<compile_context>
chip_gen: v7x
topology: tpu7x:2x2x1
jax: 0.10.0
libtpu: 0.0.40
codegen_flags: <defaults>
</compile_context>

<pallas_src>
import functools

import numpy as np

import jax
import jax.numpy as jnp
from jax.experimental import pallas as pl
from jax.experimental.pallas import tpu as pltpu

# ----------------------------- model config ---------------------------------
STATE_DIM = 6        # env.state_dim (synthetic, small)
OUT_SIZE = 5         # action space of deep_mobile_printing_2d1r
HIDDEN_SIZE = 32     # LSTM hidden size
PLAN_HW = 20         # plan image size
KSIZE = 3            # conv kernel
STRIDE = 2           # conv stride
C1_OUT = 16          # conv1 out channels
C2_OUT = 16          # conv2 out channels
C3_OUT = 32          # conv3 out channels
C1_POS = 7           # conv1 spatial positions (per side) consumed downstream
C2_POS = 3           # conv2 spatial positions (per side) consumed by conv3
SUBLANE = 8          # batch padding target (one sublane tile)


# ----------------------------- fused Pallas kernel ---------------------------
def _qnet_fused_kernel(
    # data inputs (4)
    plan_ref, x_ref, h0_ref, c0_ref,
    # parameters (18)
    m1_ref, b1_ref, m2_ref, b2_ref, m3_ref, b3_ref,
    wfc1_ref, bfc1_ref, wfc2_ref, bfc2_ref, wfc3_ref, bfc3_ref,
    wih_fc_ref, wih_cv_ref, blstm_ref, whh_ref, whead_ref, bhead_ref,
    # outputs (3)
    q_ref, hn_ref, cn_ref,
):
    f32 = jnp.float32
    Bp, H = h0_ref.shape          # (8, 32)  -- padded batch, hidden
    Np = x_ref.shape[0]           # T * Bp   (time-major: row = t*Bp + b)
    T = Np // Bp
    A = q_ref.shape[1]            # out_size

    def dot(a, b):
        return jnp.dot(a, b, preferred_element_type=f32)

    def relu(v):
        return jnp.maximum(v, 0.0)

    # ---- conv stack: three dense GEMMs (spatial gather folded into M1/M2/M3) ----
    c1 = relu(dot(plan_ref[...], m1_ref[...]) + b1_ref[...])     # (Np, 784) = 49 pos x 16 ch
    c2 = relu(dot(c1, m2_ref[...]) + b2_ref[...])                # (Np, 144) =  9 pos x 16 ch
    conv_out = relu(dot(c2, m3_ref[...]) + b3_ref[...])          # (Np,  32)

    # ---- MLP path ----
    h1 = relu(dot(x_ref[...], wfc1_ref[...]) + bfc1_ref[...])    # (Np, 64)
    h2 = relu(dot(h1, wfc2_ref[...]) + bfc2_ref[...])            # (Np, 128)
    h3 = relu(dot(h2, wfc3_ref[...]) + bfc3_ref[...])            # (Np, 128)

    # ---- LSTM input projection hoisted out of the recurrence ----
    # feature split [fc(128) | conv(32)] replaces torch.cat + single W_ih.
    gates_x = (dot(h3, wih_fc_ref[...]) + dot(conv_out, wih_cv_ref[...])
               + blstm_ref[...])                                 # (Np, 4H) i|f|g|o

    # ---- LSTM recurrence: one packed (Bp,32)x(32,128) MXU op per step ----
    whh = whh_ref[...]                                           # (H, 4H)
    h = h0_ref[...]
    c = c0_ref[...]
    for t in range(T):                     # rows t*Bp : (t+1)*Bp hold step t (tile-aligned)
        r0 = t * Bp
        pre = gates_x[r0:r0 + Bp, :] + dot(h, whh)               # (Bp, 4H), lane-dense
        i_g = jax.nn.sigmoid(pre[:, 0:H])
        f_g = jax.nn.sigmoid(pre[:, H:2 * H])
        g_g = jnp.tanh(pre[:, 2 * H:3 * H])
        o_g = jax.nn.sigmoid(pre[:, 3 * H:4 * H])
        c = f_g * c + i_g * g_g
        h = o_g * jnp.tanh(c)

    hn_ref[...] = h
    cn_ref[...] = c

    # ---- dueling head: merged [adv | val] GEMM ----
    head = dot(h, whead_ref[...]) + bhead_ref[...]               # (Bp, A+1)
    adv = head[:, 0:A]
    val = head[:, A:A + 1]
    q_ref[...] = val + adv - jnp.mean(adv, axis=1, keepdims=True)


# -------------------- one-time parameter re-layout ---------------------------
_KP_ORDER = ("m1", "b1", "m2", "b2", "m3", "b3",
             "wfc1", "bfc1", "wfc2", "bfc2", "wfc3", "bfc3",
             "wih_fc", "wih_cv", "blstm", "whh", "whead", "bhead")


def prepare_params(p):
    """Convert PyTorch-layout parameters to the fused-GEMM kernel layout (ONCE).

    The conv layers are restricted to the receptive field of the final 1x1
    conv3 output (7x7 of conv1, 3x3 of conv2) -- mathematically identical to
    the full convolutions for this network -- and the spatial gather is folded
    into dense matrices so each conv is a single GEMM inside the kernel.
    """
    H = HIDDEN_SIZE
    w1 = np.asarray(p["conv1_w"], np.float32)   # (16,  1, 3, 3)  PyTorch OIHW
    w2 = np.asarray(p["conv2_w"], np.float32)   # (16, 16, 3, 3)
    w3 = np.asarray(p["conv3_w"], np.float32)   # (32, 16, 3, 3)

    # M1: plan pixel (r*20+c)  ->  conv1 column (a*7+b)*16 + o
    M1 = np.zeros((PLAN_HW * PLAN_HW, C1_POS * C1_POS * C1_OUT), np.float32)
    for a in range(C1_POS):
        for b in range(C1_POS):
            col0 = (a * C1_POS + b) * C1_OUT
            for kh in range(KSIZE):
                for kw in range(KSIZE):
                    pix = (STRIDE * a + kh) * PLAN_HW + (STRIDE * b + kw)
                    M1[pix, col0:col0 + C1_OUT] += w1[:, 0, kh, kw]
    b1t = np.tile(np.asarray(p["conv1_b"], np.float32), C1_POS * C1_POS)[None, :]

    # M2: conv1 column (a*7+b)*16 + cin  ->  conv2 column (i*3+j)*16 + o2
    M2 = np.zeros((C1_POS * C1_POS * C1_OUT, C2_POS * C2_POS * C2_OUT), np.float32)
    for i in range(C2_POS):
        for j in range(C2_POS):
            cc0 = (i * C2_POS + j) * C2_OUT
            for kh in range(KSIZE):
                for kw in range(KSIZE):
                    a, b = STRIDE * i + kh, STRIDE * j + kw
                    rr0 = (a * C1_POS + b) * C1_OUT
                    M2[rr0:rr0 + C1_OUT, cc0:cc0 + C2_OUT] += w2[:, :, kh, kw].T
    b2t = np.tile(np.asarray(p["conv2_b"], np.float32), C2_POS * C2_POS)[None, :]

    # M3: conv2 column (i*3+j)*16 + cin  ->  conv3 channel o3 (single 1x1 output)
    M3 = np.zeros((C2_POS * C2_POS * C2_OUT, C3_OUT), np.float32)
    for i in range(C2_POS):
        for j in range(C2_POS):
            rr0 = (i * C2_POS + j) * C2_OUT
            M3[rr0:rr0 + C2_OUT, :] = w3[:, :, i, j].T
    b3 = np.asarray(p["conv3_b"], np.float32)[None, :]

    wih_t = np.asarray(p["lstm_wih"], np.float32).T              # (160, 4H), gates i|f|g|o
    whh_packed = np.asarray(p["lstm_whh"], np.float32).T         # (H, 4H)   packed
    blstm = (np.asarray(p["lstm_bih"], np.float32)
             + np.asarray(p["lstm_bhh"], np.float32))[None, :]

    whead = np.concatenate([np.asarray(p["adv_w"], np.float32),
                            np.asarray(p["val_w"], np.float32)], axis=1)   # (H, OUT+1)
    bhead = np.concatenate([np.asarray(p["adv_b"], np.float32),
                            np.asarray(p["val_b"], np.float32)])[None, :]

    out = {
        "m1": M1, "b1": b1t, "m2": M2, "b2": b2t, "m3": M3, "b3": b3,
        "wfc1": np.asarray(p["fc1_w"], np.float32),
        "bfc1": np.asarray(p["fc1_b"], np.float32)[None, :],
        "wfc2": np.asarray(p["fc2_w"], np.float32),
        "bfc2": np.asarray(p["fc2_b"], np.float32)[None, :],
        "wfc3": np.asarray(p["fc3_w"], np.float32),
        "bfc3": np.asarray(p["fc3_b"], np.float32)[None, :],
        "wih_fc": wih_t[:128, :],                                # (128, 4H)
        "wih_cv": wih_t[128:, :],                                # (32, 4H)
        "blstm": blstm, "whh": whh_packed,
        "whead": whead, "bhead": bhead,
    }
    return {k: jnp.asarray(v) for k, v in out.items()}


# ----------------------------- jitted forward --------------------------------
@functools.partial(jax.jit, static_argnums=(3, 4))
def q_net_forward(kparams, x, plan, bsize, time_step, hidden_state, cell_state):
    """Mirrors Q_NET.forward.  x: (B, T, STATE_DIM), plan: (B, T, 20, 20),
    hidden/cell: (1, B, H).  Returns (qout (B, OUT_SIZE), (h_n, c_n))."""
    B, T = bsize, time_step
    Bp = max(SUBLANE, ((B + SUBLANE - 1) // SUBLANE) * SUBLANE)  # pad batch to sublane tile
    Np = T * Bp
    H = HIDDEN_SIZE

    # time-major sample order (row = t*Bp + b), batch padded with zeros so every
    # per-step row slice inside the kernel is sublane-tile aligned.
    x_tb = jnp.transpose(x.astype(jnp.float32).reshape(B, T, STATE_DIM), (1, 0, 2))
    x_tb = jnp.pad(x_tb, ((0, 0), (0, Bp - B), (0, 0))).reshape(Np, STATE_DIM)

    plan_tb = jnp.transpose(
        plan.astype(jnp.float32).reshape(B, T, PLAN_HW * PLAN_HW), (1, 0, 2))
    plan_tb = jnp.pad(plan_tb, ((0, 0), (0, Bp - B), (0, 0))).reshape(Np, PLAN_HW * PLAN_HW)

    h0 = jnp.pad(hidden_state.reshape(B, H).astype(jnp.float32), ((0, Bp - B), (0, 0)))
    c0 = jnp.pad(cell_state.reshape(B, H).astype(jnp.float32), ((0, Bp - B), (0, 0)))

    q, h_n, c_n = pl.pallas_call(
        _qnet_fused_kernel,
        out_shape=(
            jax.ShapeDtypeStruct((Bp, OUT_SIZE), jnp.float32),
            jax.ShapeDtypeStruct((Bp, H), jnp.float32),
            jax.ShapeDtypeStruct((Bp, H), jnp.float32),
        ),
        compiler_params=pltpu.CompilerParams(
            # weights + activations are ~3 MB here; explicit headroom for larger B*T.
            vmem_limit_bytes=32 * 1024 * 1024),
    )(plan_tb, x_tb, h0, c0, *[kparams[k] for k in _KP_ORDER])

    return q[:B], (h_n[:B].reshape(1, B, H), c_n[:B].reshape(1, B, H))


# ----------------------------- pure-JAX reference ----------------------------
def q_net_reference(params, x, plan, bsize, time_step, hidden_state, cell_state):
    """Direct NCHW translation of the PyTorch forward (for the self-check)."""
    N = bsize * time_step
    H = HIDDEN_SIZE
    with jax.default_matmul_precision("highest"):
        img = plan.reshape(N, 1, PLAN_HW, PLAN_HW).astype(jnp.float32)

        def conv(v, w, b):
            y = jax.lax.conv_general_dilated(
                v, w, window_strides=(STRIDE, STRIDE), padding="VALID",
                dimension_numbers=("NCHW", "OIHW", "NCHW"))
            return jax.nn.relu(y + b.reshape(1, -1, 1, 1))

        c = conv(img, params["conv1_w"], params["conv1_b"])
        c = conv(c, params["conv2_w"], params["conv2_b"])
        c = conv(c, params["conv3_w"], params["conv3_b"])
        conv_out = c.reshape(N, C3_OUT)

        xf = x.reshape(N, STATE_DIM).astype(jnp.float32)
        xf = jax.nn.relu(xf @ params["fc1_w"] + params["fc1_b"])
        xf = jax.nn.relu(xf @ params["fc2_w"] + params["fc2_b"])
        xf = jax.nn.relu(xf @ params["fc3_w"] + params["fc3_b"])

        feat = jnp.concatenate([xf, conv_out], axis=1).reshape(bsize, time_step, 128 + 32)
        h = hidden_state.reshape(bsize, H).astype(jnp.float32)
        cs = cell_state.reshape(bsize, H).astype(jnp.float32)
        wih, whh = params["lstm_wih"], params["lstm_whh"]
        b = params["lstm_bih"] + params["lstm_bhh"]
        for t in range(time_step):
            g = feat[:, t, :] @ wih.T + h @ whh.T + b
            i = jax.nn.sigmoid(g[:, 0:H])
            f = jax.nn.sigmoid(g[:, H:2 * H])
            gg = jnp.tanh(g[:, 2 * H:3 * H])
            o = jax.nn.sigmoid(g[:, 3 * H:4 * H])
            cs = f * cs + i * gg
            h = o * jnp.tanh(cs)

        adv = h @ params["adv_w"] + params["adv_b"]
        val = h @ params["val_w"] + params["val_b"]
        q = val + adv - jnp.mean(adv, axis=1, keepdims=True)
    return q, h, cs


# ----------------------------- params (PyTorch layout) -----------------------
def init_params(key):
    ks = jax.random.split(key, 20)
    n = lambda k, shape: (0.1 * jax.random.normal(k, shape)).astype(jnp.float32)
    H, D_LSTM = HIDDEN_SIZE, 128 + 32
    return {
        # conv weights in PyTorch layout (O, C, kh, kw)
        "conv1_w": n(ks[0], (16, 1, 3, 3)),  "conv1_b": n(ks[1], (16,)),
        "conv2_w": n(ks[2], (16, 16, 3, 3)), "conv2_b": n(ks[3], (16,)),
        "conv3_w": n(ks[4], (32, 16, 3, 3)), "conv3_b": n(ks[5], (32,)),
        # fully connected (stored already transposed: (in, out))
        "fc1_w": n(ks[6], (STATE_DIM, 64)),  "fc1_b": n(ks[7], (64,)),
        "fc2_w": n(ks[8], (64, 128)),        "fc2_b": n(ks[9], (128,)),
        "fc3_w": n(ks[10], (128, 128)),      "fc3_b": n(ks[11], (128,)),
        # LSTM (PyTorch: W_ih (4H, D), W_hh (4H, H), b_ih, b_hh (4H,))
        "lstm_wih": n(ks[12], (4 * H, D_LSTM)),
        "lstm_whh": n(ks[13], (4 * H, H)),
        "lstm_bih": n(ks[14], (4 * H,)),
        "lstm_bhh": n(ks[15], (4 * H,)),
        # dueling heads
        "adv_w": n(ks[16], (H, OUT_SIZE)),   "adv_b": n(ks[17], (OUT_SIZE,)),
        "val_w": n(ks[18], (H, 1)),          "val_b": n(ks[19], (1,)),
    }


# --------------------------------- main ---------------------------------------
if __name__ == "__main__":
    bsize, time_step = 2, 8
    key = jax.random.PRNGKey(0)
    k_param, k_x, k_plan = jax.random.split(key, 3)

    params = init_params(k_param)
    kparams = prepare_params(params)   # one-time kernel-layout conversion

    x = jax.random.normal(k_x, (bsize, time_step, STATE_DIM), dtype=jnp.float32)
    plan = jax.random.normal(k_plan, (bsize, time_step, PLAN_HW, PLAN_HW),
                             dtype=jnp.float32)
    hidden_state = jnp.zeros((1, bsize, HIDDEN_SIZE), dtype=jnp.float32)
    cell_state = jnp.zeros((1, bsize, HIDDEN_SIZE), dtype=jnp.float32)

    qout, (h_n, c_n) = q_net_forward(kparams, x, plan, bsize, time_step,
                                     hidden_state, cell_state)
    jax.block_until_ready((qout, h_n, c_n))

    assert qout.shape == (bsize, OUT_SIZE)
    assert h_n.shape == (1, bsize, HIDDEN_SIZE)
    assert c_n.shape == (1, bsize, HIDDEN_SIZE)

    # correctness self-check against a plain-JAX (XLA) reference of the
    # PyTorch forward
    q_ref, h_ref, c_ref = q_net_reference(params, x, plan, bsize, time_step,
                                          hidden_state, cell_state)
    assert jnp.allclose(qout, q_ref, rtol=1e-3, atol=1e-3)
    assert jnp.allclose(h_n[0], h_ref, rtol=1e-3, atol=1e-3)
    assert jnp.allclose(c_n[0], c_ref, rtol=1e-3, atol=1e-3)

    print("KERNEL_OK")
</pallas_src>

<mosaic_0001>
module attributes {stable_mosaic.version = 11 : i64} {
  func.func @_qnet_fused_kernel(%arg0: memref<64x400xf32, #tpu.memory_space<vmem>>, %arg1: memref<64x6xf32, #tpu.memory_space<vmem>>, %arg2: memref<8x32xf32, #tpu.memory_space<vmem>>, %arg3: memref<8x32xf32, #tpu.memory_space<vmem>>, %arg4: memref<400x784xf32, #tpu.memory_space<vmem>>, %arg5: memref<1x784xf32, #tpu.memory_space<vmem>>, %arg6: memref<784x144xf32, #tpu.memory_space<vmem>>, %arg7: memref<1x144xf32, #tpu.memory_space<vmem>>, %arg8: memref<144x32xf32, #tpu.memory_space<vmem>>, %arg9: memref<1x32xf32, #tpu.memory_space<vmem>>, %arg10: memref<6x64xf32, #tpu.memory_space<vmem>>, %arg11: memref<1x64xf32, #tpu.memory_space<vmem>>, %arg12: memref<64x128xf32, #tpu.memory_space<vmem>>, %arg13: memref<1x128xf32, #tpu.memory_space<vmem>>, %arg14: memref<128x128xf32, #tpu.memory_space<vmem>>, %arg15: memref<1x128xf32, #tpu.memory_space<vmem>>, %arg16: memref<128x128xf32, #tpu.memory_space<vmem>>, %arg17: memref<32x128xf32, #tpu.memory_space<vmem>>, %arg18: memref<1x128xf32, #tpu.memory_space<vmem>>, %arg19: memref<32x128xf32, #tpu.memory_space<vmem>>, %arg20: memref<32x6xf32, #tpu.memory_space<vmem>>, %arg21: memref<1x6xf32, #tpu.memory_space<vmem>>, %arg22: memref<8x5xf32, #tpu.memory_space<vmem>>, %arg23: memref<8x32xf32, #tpu.memory_space<vmem>>, %arg24: memref<8x32xf32, #tpu.memory_space<vmem>>) attributes {dimension_semantics = [], scalar_prefetch = 0 : i64, scratch_operands = 0 : i64, tpu.core_type = #tpu.core_type<tc>} {
    %c0 = arith.constant 0 : index
    %c0_0 = arith.constant 0 : index
    %0 = vector.load %arg0[%c0, %c0_0] : memref<64x400xf32, #tpu.memory_space<vmem>>, vector<64x400xf32>
    %c0_1 = arith.constant 0 : index
    %c0_2 = arith.constant 0 : index
    %1 = vector.load %arg4[%c0_1, %c0_2] : memref<400x784xf32, #tpu.memory_space<vmem>>, vector<400x784xf32>
    %cst = arith.constant dense<0.000000e+00> : vector<64x784xf32>
    %2 = tpu.matmul %0, %1, %cst {dimension_numbers = #tpu.dot_dimension_numbers<[1], [0], [0], [1], [0, 0, 1, 1], [], []>} : vector<64x400xf32>, vector<400x784xf32>, vector<64x784xf32> -> vector<64x784xf32>
    %c0_3 = arith.constant 0 : index
    %c0_4 = arith.constant 0 : index
    %3 = vector.load %arg5[%c0_3, %c0_4] : memref<1x784xf32, #tpu.memory_space<vmem>>, vector<1x784xf32>
    %4 = vector.broadcast %3 : vector<1x784xf32> to vector<64x784xf32>
    %5 = arith.addf %2, %4 : vector<64x784xf32>
    %cst_5 = arith.constant 0.000000e+00 : f32
    %6 = vector.broadcast %cst_5 : f32 to vector<64x784xf32>
    %7 = arith.maximumf %5, %6 : vector<64x784xf32>
    %c0_6 = arith.constant 0 : index
    %c0_7 = arith.constant 0 : index
    %8 = vector.load %arg6[%c0_6, %c0_7] : memref<784x144xf32, #tpu.memory_space<vmem>>, vector<784x144xf32>
    %cst_8 = arith.constant dense<0.000000e+00> : vector<64x144xf32>
    %9 = tpu.matmul %7, %8, %cst_8 {dimension_numbers = #tpu.dot_dimension_numbers<[1], [0], [0], [1], [0, 0, 1, 1], [], []>} : vector<64x784xf32>, vector<784x144xf32>, vector<64x144xf32> -> vector<64x144xf32>
    %c0_9 = arith.constant 0 : index
    %c0_10 = arith.constant 0 : index
    %10 = vector.load %arg7[%c0_9, %c0_10] : memref<1x144xf32, #tpu.memory_space<vmem>>, vector<1x144xf32>
    %11 = vector.broadcast %10 : vector<1x144xf32> to vector<64x144xf32>
    %12 = arith.addf %9, %11 : vector<64x144xf32>
    %cst_11 = arith.constant 0.000000e+00 : f32
    %13 = vector.broadcast %cst_11 : f32 to vector<64x144xf32>
    %14 = arith.maximumf %12, %13 : vector<64x144xf32>
    %c0_12 = arith.constant 0 : index
    %c0_13 = arith.constant 0 : index
    %15 = vector.load %arg8[%c0_12, %c0_13] : memref<144x32xf32, #tpu.memory_space<vmem>>, vector<144x32xf32>
    %cst_14 = arith.constant dense<0.000000e+00> : vector<64x32xf32>
    %16 = tpu.matmul %14, %15, %cst_14 {dimension_numbers = #tpu.dot_dimension_numbers<[1], [0], [0], [1], [0, 0, 1, 1], [], []>} : vector<64x144xf32>, vector<144x32xf32>, vector<64x32xf32> -> vector<64x32xf32>
    %c0_15 = arith.constant 0 : index
    %c0_16 = arith.constant 0 : index
    %17 = vector.load %arg9[%c0_15, %c0_16] : memref<1x32xf32, #tpu.memory_space<vmem>>, vector<1x32xf32>
    %18 = vector.broadcast %17 : vector<1x32xf32> to vector<64x32xf32>
    %19 = arith.addf %16, %18 : vector<64x32xf32>
    %cst_17 = arith.constant 0.000000e+00 : f32
    %20 = vector.broadcast %cst_17 : f32 to vector<64x32xf32>
    %21 = arith.maximumf %19, %20 : vector<64x32xf32>
    %c0_18 = arith.constant 0 : index
    %c0_19 = arith.constant 0 : index
    %22 = vector.load %arg1[%c0_18, %c0_19] : memref<64x6xf32, #tpu.memory_space<vmem>>, vector<64x6xf32>
    %c0_20 = arith.constant 0 : index
    %c0_21 = arith.constant 0 : index
    %23 = vector.load %arg10[%c0_20, %c0_21] : memref<6x64xf32, #tpu.memory_space<vmem>>, vector<6x64xf32>
    %cst_22 = arith.constant dense<0.000000e+00> : vector<64x64xf32>
    %24 = tpu.matmul %22, %23, %cst_22 {dimension_numbers = #tpu.dot_dimension_numbers<[1], [0], [0], [1], [0, 0, 1, 1], [], []>} : vector<64x6xf32>, vector<6x64xf32>, vector<64x64xf32> -> vector<64x64xf32>
    %c0_23 = arith.constant 0 : index
    %c0_24 = arith.constant 0 : index
    %25 = vector.load %arg11[%c0_23, %c0_24] : memref<1x64xf32, #tpu.memory_space<vmem>>, vector<1x64xf32>
    %26 = vector.broadcast %25 : vector<1x64xf32> to vector<64x64xf32>
    %27 = arith.addf %24, %26 : vector<64x64xf32>
    %cst_25 = arith.constant 0.000000e+00 : f32
    %28 = vector.broadcast %cst_25 : f32 to vector<64x64xf32>
    %29 = arith.maximumf %27, %28 : vector<64x64xf32>
    %c0_26 = arith.constant 0 : index
    %c0_27 = arith.constant 0 : index
    %30 = vector.load %arg12[%c0_26, %c0_27] : memref<64x128xf32, #tpu.memory_space<vmem>>, vector<64x128xf32>
    %cst_28 = arith.constant dense<0.000000e+00> : vector<64x128xf32>
    %31 = tpu.matmul %29, %30, %cst_28 {dimension_numbers = #tpu.dot_dimension_numbers<[1], [0], [0], [1], [0, 0, 1, 1], [], []>} : vector<64x64xf32>, vector<64x128xf32>, vector<64x128xf32> -> vector<64x128xf32>
    %c0_29 = arith.constant 0 : index
    %c0_30 = arith.constant 0 : index
    %32 = vector.load %arg13[%c0_29, %c0_30] : memref<1x128xf32, #tpu.memory_space<vmem>>, vector<1x128xf32>
    %33 = vector.broadcast %32 : vector<1x128xf32> to vector<64x128xf32>
    %34 = arith.addf %31, %33 : vector<64x128xf32>
    %cst_31 = arith.constant 0.000000e+00 : f32
    %35 = vector.broadcast %cst_31 : f32 to vector<64x128xf32>
    %36 = arith.maximumf %34, %35 : vector<64x128xf32>
    %c0_32 = arith.constant 0 : index
    %c0_33 = arith.constant 0 : index
    %37 = vector.load %arg14[%c0_32, %c0_33] : memref<128x128xf32, #tpu.memory_space<vmem>>, vector<128x128xf32>
    %cst_34 = arith.constant dense<0.000000e+00> : vector<64x128xf32>
    %38 = tpu.matmul %36, %37, %cst_34 {dimension_numbers = #tpu.dot_dimension_numbers<[1], [0], [0], [1], [0, 0, 1, 1], [], []>} : vector<64x128xf32>, vector<128x128xf32>, vector<64x128xf32> -> vector<64x128xf32>
    %c0_35 = arith.constant 0 : index
    %c0_36 = arith.constant 0 : index
    %39 = vector.load %arg15[%c0_35, %c0_36] : memref<1x128xf32, #tpu.memory_space<vmem>>, vector<1x128xf32>
    %40 = vector.broadcast %39 : vector<1x128xf32> to vector<64x128xf32>
    %41 = arith.addf %38, %40 : vector<64x128xf32>
    %cst_37 = arith.constant 0.000000e+00 : f32
    %42 = vector.broadcast %cst_37 : f32 to vector<64x128xf32>
    %43 = arith.maximumf %41, %42 : vector<64x128xf32>
    %c0_38 = arith.constant 0 : index
    %c0_39 = arith.constant 0 : index
    %44 = vector.load %arg16[%c0_38, %c0_39] : memref<128x128xf32, #tpu.memory_space<vmem>>, vector<128x128xf32>
    %cst_40 = arith.constant dense<0.000000e+00> : vector<64x128xf32>
    %45 = tpu.matmul %43, %44, %cst_40 {dimension_numbers = #tpu.dot_dimension_numbers<[1], [0], [0], [1], [0, 0, 1, 1], [], []>} : vector<64x128xf32>, vector<128x128xf32>, vector<64x128xf32> -> vector<64x128xf32>
    %c0_41 = arith.constant 0 : index
    %c0_42 = arith.constant 0 : index
    %46 = vector.load %arg17[%c0_41, %c0_42] : memref<32x128xf32, #tpu.memory_space<vmem>>, vector<32x128xf32>
    %cst_43 = arith.constant dense<0.000000e+00> : vector<64x128xf32>
    %47 = tpu.matmul %21, %46, %cst_43 {dimension_numbers = #tpu.dot_dimension_numbers<[1], [0], [0], [1], [0, 0, 1, 1], [], []>} : vector<64x32xf32>, vector<32x128xf32>, vector<64x128xf32> -> vector<64x128xf32>
    %48 = arith.addf %45, %47 : vector<64x128xf32>
    %c0_44 = arith.constant 0 : index
    %c0_45 = arith.constant 0 : index
    %49 = vector.load %arg18[%c0_44, %c0_45] : memref<1x128xf32, #tpu.memory_space<vmem>>, vector<1x128xf32>
    %50 = vector.broadcast %49 : vector<1x128xf32> to vector<64x128xf32>
    %51 = arith.addf %48, %50 : vector<64x128xf32>
    %c0_46 = arith.constant 0 : index
    %c0_47 = arith.constant 0 : index
    %52 = vector.load %arg19[%c0_46, %c0_47] : memref<32x128xf32, #tpu.memory_space<vmem>>, vector<32x128xf32>
    %c0_48 = arith.constant 0 : index
    %c0_49 = arith.constant 0 : index
    %53 = vector.load %arg2[%c0_48, %c0_49] : memref<8x32xf32, #tpu.memory_space<vmem>>, vector<8x32xf32>
    %c0_50 = arith.constant 0 : index
    %c0_51 = arith.constant 0 : index
    %54 = vector.load %arg3[%c0_50, %c0_51] : memref<8x32xf32, #tpu.memory_space<vmem>>, vector<8x32xf32>
    %55 = vector.extract_strided_slice %51 {offsets = [0, 0], sizes = [8, 128], strides = [1, 1]} : vector<64x128xf32> to vector<8x128xf32>
    %cst_52 = arith.constant dense<0.000000e+00> : vector<8x128xf32>
    %56 = tpu.matmul %53, %52, %cst_52 {dimension_numbers = #tpu.dot_dimension_numbers<[1], [0], [0], [1], [0, 0, 1, 1], [], []>} : vector<8x32xf32>, vector<32x128xf32>, vector<8x128xf32> -> vector<8x128xf32>
    %57 = arith.addf %55, %56 : vector<8x128xf32>
    %58 = vector.extract_strided_slice %57 {offsets = [0, 0], sizes = [8, 32], strides = [1, 1]} : vector<8x128xf32> to vector<8x32xf32>
    %59 = arith.negf %58 : vector<8x32xf32>
    %60 = math.exp %59 : vector<8x32xf32>
    %cst_53 = arith.constant 1.000000e+00 : f32
    %61 = vector.broadcast %cst_53 : f32 to vector<8x32xf32>
    %62 = arith.addf %61, %60 : vector<8x32xf32>
    %63 = arith.divf %61, %62 : vector<8x32xf32>
    %64 = vector.extract_strided_slice %57 {offsets = [0, 32], sizes = [8, 32], strides = [1, 1]} : vector<8x128xf32> to vector<8x32xf32>
    %65 = arith.negf %64 : vector<8x32xf32>
    %66 = math.exp %65 : vector<8x32xf32>
    %cst_54 = arith.constant 1.000000e+00 : f32
    %67 = vector.broadcast %cst_54 : f32 to vector<8x32xf32>
    %68 = arith.addf %67, %66 : vector<8x32xf32>
    %69 = arith.divf %67, %68 : vector<8x32xf32>
    %70 = vector.extract_strided_slice %57 {offsets = [0, 64], sizes = [8, 32], strides = [1, 1]} : vector<8x128xf32> to vector<8x32xf32>
    %71 = math.tanh %70 : vector<8x32xf32>
    %72 = vector.extract_strided_slice %57 {offsets = [0, 96], sizes = [8, 32], strides = [1, 1]} : vector<8x128xf32> to vector<8x32xf32>
    %73 = arith.negf %72 : vector<8x32xf32>
    %74 = math.exp %73 : vector<8x32xf32>
    %cst_55 = arith.constant 1.000000e+00 : f32
    %75 = vector.broadcast %cst_55 : f32 to vector<8x32xf32>
    %76 = arith.addf %75, %74 : vector<8x32xf32>
    %77 = arith.divf %75, %76 : vector<8x32xf32>
    %78 = arith.mulf %69, %54 : vector<8x32xf32>
    %79 = arith.mulf %63, %71 : vector<8x32xf32>
    %80 = arith.addf %78, %79 : vector<8x32xf32>
    %81 = math.tanh %80 : vector<8x32xf32>
    %82 = arith.mulf %77, %81 : vector<8x32xf32>
    %83 = vector.extract_strided_slice %51 {offsets = [8, 0], sizes = [8, 128], strides = [1, 1]} : vector<64x128xf32> to vector<8x128xf32>
    %cst_56 = arith.constant dense<0.000000e+00> : vector<8x128xf32>
    %84 = tpu.matmul %82, %52, %cst_56 {dimension_numbers = #tpu.dot_dimension_numbers<[1], [0], [0], [1], [0, 0, 1, 1], [], []>} : vector<8x32xf32>, vector<32x128xf32>, vector<8x128xf32> -> vector<8x128xf32>
    %85 = arith.addf %83, %84 : vector<8x128xf32>
    %86 = vector.extract_strided_slice %85 {offsets = [0, 0], sizes = [8, 32], strides = [1, 1]} : vector<8x128xf32> to vector<8x32xf32>
    %87 = arith.negf %86 : vector<8x32xf32>
    %88 = math.exp %87 : vector<8x32xf32>
    %cst_57 = arith.constant 1.000000e+00 : f32
    %89 = vector.broadcast %cst_57 : f32 to vector<8x32xf32>
    %90 = arith.addf %89, %88 : vector<8x32xf32>
    %91 = arith.divf %89, %90 : vector<8x32xf32>
    %92 = vector.extract_strided_slice %85 {offsets = [0, 32], sizes = [8, 32], strides = [1, 1]} : vector<8x128xf32> to vector<8x32xf32>
    %93 = arith.negf %92 : vector<8x32xf32>
    %94 = math.exp %93 : vector<8x32xf32>
    %cst_58 = arith.constant 1.000000e+00 : f32
    %95 = vector.broadcast %cst_58 : f32 to vector<8x32xf32>
    %96 = arith.addf %95, %94 : vector<8x32xf32>
    %97 = arith.divf %95, %96 : vector<8x32xf32>
    %98 = vector.extract_strided_slice %85 {offsets = [0, 64], sizes = [8, 32], strides = [1, 1]} : vector<8x128xf32> to vector<8x32xf32>
    %99 = math.tanh %98 : vector<8x32xf32>
    %100 = vector.extract_strided_slice %85 {offsets = [0, 96], sizes = [8, 32], strides = [1, 1]} : vector<8x128xf32> to vector<8x32xf32>
    %101 = arith.negf %100 : vector<8x32xf32>
    %102 = math.exp %101 : vector<8x32xf32>
    %cst_59 = arith.constant 1.000000e+00 : f32
    %103 = vector.broadcast %cst_59 : f32 to vector<8x32xf32>
    %104 = arith.addf %103, %102 : vector<8x32xf32>
    %105 = arith.divf %103, %104 : vector<8x32xf32>
    %106 = arith.mulf %97, %80 : vector<8x32xf32>
    %107 = arith.mulf %91, %99 : vector<8x32xf32>
    %108 = arith.addf %106, %107 : vector<8x32xf32>
    %109 = math.tanh %108 : vector<8x32xf32>
    %110 = arith.mulf %105, %109 : vector<8x32xf32>
    %111 = vector.extract_strided_slice %51 {offsets = [16, 0], sizes = [8, 128], strides = [1, 1]} : vector<64x128xf32> to vector<8x128xf32>
    %cst_60 = arith.constant dense<0.000000e+00> : vector<8x128xf32>
    %112 = tpu.matmul %110, %52, %cst_60 {dimension_numbers = #tpu.dot_dimension_numbers<[1], [0], [0], [1], [0, 0, 1, 1], [], []>} : vector<8x32xf32>, vector<32x128xf32>, vector<8x128xf32> -> vector<8x128xf32>
    %113 = arith.addf %111, %112 : vector<8x128xf32>
    %114 = vector.extract_strided_slice %113 {offsets = [0, 0], sizes = [8, 32], strides = [1, 1]} : vector<8x128xf32> to vector<8x32xf32>
    %115 = arith.negf %114 : vector<8x32xf32>
    %116 = math.exp %115 : vector<8x32xf32>
    %cst_61 = arith.constant 1.000000e+00 : f32
    %117 = vector.broadcast %cst_61 : f32 to vector<8x32xf32>
    %118 = arith.addf %117, %116 : vector<8x32xf32>
    %119 = arith.divf %117, %118 : vector<8x32xf32>
    %120 = vector.extract_strided_slice %113 {offsets = [0, 32], sizes = [8, 32], strides = [1, 1]} : vector<8x128xf32> to vector<8x32xf32>
    %121 = arith.negf %120 : vector<8x32xf32>
    %122 = math.exp %121 : vector<8x32xf32>
    %cst_62 = arith.constant 1.000000e+00 : f32
    %123 = vector.broadcast %cst_62 : f32 to vector<8x32xf32>
    %124 = arith.addf %123, %122 : vector<8x32xf32>
    %125 = arith.divf %123, %124 : vector<8x32xf32>
    %126 = vector.extract_strided_slice %113 {offsets = [0, 64], sizes = [8, 32], strides = [1, 1]} : vector<8x128xf32> to vector<8x32xf32>
    %127 = math.tanh %126 : vector<8x32xf32>
    %128 = vector.extract_strided_slice %113 {offsets = [0, 96], sizes = [8, 32], strides = [1, 1]} : vector<8x128xf32> to vector<8x32xf32>
    %129 = arith.negf %128 : vector<8x32xf32>
    %130 = math.exp %129 : vector<8x32xf32>
    %cst_63 = arith.constant 1.000000e+00 : f32
    %131 = vector.broadcast %cst_63 : f32 to vector<8x32xf32>
    %132 = arith.addf %131, %130 : vector<8x32xf32>
    %133 = arith.divf %131, %132 : vector<8x32xf32>
    %134 = arith.mulf %125, %108 : vector<8x32xf32>
    %135 = arith.mulf %119, %127 : vector<8x32xf32>
    %136 = arith.addf %134, %135 : vector<8x32xf32>
    %137 = math.tanh %136 : vector<8x32xf32>
    %138 = arith.mulf %133, %137 : vector<8x32xf32>
    %139 = vector.extract_strided_slice %51 {offsets = [24, 0], sizes = [8, 128], strides = [1, 1]} : vector<64x128xf32> to vector<8x128xf32>
    %cst_64 = arith.constant dense<0.000000e+00> : vector<8x128xf32>
    %140 = tpu.matmul %138, %52, %cst_64 {dimension_numbers = #tpu.dot_dimension_numbers<[1], [0], [0], [1], [0, 0, 1, 1], [], []>} : vector<8x32xf32>, vector<32x128xf32>, vector<8x128xf32> -> vector<8x128xf32>
    %141 = arith.addf %139, %140 : vector<8x128xf32>
    %142 = vector.extract_strided_slice %141 {offsets = [0, 0], sizes = [8, 32], strides = [1, 1]} : vector<8x128xf32> to vector<8x32xf32>
    %143 = arith.negf %142 : vector<8x32xf32>
    %144 = math.exp %143 : vector<8x32xf32>
    %cst_65 = arith.constant 1.000000e+00 : f32
    %145 = vector.broadcast %cst_65 : f32 to vector<8x32xf32>
    %146 = arith.addf %145, %144 : vector<8x32xf32>
    %147 = arith.divf %145, %146 : vector<8x32xf32>
    %148 = vector.extract_strided_slice %141 {offsets = [0, 32], sizes = [8, 32], strides = [1, 1]} : vector<8x128xf32> to vector<8x32xf32>
    %149 = arith.negf %148 : vector<8x32xf32>
    %150 = math.exp %149 : vector<8x32xf32>
    %cst_66 = arith.constant 1.000000e+00 : f32
    %151 = vector.broadcast %cst_66 : f32 to vector<8x32xf32>
    %152 = arith.addf %151, %150 : vector<8x32xf32>
    %153 = arith.divf %151, %152 : vector<8x32xf32>
    %154 = vector.extract_strided_slice %141 {offsets = [0, 64], sizes = [8, 32], strides = [1, 1]} : vector<8x128xf32> to vector<8x32xf32>
    %155 = math.tanh %154 : vector<8x32xf32>
    %156 = vector.extract_strided_slice %141 {offsets = [0, 96], sizes = [8, 32], strides = [1, 1]} : vector<8x128xf32> to vector<8x32xf32>
    %157 = arith.negf %156 : vector<8x32xf32>
    %158 = math.exp %157 : vector<8x32xf32>
    %cst_67 = arith.constant 1.000000e+00 : f32
    %159 = vector.broadcast %cst_67 : f32 to vector<8x32xf32>
    %160 = arith.addf %159, %158 : vector<8x32xf32>
    %161 = arith.divf %159, %160 : vector<8x32xf32>
    %162 = arith.mulf %153, %136 : vector<8x32xf32>
    %163 = arith.mulf %147, %155 : vector<8x32xf32>
    %164 = arith.addf %162, %163 : vector<8x32xf32>
    %165 = math.tanh %164 : vector<8x32xf32>
    %166 = arith.mulf %161, %165 : vector<8x32xf32>
    %167 = vector.extract_strided_slice %51 {offsets = [32, 0], sizes = [8, 128], strides = [1, 1]} : vector<64x128xf32> to vector<8x128xf32>
    %cst_68 = arith.constant dense<0.000000e+00> : vector<8x128xf32>
    %168 = tpu.matmul %166, %52, %cst_68 {dimension_numbers = #tpu.dot_dimension_numbers<[1], [0], [0], [1], [0, 0, 1, 1], [], []>} : vector<8x32xf32>, vector<32x128xf32>, vector<8x128xf32> -> vector<8x128xf32>
    %169 = arith.addf %167, %168 : vector<8x128xf32>
    %170 = vector.extract_strided_slice %169 {offsets = [0, 0], sizes = [8, 32], strides = [1, 1]} : vector<8x128xf32> to vector<8x32xf32>
    %171 = arith.negf %170 : vector<8x32xf32>
    %172 = math.exp %171 : vector<8x32xf32>
    %cst_69 = arith.constant 1.000000e+00 : f32
    %173 = vector.broadcast %cst_69 : f32 to vector<8x32xf32>
    %174 = arith.addf %173, %172 : vector<8x32xf32>
    %175 = arith.divf %173, %174 : vector<8x32xf32>
    %176 = vector.extract_strided_slice %169 {offsets = [0, 32], sizes = [8, 32], strides = [1, 1]} : vector<8x128xf32> to vector<8x32xf32>
    %177 = arith.negf %176 : vector<8x32xf32>
    %178 = math.exp %177 : vector<8x32xf32>
    %cst_70 = arith.constant 1.000000e+00 : f32
    %179 = vector.broadcast %cst_70 : f32 to vector<8x32xf32>
    %180 = arith.addf %179, %178 : vector<8x32xf32>
    %181 = arith.divf %179, %180 : vector<8x32xf32>
    %182 = vector.extract_strided_slice %169 {offsets = [0, 64], sizes = [8, 32], strides = [1, 1]} : vector<8x128xf32> to vector<8x32xf32>
    %183 = math.tanh %182 : vector<8x32xf32>
    %184 = vector.extract_strided_slice %169 {offsets = [0, 96], sizes = [8, 32], strides = [1, 1]} : vector<8x128xf32> to vector<8x32xf32>
    %185 = arith.negf %184 : vector<8x32xf32>
    %186 = math.exp %185 : vector<8x32xf32>
    %cst_71 = arith.constant 1.000000e+00 : f32
    %187 = vector.broadcast %cst_71 : f32 to vector<8x32xf32>
    %188 = arith.addf %187, %186 : vector<8x32xf32>
    %189 = arith.divf %187, %188 : vector<8x32xf32>
    %190 = arith.mulf %181, %164 : vector<8x32xf32>
    %191 = arith.mulf %175, %183 : vector<8x32xf32>
    %192 = arith.addf %190, %191 : vector<8x32xf32>
    %193 = math.tanh %192 : vector<8x32xf32>
    %194 = arith.mulf %189, %193 : vector<8x32xf32>
    %195 = vector.extract_strided_slice %51 {offsets = [40, 0], sizes = [8, 128], strides = [1, 1]} : vector<64x128xf32> to vector<8x128xf32>
    %cst_72 = arith.constant dense<0.000000e+00> : vector<8x128xf32>
    %196 = tpu.matmul %194, %52, %cst_72 {dimension_numbers = #tpu.dot_dimension_numbers<[1], [0], [0], [1], [0, 0, 1, 1], [], []>} : vector<8x32xf32>, vector<32x128xf32>, vector<8x128xf32> -> vector<8x128xf32>
    %197 = arith.addf %195, %196 : vector<8x128xf32>
    %198 = vector.extract_strided_slice %197 {offsets = [0, 0], sizes = [8, 32], strides = [1, 1]} : vector<8x128xf32> to vector<8x32xf32>
    %199 = arith.negf %198 : vector<8x32xf32>
    %200 = math.exp %199 : vector<8x32xf32>
    %cst_73 = arith.constant 1.000000e+00 : f32
    %201 = vector.broadcast %cst_73 : f32 to vector<8x32xf32>
    %202 = arith.addf %201, %200 : vector<8x32xf32>
    %203 = arith.divf %201, %202 : vector<8x32xf32>
    %204 = vector.extract_strided_slice %197 {offsets = [0, 32], sizes = [8, 32], strides = [1, 1]} : vector<8x128xf32> to vector<8x32xf32>
    %205 = arith.negf %204 : vector<8x32xf32>
    %206 = math.exp %205 : vector<8x32xf32>
    %cst_74 = arith.constant 1.000000e+00 : f32
    %207 = vector.broadcast %cst_74 : f32 to vector<8x32xf32>
    %208 = arith.addf %207, %206 : vector<8x32xf32>
    %209 = arith.divf %207, %208 : vector<8x32xf32>
    %210 = vector.extract_strided_slice %197 {offsets = [0, 64], sizes = [8, 32], strides = [1, 1]} : vector<8x128xf32> to vector<8x32xf32>
    %211 = math.tanh %210 : vector<8x32xf32>
    %212 = vector.extract_strided_slice %197 {offsets = [0, 96], sizes = [8, 32], strides = [1, 1]} : vector<8x128xf32> to vector<8x32xf32>
    %213 = arith.negf %212 : vector<8x32xf32>
    %214 = math.exp %213 : vector<8x32xf32>
    %cst_75 = arith.constant 1.000000e+00 : f32
    %215 = vector.broadcast %cst_75 : f32 to vector<8x32xf32>
    %216 = arith.addf %215, %214 : vector<8x32xf32>
    %217 = arith.divf %215, %216 : vector<8x32xf32>
    %218 = arith.mulf %209, %192 : vector<8x32xf32>
    %219 = arith.mulf %203, %211 : vector<8x32xf32>
    %220 = arith.addf %218, %219 : vector<8x32xf32>
    %221 = math.tanh %220 : vector<8x32xf32>
    %222 = arith.mulf %217, %221 : vector<8x32xf32>
    %223 = vector.extract_strided_slice %51 {offsets = [48, 0], sizes = [8, 128], strides = [1, 1]} : vector<64x128xf32> to vector<8x128xf32>
    %cst_76 = arith.constant dense<0.000000e+00> : vector<8x128xf32>
    %224 = tpu.matmul %222, %52, %cst_76 {dimension_numbers = #tpu.dot_dimension_numbers<[1], [0], [0], [1], [0, 0, 1, 1], [], []>} : vector<8x32xf32>, vector<32x128xf32>, vector<8x128xf32> -> vector<8x128xf32>
    %225 = arith.addf %223, %224 : vector<8x128xf32>
    %226 = vector.extract_strided_slice %225 {offsets = [0, 0], sizes = [8, 32], strides = [1, 1]} : vector<8x128xf32> to vector<8x32xf32>
    %227 = arith.negf %226 : vector<8x32xf32>
    %228 = math.exp %227 : vector<8x32xf32>
    %cst_77 = arith.constant 1.000000e+00 : f32
    %229 = vector.broadcast %cst_77 : f32 to vector<8x32xf32>
    %230 = arith.addf %229, %228 : vector<8x32xf32>
    %231 = arith.divf %229, %230 : vector<8x32xf32>
    %232 = vector.extract_strided_slice %225 {offsets = [0, 32], sizes = [8, 32], strides = [1, 1]} : vector<8x128xf32> to vector<8x32xf32>
    %233 = arith.negf %232 : vector<8x32xf32>
    %234 = math.exp %233 : vector<8x32xf32>
    %cst_78 = arith.constant 1.000000e+00 : f32
    %235 = vector.broadcast %cst_78 : f32 to vector<8x32xf32>
    %236 = arith.addf %235, %234 : vector<8x32xf32>
    %237 = arith.divf %235, %236 : vector<8x32xf32>
    %238 = vector.extract_strided_slice %225 {offsets = [0, 64], sizes = [8, 32], strides = [1, 1]} : vector<8x128xf32> to vector<8x32xf32>
    %239 = math.tanh %238 : vector<8x32xf32>
    %240 = vector.extract_strided_slice %225 {offsets = [0, 96], sizes = [8, 32], strides = [1, 1]} : vector<8x128xf32> to vector<8x32xf32>
    %241 = arith.negf %240 : vector<8x32xf32>
    %242 = math.exp %241 : vector<8x32xf32>
    %cst_79 = arith.constant 1.000000e+00 : f32
    %243 = vector.broadcast %cst_79 : f32 to vector<8x32xf32>
    %244 = arith.addf %243, %242 : vector<8x32xf32>
    %245 = arith.divf %243, %244 : vector<8x32xf32>
    %246 = arith.mulf %237, %220 : vector<8x32xf32>
    %247 = arith.mulf %231, %239 : vector<8x32xf32>
    %248 = arith.addf %246, %247 : vector<8x32xf32>
    %249 = math.tanh %248 : vector<8x32xf32>
    %250 = arith.mulf %245, %249 : vector<8x32xf32>
    %251 = vector.extract_strided_slice %51 {offsets = [56, 0], sizes = [8, 128], strides = [1, 1]} : vector<64x128xf32> to vector<8x128xf32>
    %cst_80 = arith.constant dense<0.000000e+00> : vector<8x128xf32>
    %252 = tpu.matmul %250, %52, %cst_80 {dimension_numbers = #tpu.dot_dimension_numbers<[1], [0], [0], [1], [0, 0, 1, 1], [], []>} : vector<8x32xf32>, vector<32x128xf32>, vector<8x128xf32> -> vector<8x128xf32>
    %253 = arith.addf %251, %252 : vector<8x128xf32>
    %254 = vector.extract_strided_slice %253 {offsets = [0, 0], sizes = [8, 32], strides = [1, 1]} : vector<8x128xf32> to vector<8x32xf32>
    %255 = arith.negf %254 : vector<8x32xf32>
    %256 = math.exp %255 : vector<8x32xf32>
    %cst_81 = arith.constant 1.000000e+00 : f32
    %257 = vector.broadcast %cst_81 : f32 to vector<8x32xf32>
    %258 = arith.addf %257, %256 : vector<8x32xf32>
    %259 = arith.divf %257, %258 : vector<8x32xf32>
    %260 = vector.extract_strided_slice %253 {offsets = [0, 32], sizes = [8, 32], strides = [1, 1]} : vector<8x128xf32> to vector<8x32xf32>
    %261 = arith.negf %260 : vector<8x32xf32>
    %262 = math.exp %261 : vector<8x32xf32>
    %cst_82 = arith.constant 1.000000e+00 : f32
    %263 = vector.broadcast %cst_82 : f32 to vector<8x32xf32>
    %264 = arith.addf %263, %262 : vector<8x32xf32>
    %265 = arith.divf %263, %264 : vector<8x32xf32>
    %266 = vector.extract_strided_slice %253 {offsets = [0, 64], sizes = [8, 32], strides = [1, 1]} : vector<8x128xf32> to vector<8x32xf32>
    %267 = math.tanh %266 : vector<8x32xf32>
    %268 = vector.extract_strided_slice %253 {offsets = [0, 96], sizes = [8, 32], strides = [1, 1]} : vector<8x128xf32> to vector<8x32xf32>
    %269 = arith.negf %268 : vector<8x32xf32>
    %270 = math.exp %269 : vector<8x32xf32>
    %cst_83 = arith.constant 1.000000e+00 : f32
    %271 = vector.broadcast %cst_83 : f32 to vector<8x32xf32>
    %272 = arith.addf %271, %270 : vector<8x32xf32>
    %273 = arith.divf %271, %272 : vector<8x32xf32>
    %274 = arith.mulf %265, %248 : vector<8x32xf32>
    %275 = arith.mulf %259, %267 : vector<8x32xf32>
    %276 = arith.addf %274, %275 : vector<8x32xf32>
    %277 = math.tanh %276 : vector<8x32xf32>
    %278 = arith.mulf %273, %277 : vector<8x32xf32>
    %c0_84 = arith.constant 0 : index
    %c0_85 = arith.constant 0 : index
    %279 = vector.load %arg23[%c0_84, %c0_85] : memref<8x32xf32, #tpu.memory_space<vmem>>, vector<8x32xf32>
    tpu.vector_store %arg23[%c0_84, %c0_85], %278 {strides = array<i32>} : memref<8x32xf32, #tpu.memory_space<vmem>>, vector<8x32xf32>,
    %c0_86 = arith.constant 0 : index
    %c0_87 = arith.constant 0 : index
    %280 = vector.load %arg24[%c0_86, %c0_87] : memref<8x32xf32, #tpu.memory_space<vmem>>, vector<8x32xf32>
    tpu.vector_store %arg24[%c0_86, %c0_87], %276 {strides = array<i32>} : memref<8x32xf32, #tpu.memory_space<vmem>>, vector<8x32xf32>,
    %c0_88 = arith.constant 0 : index
    %c0_89 = arith.constant 0 : index
    %281 = vector.load %arg20[%c0_88, %c0_89] : memref<32x6xf32, #tpu.memory_space<vmem>>, vector<32x6xf32>
    %cst_90 = arith.constant dense<0.000000e+00> : vector<8x6xf32>
    %282 = tpu.matmul %278, %281, %cst_90 {dimension_numbers = #tpu.dot_dimension_numbers<[1], [0], [0], [1], [0, 0, 1, 1], [], []>} : vector<8x32xf32>, vector<32x6xf32>, vector<8x6xf32> -> vector<8x6xf32>
    %c0_91 = arith.constant 0 : index
    %c0_92 = arith.constant 0 : index
    %283 = vector.load %arg21[%c0_91, %c0_92] : memref<1x6xf32, #tpu.memory_space<vmem>>, vector<1x6xf32>
    %284 = vector.broadcast %283 : vector<1x6xf32> to vector<8x6xf32>
    %285 = arith.addf %282, %284 : vector<8x6xf32>
    %286 = vector.extract_strided_slice %285 {offsets = [0, 0], sizes = [8, 5], strides = [1, 1]} : vector<8x6xf32> to vector<8x5xf32>
    %287 = vector.extract_strided_slice %285 {offsets = [0, 5], sizes = [8, 1], strides = [1, 1]} : vector<8x6xf32> to vector<8x1xf32>
    %288 = vector.broadcast %287 : vector<8x1xf32> to vector<8x5xf32>
    %289 = arith.addf %288, %286 : vector<8x5xf32>
    %cst_93 = arith.constant dense<0.000000e+00> : vector<8xf32>
    %290 = vector.multi_reduction <add>, %286, %cst_93 [1] : vector<8x5xf32> to vector<8xf32>
    %291 = vector.shape_cast %290 : vector<8xf32> to vector<8x1xf32>
    %cst_94 = arith.constant 5.000000e+00 : f32
    %292 = vector.broadcast %cst_94 : f32 to vector<8x1xf32>
    %293 = arith.divf %291, %292 : vector<8x1xf32>
    %294 = vector.broadcast %293 : vector<8x1xf32> to vector<8x5xf32>
    %295 = arith.subf %289, %294 : vector<8x5xf32>
    %c0_95 = arith.constant 0 : index
    %c0_96 = arith.constant 0 : index
    %296 = vector.load %arg22[%c0_95, %c0_96] : memref<8x5xf32, #tpu.memory_space<vmem>>, vector<8x5xf32>
    tpu.vector_store %arg22[%c0_95, %c0_96], %295 {strides = array<i32>} : memref<8x5xf32, #tpu.memory_space<vmem>>, vector<8x5xf32>,
    return
  }
}

</mosaic_0001>

<bundles_post_ra>
// kernel: q_net_forward.1
= control target key start
LH: loop header
LB: loop body
LE: loop exit
PB: predicated region body
PF: predicated region fallthrough
CT: control target
= control target key end

     0   :  { %vm493_vm0 = vcmask 130048   ;;  %vm2365_vm1 = vcmask 1045504   ;;  %vm2340_vm2 = vcmask 48128   ;;  %vm2497_vm3 = vcmask 523264   ;;  %s8250_s4 = inlined_call_operand.vmem [shape: f32[400,784], index: 4, kind: input, shape index: {}]   ;;  %s8251_s0 = inlined_call_operand.vmem [shape: f32[64,400], index: 0, kind: input, shape index: {}]   ;;  %s8252_s6 = inlined_call_operand.vmem [shape: f32[784,144], index: 6, kind: input, shape index: {}]   ;;  %s8253_s5 = inlined_call_operand.vmem [shape: f32[1,784], index: 5, kind: input, shape index: {}]   ;;  %s8254_s8 = inlined_call_operand.vmem [shape: f32[144,32], index: 8, kind: input, shape index: {}]   ;;  %s8255_s10 = inlined_call_operand.vmem [shape: f32[6,64], index: 10, kind: input, shape index: {}]   ;;  %s8256_s7 = inlined_call_operand.vmem [shape: f32[1,144], index: 7, kind: input, shape index: {}]   ;;  %s8257_s1 = inlined_call_operand.vmem [shape: f32[64,6], index: 1, kind: input, shape index: {}]   ;;  %s8258_s12 = inlined_call_operand.vmem [shape: f32[64,128], index: 12, kind: input, shape index: {}]   ;;  %s8259_s14 = inlined_call_operand.vmem [shape: f32[128,128], index: 14, kind: input, shape index: {}]   ;;  %s8260_s11 = inlined_call_operand.vmem [shape: f32[1,64], index: 11, kind: input, shape index: {}]   ;;  %s8261_s17 = inlined_call_operand.vmem [shape: f32[32,128], index: 17, kind: input, shape index: {}]   ;;  %s8262_s13 = inlined_call_operand.vmem [shape: f32[1,128], index: 13, kind: input, shape index: {}]   ;;  %s8263_s16 = inlined_call_operand.vmem [shape: f32[128,128], index: 16, kind: input, shape index: {}]   ;;  %s8264_s9 = inlined_call_operand.vmem [shape: f32[1,32], index: 9, kind: input, shape index: {}]   ;;  %s8265_s19 = inlined_call_operand.vmem [shape: f32[32,128], index: 19, kind: input, shape index: {}]   ;;  %s8266_s15 = inlined_call_operand.vmem [shape: f32[1,128], index: 15, kind: input, shape index: {}]   ;;  %s8267_s2 = inlined_call_operand.vmem [shape: f32[8,32], index: 2, kind: input, shape index: {}]   ;;  %s8268_s18 = inlined_call_operand.vmem [shape: f32[1,128], index: 18, kind: input, shape index: {}]   ;;  %s8269_s3 = inlined_call_operand.vmem [shape: f32[8,32], index: 3, kind: input, shape index: {}]   ;;  %s8270_s20 = inlined_call_operand.vmem [shape: f32[32,6], index: 20, kind: input, shape index: {}]   ;;  %s8271_s23 = inlined_call_operand.vmem [shape: f32[8,32], index: 23, kind: output, shape index: {1}]   ;;  %s8272_s21 = inlined_call_operand.vmem [shape: f32[1,6], index: 21, kind: input, shape index: {}]   ;;  %s8273_s24 = inlined_call_operand.vmem [shape: f32[8,32], index: 24, kind: output, shape index: {2}]   ;;  %s8274_s22 = inlined_call_operand.vmem [shape: f32[8,5], index: 22, kind: output, shape index: {0}]  }
   0x1   :  { %8281 = sst [smem:[#allocation2_spill]] %s8250_s4  ;;  %vm2791_vm4 = vcmask 261120   ;;  %vm5466_vm5 = vmmov 0   ;;  %vm3948_vm6 = vcmask 39936  }
   0x2   :  { %8282 = sst [smem:[#allocation3_spill]] %s8251_s0  ;;  %s8290_s27 = sld [smem:[#allocation2_spill]] }
   0x3   :  { %8283 = sst [smem:[#allocation4_spill]] %s8252_s6  ;;  %s8291_s28 = sld [smem:[#allocation3_spill]] }
   0x4   :  { %8284 = sst [smem:[#allocation5_spill]] %s8253_s5 }
   0x5   :  { %8285 = sst [smem:[#allocation6_spill]] %s8254_s8  ;;  %s8293_s4 = sld [smem:[#allocation5_spill]] }
   0x6   :  { %8286 = sst [smem:[#allocation7_spill]] %s8255_s10  ;;  %s8294_s29 = sld [smem:[#allocation6_spill]] }
   0x7   :  { %8287 = sst [smem:[#allocation8_spill]] %s8256_s7  ;;  %s8295_s25 = sld [smem:[#allocation7_spill]] }
   0x8   :  { %8288 = sst [smem:[#allocation9_spill]] %s8257_s1  ;;  %v107_v0 = vld [vmem:[%s8290_s27 + $0x8] sm:$0xff]  ;;  %v114_v1 = vld [vmem:[%s8290_s27 + $0x40] sm:$0xff]  ;;  %v113_v4 = vld [vmem:[%s8290_s27 + $0x38] sm:$0xff]  ;;  %s8296_s0 = sld [smem:[#allocation8_spill]] }
   0x9   :  { %8289 = sst [smem:[#allocation10_spill]] %s8258_s12  ;;  %v106_v2 = vld [vmem:[%s8290_s27] sm:$0xff]  ;;  %v4499_v3 = vpack.c.bf16 %v114_v1, %v107_v0  ;;  %v121_v5 = vld [vmem:[%s8290_s27 + $0x78] sm:$0xff]  ;;  %v128_v6 = vld [vmem:[%s8290_s27 + $0xb0] sm:$0xff]  ;;  %s8297_s10 = sld [smem:[#allocation9_spill]] }
   0xa   :  { %v4501_v7 = vpack.c.bf16 %v113_v4, %v106_v2  ;;  %v4503_v8 = vpack.c.bf16 %v128_v6, %v121_v5  ;;  %v120_v9 = vld [vmem:[%s8290_s27 + $0x70] sm:$0xff]  ;;  %v127_v10 = vld [vmem:[%s8290_s27 + $0xa8] sm:$0xff]  ;;  %v142_v12 = vld [vmem:[%s8290_s27 + $0x120] sm:$0xff]  ;;  %s8298_s6 = sld [smem:[#allocation10_spill]]  ;;  %s5470_s12 = smov 96  }
   0xb   :  { %v135_v11 = vld [vmem:[%s8290_s27 + $0xe8] sm:$0xff]  ;;  %4500 = vmatprep.subr.bf16.mxu0 %v4499_v3  ;;  %v4505_v13 = vpack.c.bf16 %v127_v10, %v120_v9  ;;  %v134_v15 = vld [vmem:[%s8290_s27 + $0xe0] sm:$0xff]  ;;  %v141_v16 = vld [vmem:[%s8290_s27 + $0x118] sm:$0xff] }
   0xc   :  { %4502 = vmatpush1.bf16.msra.mxu0 %v4501_v7  ;;  %v4507_v14 = vpack.c.bf16 %v142_v12, %v135_v11  ;;  %v149_v17 = vld [vmem:[%s8290_s27 + $0x158] sm:$0xff]  ;;  %v156_v18 = vld [vmem:[%s8290_s27 + $0x190] sm:$0xff]  ;;  %v4509_v19 = vpack.c.bf16 %v141_v16, %v134_v15  ;;  %v155_v22 = vld [vmem:[%s8290_s27 + $0x188] sm:$0xff] }
   0xd   :  { %4504 = vmatprep.subr.bf16.mxu0 %v4503_v8  ;;  %v4511_v20 = vpack.c.bf16 %v156_v18, %v149_v17  ;;  %v148_v21 = vld [vmem:[%s8290_s27 + $0x150] sm:$0xff]  ;;  %v163_v23 = vld [vmem:[%s8290_s27 + $0x1c8] sm:$0xff]  ;;  %v170_v24 = vld [vmem:[%s8290_s27 + $0x200] sm:$0xff] }
   0xe   :  { %v109_v25 = vld [vmem:[%s8290_s27 + $0x18] sm:$0xff]  ;;  %v116_v26 = vld [vmem:[%s8290_s27 + $0x50] sm:$0xff]  ;;  %v115_v29 = vld [vmem:[%s8290_s27 + $0x48] sm:$0xff]  ;;  %v4513_v30 = vpack.c.bf16 %v155_v22, %v148_v21  ;;  %v4515_v34 = vpack.c.bf16 %v170_v24, %v163_v23 }
   0xf   :  { %v4599_v27 = vpack.c.bf16 %v116_v26, %v109_v25  ;;  %v108_v28 = vld [vmem:[%s8290_s27 + $0x10] sm:$0xff]  ;;  %v162_v31 = vld [vmem:[%s8290_s27 + $0x1c0] sm:$0xff]  ;;  %v123_v33 = vld [vmem:[%s8290_s27 + $0x88] sm:$0xff] }
  0x10   :  { %4506 = vmatpush1.bf16.msra.mxu0 %v4505_v13  ;;  %v4601_v32 = vpack.c.bf16 %v115_v29, %v108_v28  ;;  %v169_v35 = vld [vmem:[%s8290_s27 + $0x1f8] sm:$0xff]  ;;  %v130_v37 = vld [vmem:[%s8290_s27 + $0xc0] sm:$0xff]  ;;  %v184_v38 = vld [vmem:[%s8290_s27 + $0x270] sm:$0xff] }
  0x11   :  { %4508 = vmatprep.subr.bf16.mxu0 %v4507_v14  ;;  %v177_v36 = vld [vmem:[%s8290_s27 + $0x238] sm:$0xff]  ;;  %4600 = vmatprep.subr.bf16.mxu1 %v4599_v27  ;;  %v4603_v39 = vpack.c.bf16 %v130_v37, %v123_v33  ;;  %v122_v40 = vld [vmem:[%s8290_s27 + $0x80] sm:$0xff]  ;;  %v144_v44 = vld [vmem:[%s8290_s27 + $0x130] sm:$0xff]  ;;  %v4517_v45 = vpack.c.bf16 %v169_v35, %v162_v31 }
  0x12   :  { %4602 = vmatpush1.bf16.msra.mxu1 %v4601_v32  ;;  %v129_v41 = vld [vmem:[%s8290_s27 + $0xb8] sm:$0xff]  ;;  %v176_v46 = vld [vmem:[%s8290_s27 + $0x230] sm:$0xff]  ;;  %v4519_v49 = vpack.c.bf16 %v184_v38, %v177_v36  ;;  %v183_v50 = vld [vmem:[%s8290_s27 + $0x268] sm:$0xff] }
  0x13   :  { %v4605_v42 = vpack.c.bf16 %v129_v41, %v122_v40  ;;  %v137_v43 = vld [vmem:[%s8290_s27 + $0xf8] sm:$0xff]  ;;  %4604 = vmatprep.subr.bf16.mxu1 %v4603_v39  ;;  %v136_v48 = vld [vmem:[%s8290_s27 + $0xf0] sm:$0xff]  ;;  %v191_v51 = vld [vmem:[%s8290_s27 + $0x2a8] sm:$0xff]  ;;  %v4521_v60 = vpack.c.bf16 %v183_v50, %v176_v46 }
  0x14   :  { %4510 = vmatpush1.bf16.msra.mxu0 %v4509_v19  ;;  %v4607_v47 = vpack.c.bf16 %v144_v44, %v137_v43  ;;  %v143_v52 = vld [vmem:[%s8290_s27 + $0x128] sm:$0xff]  ;;  %v198_v53 = vld [vmem:[%s8290_s27 + $0x2e0] sm:$0xff]  ;;  %v157_v59 = vld [vmem:[%s8290_s27 + $0x198] sm:$0xff] }
  0x15   :  { %4512 = vmatprep.subr.bf16.mxu0 %v4511_v20  ;;  %v4609_v54 = vpack.c.bf16 %v143_v52, %v136_v48  ;;  %v151_v55 = vld [vmem:[%s8290_s27 + $0x168] sm:$0xff]  ;;  %v158_v56 = vld [vmem:[%s8290_s27 + $0x1a0] sm:$0xff]  ;;  %v165_v61 = vld [vmem:[%s8290_s27 + $0x1d8] sm:$0xff]  ;;  %v4523_v62 = vpack.c.bf16 %v198_v53, %v191_v51 }
  0x16   :  { %4606 = vmatpush1.bf16.msra.mxu1 %v4605_v42  ;;  %v4611_v57 = vpack.c.bf16 %v158_v56, %v151_v55  ;;  %v150_v58 = vld [vmem:[%s8290_s27 + $0x160] sm:$0xff]  ;;  %v197_v0 = vld [vmem:[%s8290_s27 + $0x2d8] sm:$0xff]  ;;  %v172_v1 = vld [vmem:[%s8290_s27 + $0x210] sm:$0xff] }
  0x17   :  { %4608 = vmatprep.subr.bf16.mxu1 %v4607_v47  ;;  %v190_v63 = vld [vmem:[%s8290_s27 + $0x2a0] sm:$0xff]  ;;  %v205_v2 = vld [vmem:[%s8290_s27 + $0x318] sm:$0xff]  ;;  %v212_v3 = vld [vmem:[%s8290_s27 + $0x350] sm:$0xff]  ;;  %v4613_v4 = vpack.c.bf16 %v157_v59, %v150_v58  ;;  %v4615_v5 = vpack.c.bf16 %v172_v1, %v165_v61 }
  0x18   :  { %4514 = vmatpush1.bf16.msra.mxu0 %v4513_v30  ;;  %v164_v6 = vld [vmem:[%s8290_s27 + $0x1d0] sm:$0xff]  ;;  %v171_v7 = vld [vmem:[%s8290_s27 + $0x208] sm:$0xff]  ;;  %v4525_v8 = vpack.c.bf16 %v197_v0, %v190_v63  ;;  %v186_v10 = vld [vmem:[%s8290_s27 + $0x280] sm:$0xff]  ;;  %v4527_v11 = vpack.c.bf16 %v212_v3, %v205_v2 }
  0x19   :  { %4516 = vmatprep.subr.bf16.mxu0 %v4515_v34  ;;  %v179_v9 = vld [vmem:[%s8290_s27 + $0x248] sm:$0xff]  ;;  %v204_v12 = vld [vmem:[%s8290_s27 + $0x310] sm:$0xff]  ;;  %v226_v15 = vld [vmem:[%s8290_s27 + $0x3c0] sm:$0xff]  ;;  %v4617_v16 = vpack.c.bf16 %v171_v7, %v164_v6 }
  0x1a   :  { %4610 = vmatpush1.bf16.msra.mxu1 %v4609_v54  ;;  %v211_v13 = vld [vmem:[%s8290_s27 + $0x348] sm:$0xff]  ;;  %v4619_v17 = vpack.c.bf16 %v186_v10, %v179_v9  ;;  %v178_v18 = vld [vmem:[%s8290_s27 + $0x240] sm:$0xff]  ;;  %v185_v19 = vld [vmem:[%s8290_s27 + $0x278] sm:$0xff] }
  0x1b   :  { %4612 = vmatprep.subr.bf16.mxu1 %v4611_v57  ;;  %v219_v14 = vld [vmem:[%s8290_s27 + $0x388] sm:$0xff]  ;;  %v4529_v20 = vpack.c.bf16 %v211_v13, %v204_v12  ;;  %v193_v21 = vld [vmem:[%s8290_s27 + $0x2b8] sm:$0xff]  ;;  %v200_v22 = vld [vmem:[%s8290_s27 + $0x2f0] sm:$0xff]  ;;  %v4621_v28 = vpack.c.bf16 %v185_v19, %v178_v18 }
  0x1c   :  { %4518 = vmatpush1.bf16.msra.mxu0 %v4517_v45  ;;  %v4531_v23 = vpack.c.bf16 %v226_v15, %v219_v14  ;;  %v218_v24 = vld [vmem:[%s8290_s27 + $0x380] sm:$0xff]  ;;  %v225_v25 = vld [vmem:[%s8290_s27 + $0x3b8] sm:$0xff]  ;;  %v240_v27 = vld [vmem:[%s8290_s27 + $0x430] sm:$0xff]  ;;  %v4623_v29 = vpack.c.bf16 %v200_v22, %v193_v21 }
  0x1d   :  { %4520 = vmatprep.subr.bf16.mxu0 %v4519_v49  ;;  %v233_v26 = vld [vmem:[%s8290_s27 + $0x3f8] sm:$0xff]  ;;  %v192_v30 = vld [vmem:[%s8290_s27 + $0x2b0] sm:$0xff]  ;;  %v199_v31 = vld [vmem:[%s8290_s27 + $0x2e8] sm:$0xff]  ;;  %v4533_v32 = vpack.c.bf16 %v225_v25, %v218_v24 }
  0x1e   :  { %4614 = vmatpush1.bf16.msra.mxu1 %v4613_v4  ;;  %v207_v33 = vld [vmem:[%s8290_s27 + $0x328] sm:$0xff]  ;;  %v214_v34 = vld [vmem:[%s8290_s27 + $0x360] sm:$0xff]  ;;  %v4535_v35 = vpack.c.bf16 %v240_v27, %v233_v26  ;;  %v232_v36 = vld [vmem:[%s8290_s27 + $0x3f0] sm:$0xff]  ;;  %v4625_v41 = vpack.c.bf16 %v199_v31, %v192_v30 }
  0x1f   :  { %4616 = vmatprep.subr.bf16.mxu1 %v4615_v5  ;;  %v239_v37 = vld [vmem:[%s8290_s27 + $0x428] sm:$0xff]  ;;  %v254_v40 = vld [vmem:[%s8290_s27 + $0x4a0] sm:$0xff]  ;;  %v4627_v42 = vpack.c.bf16 %v214_v34, %v207_v33  ;;  %v213_v44 = vld [vmem:[%s8290_s27 + $0x358] sm:$0xff] }
  0x20   :  { %4522 = vmatpush1.bf16.msra.mxu0 %v4521_v60  ;;  %v5809_v38 = vld [vmem:[%s8291_s28 + $0x8] sm:$0xff]  ;;  %v206_v43 = vld [vmem:[%s8290_s27 + $0x320] sm:$0xff]  ;;  %v4537_v45 = vpack.c.bf16 %v239_v37, %v232_v36  ;;  %v221_v46 = vld [vmem:[%s8290_s27 + $0x398] sm:$0xff] }
  0x21   :  { %4524 = vmatprep.subr.bf16.mxu0 %v4523_v62  ;;  %v247_v39 = vld [vmem:[%s8290_s27 + $0x468] sm:$0xff]  ;;  %582 = vmatprep.mubr.f32.mxu0 %v5809_v38  ;;  %v228_v47 = vld [vmem:[%s8290_s27 + $0x3d0] sm:$0xff]  ;;  %v246_v49 = vld [vmem:[%s8290_s27 + $0x460] sm:$0xff]  ;;  %v4629_v53 = vpack.c.bf16 %v213_v44, %v206_v43 }
  0x22   :  { %4618 = vmatpush1.bf16.msra.mxu1 %v4617_v16  ;;  %808 = vmatprep.mubr.f32.mxu1 %v5809_v38  ;;  %v4539_v48 = vpack.c.bf16 %v254_v40, %v247_v39  ;;  %v253_v50 = vld [vmem:[%s8290_s27 + $0x498] sm:$0xff]  ;;  %v268_v52 = vld [vmem:[%s8290_s27 + $0x510] sm:$0xff]  ;;  %v4631_v54 = vpack.c.bf16 %v228_v47, %v221_v46  ;;  %v227_v56 = vld [vmem:[%s8290_s27 + $0x3c8] sm:$0xff] }
  0x23   :  { %4620 = vmatprep.subr.bf16.mxu1 %v4619_v17  ;;  %v261_v51 = vld [vmem:[%s8290_s27 + $0x4d8] sm:$0xff]  ;;  %v220_v55 = vld [vmem:[%s8290_s27 + $0x390] sm:$0xff]  ;;  %v4541_v57 = vpack.c.bf16 %v253_v50, %v246_v49  ;;  %v235_v58 = vld [vmem:[%s8290_s27 + $0x408] sm:$0xff] }
  0x24   :  { %4526 = vmatpush1.bf16.msra.mxu0 %v4525_v8  ;;  %v242_v59 = vld [vmem:[%s8290_s27 + $0x440] sm:$0xff]  ;;  %v4543_v60 = vpack.c.bf16 %v268_v52, %v261_v51  ;;  %v260_v61 = vld [vmem:[%s8290_s27 + $0x4d0] sm:$0xff]  ;;  %v267_v62 = vld [vmem:[%s8290_s27 + $0x508] sm:$0xff]  ;;  %v4633_v1 = vpack.c.bf16 %v227_v56, %v220_v55 }
  0x25   :  { %4528 = vmatprep.subr.bf16.mxu0 %v4527_v11  ;;  %v275_v63 = vld [vmem:[%s8290_s27 + $0x548] sm:$0xff]  ;;  %v282_v0 = vld [vmem:[%s8290_s27 + $0x580] sm:$0xff]  ;;  %v4635_v2 = vpack.c.bf16 %v242_v59, %v235_v58  ;;  %v241_v4 = vld [vmem:[%s8290_s27 + $0x438] sm:$0xff]  ;;  %v4545_v5 = vpack.c.bf16 %v267_v62, %v260_v61 }
  0x26   :  { %4622 = vmatpush1.bf16.msra.mxu1 %v4621_v28  ;;  %v234_v3 = vld [vmem:[%s8290_s27 + $0x400] sm:$0xff]  ;;  %v249_v6 = vld [vmem:[%s8290_s27 + $0x478] sm:$0xff]  ;;  %v256_v7 = vld [vmem:[%s8290_s27 + $0x4b0] sm:$0xff]  ;;  %v4547_v8 = vpack.c.bf16 %v282_v0, %v275_v63 }
  0x27   :  { %4624 = vmatprep.subr.bf16.mxu1 %v4623_v29  ;;  %v274_v9 = vld [vmem:[%s8290_s27 + $0x540] sm:$0xff]  ;;  %v281_v10 = vld [vmem:[%s8290_s27 + $0x578] sm:$0xff]  ;;  %v296_v12 = vld [vmem:[%s8290_s27 + $0x5f0] sm:$0xff]  ;;  %v4637_v13 = vpack.c.bf16 %v241_v4, %v234_v3  ;;  %v4639_v14 = vpack.c.bf16 %v256_v7, %v249_v6 }
  0x28   :  { %4530 = vmatpush1.bf16.msra.mxu0 %v4529_v20  ;;  %v289_v11 = vld [vmem:[%s8290_s27 + $0x5b8] sm:$0xff]  ;;  %v248_v15 = vld [vmem:[%s8290_s27 + $0x470] sm:$0xff]  ;;  %v255_v16 = vld [vmem:[%s8290_s27 + $0x4a8] sm:$0xff]  ;;  %v4549_v17 = vpack.c.bf16 %v281_v10, %v274_v9 }
  0x29   :  { %4532 = vmatprep.subr.bf16.mxu0 %v4531_v23  ;;  %v263_v18 = vld [vmem:[%s8290_s27 + $0x4e8] sm:$0xff]  ;;  %v270_v19 = vld [vmem:[%s8290_s27 + $0x520] sm:$0xff]  ;;  %v4551_v20 = vpack.c.bf16 %v296_v12, %v289_v11  ;;  %v288_v21 = vld [vmem:[%s8290_s27 + $0x5b0] sm:$0xff]  ;;  %v4641_v25 = vpack.c.bf16 %v255_v16, %v248_v15 }
  0x2a   :  { %4626 = vmatpush1.bf16.msra.mxu1 %v4625_v41  ;;  %v295_v22 = vld [vmem:[%s8290_s27 + $0x5e8] sm:$0xff]  ;;  %v310_v24 = vld [vmem:[%s8290_s27 + $0x660] sm:$0xff]  ;;  %v4643_v26 = vpack.c.bf16 %v270_v19, %v263_v18  ;;  %v269_v28 = vld [vmem:[%s8290_s27 + $0x518] sm:$0xff] }
  0x2b   :  { %4628 = vmatprep.subr.bf16.mxu1 %v4627_v42  ;;  %v303_v23 = vld [vmem:[%s8290_s27 + $0x628] sm:$0xff]  ;;  %v262_v27 = vld [vmem:[%s8290_s27 + $0x4e0] sm:$0xff]  ;;  %v4553_v29 = vpack.c.bf16 %v295_v22, %v288_v21  ;;  %v277_v30 = vld [vmem:[%s8290_s27 + $0x558] sm:$0xff] }
  0x2c   :  { %4534 = vmatpush1.bf16.msra.mxu0 %v4533_v32  ;;  %v284_v31 = vld [vmem:[%s8290_s27 + $0x590] sm:$0xff]  ;;  %v4555_v32 = vpack.c.bf16 %v310_v24, %v303_v23  ;;  %v302_v33 = vld [vmem:[%s8290_s27 + $0x620] sm:$0xff]  ;;  %v309_v34 = vld [vmem:[%s8290_s27 + $0x658] sm:$0xff]  ;;  %v4645_v37 = vpack.c.bf16 %v269_v28, %v262_v27 }
  0x2d   :  { %4536 = vmatprep.subr.bf16.mxu0 %v4535_v35  ;;  %v317_v35 = vld [vmem:[%s8290_s27 + $0x698] sm:$0xff]  ;;  %v324_v36 = vld [vmem:[%s8290_s27 + $0x6d0] sm:$0xff]  ;;  %v4647_v39 = vpack.c.bf16 %v284_v31, %v277_v30  ;;  %v283_v41 = vld [vmem:[%s8290_s27 + $0x588] sm:$0xff]  ;;  %v4557_v42 = vpack.c.bf16 %v309_v34, %v302_v33 }
  0x2e   :  { %4630 = vmatpush1.bf16.msra.mxu1 %v4629_v53  ;;  %v276_v40 = vld [vmem:[%s8290_s27 + $0x550] sm:$0xff]  ;;  %v291_v43 = vld [vmem:[%s8290_s27 + $0x5c8] sm:$0xff]  ;;  %v298_v44 = vld [vmem:[%s8290_s27 + $0x600] sm:$0xff] }
  0x2f   :  { %4632 = vmatprep.subr.bf16.mxu1 %v4631_v54  ;;  %v316_v46 = vld [vmem:[%s8290_s27 + $0x690] sm:$0xff]  ;;  %v323_v47 = vld [vmem:[%s8290_s27 + $0x6c8] sm:$0xff]  ;;  %v338_v49 = vld [vmem:[%s8290_s27 + $0x740] sm:$0xff]  ;;  %v4649_v50 = vpack.c.bf16 %v283_v41, %v276_v40  ;;  %v4651_v51 = vpack.c.bf16 %v298_v44, %v291_v43 }
  0x30   :  { %4538 = vmatpush1.bf16.msra.mxu0 %v4537_v45  ;;  %v4559_v45 = vpack.c.bf16 %v324_v36, %v317_v35  ;;  %v290_v52 = vld [vmem:[%s8290_s27 + $0x5c0] sm:$0xff]  ;;  %v297_v53 = vld [vmem:[%s8290_s27 + $0x5f8] sm:$0xff]  ;;  %v4561_v54 = vpack.c.bf16 %v323_v47, %v316_v46  ;;  %v312_v56 = vld [vmem:[%s8290_s27 + $0x670] sm:$0xff] }
  0x31   :  { %4540 = vmatprep.subr.bf16.mxu0 %v4539_v48  ;;  %v331_v48 = vld [vmem:[%s8290_s27 + $0x708] sm:$0xff]  ;;  %v305_v55 = vld [vmem:[%s8290_s27 + $0x638] sm:$0xff]  ;;  %v330_v58 = vld [vmem:[%s8290_s27 + $0x700] sm:$0xff]  ;;  %v4653_v62 = vpack.c.bf16 %v297_v53, %v290_v52 }
  0x32   :  { %4634 = vmatpush1.bf16.msra.mxu1 %v4633_v1  ;;  %v337_v59 = vld [vmem:[%s8290_s27 + $0x738] sm:$0xff]  ;;  %v352_v61 = vld [vmem:[%s8290_s27 + $0x7b0] sm:$0xff]  ;;  %v4655_v63 = vpack.c.bf16 %v312_v56, %v305_v55  ;;  %v311_v1 = vld [vmem:[%s8290_s27 + $0x668] sm:$0xff] }
  0x33   :  { %4636 = vmatprep.subr.bf16.mxu1 %v4635_v2  ;;  %v304_v0 = vld [vmem:[%s8290_s27 + $0x630] sm:$0xff]  ;;  %v5996_v2 = vld [vmem:[%s8291_s28] sm:$0xff]  ;;  %v4565_v3 = vpack.c.bf16 %v337_v59, %v330_v58  ;;  %v319_v4 = vld [vmem:[%s8290_s27 + $0x6a8] sm:$0xff] }
  0x34   :  { %4542 = vmatpush1.bf16.msra.mxu0 %v4541_v57  ;;  %v4563_v57 = vpack.c.bf16 %v338_v49, %v331_v48  ;;  %v344_v7 = vld [vmem:[%s8290_s27 + $0x770] sm:$0xff]  ;;  %v6013_v9 = vld [vmem:[%s8291_s28 + $0x28] sm:$0xff]  ;;  %v366_v11 = vld [vmem:[%s8290_s27 + $0x820] sm:$0xff]  ;;  %v4657_v12 = vpack.c.bf16 %v311_v1, %v304_v0 }
  0x35   :  { %4544 = vmatprep.subr.bf16.mxu0 %v4543_v60  ;;  %v345_v60 = vld [vmem:[%s8290_s27 + $0x778] sm:$0xff]  ;;  %v359_v10 = vld [vmem:[%s8290_s27 + $0x7e8] sm:$0xff]  ;;  %v340_v19 = vld [vmem:[%s8290_s27 + $0x750] sm:$0xff] }
  0x36   :  { %4638 = vmatpush1.bf16.msra.mxu1 %v4637_v13  ;;  %v4567_v6 = vpack.c.bf16 %v352_v61, %v345_v60  ;;  %v325_v15 = vld [vmem:[%s8290_s27 + $0x6d8] sm:$0xff]  ;;  %v358_v21 = vld [vmem:[%s8290_s27 + $0x7e0] sm:$0xff]  ;;  %v6049_v23 = vld [vmem:[%s8291_s28 + $0x48] sm:$0xff] }
  0x37   :  { %4640 = vmatprep.subr.bf16.mxu1 %v4639_v14  ;;  %v318_v14 = vld [vmem:[%s8290_s27 + $0x6a0] sm:$0xff]  ;;  %v333_v18 = vld [vmem:[%s8290_s27 + $0x718] sm:$0xff]  ;;  %v332_v28 = vld [vmem:[%s8290_s27 + $0x710] sm:$0xff] }
  0x38   :  { %4546 = vmatpush1.bf16.msra.mxu0 %v4545_v5  ;;  %v326_v5 = vld [vmem:[%s8290_s27 + $0x6e0] sm:$0xff]  ;;  %v365_v22 = vld [vmem:[%s8290_s27 + $0x818] sm:$0xff]  ;;  %v4663_v27 = vpack.c.bf16 %v340_v19, %v333_v18  ;;  %v372_v35 = vld [vmem:[%s8290_s27 + $0x850] sm:$0xff] }
  0x39   :  { %4548 = vmatprep.subr.bf16.mxu0 %v4547_v8  ;;  %v351_v8 = vld [vmem:[%s8290_s27 + $0x7a8] sm:$0xff]  ;;  %v4659_v13 = vpack.c.bf16 %v326_v5, %v319_v4  ;;  %v373_v24 = vld [vmem:[%s8290_s27 + $0x858] sm:$0xff]  ;;  %v4573_v30 = vpack.c.bf16 %v365_v22, %v358_v21  ;;  %v6068_v31 = vld [vmem:[%s8291_s28 + $0x40] sm:$0xff] }
  0x3a   :  { %4642 = vmatpush1.bf16.msra.mxu1 %v4641_v25  ;;  %v4569_v16 = vpack.c.bf16 %v351_v8, %v344_v7  ;;  %v380_v25 = vld [vmem:[%s8290_s27 + $0x890] sm:$0xff]  ;;  %v354_v33 = vld [vmem:[%s8290_s27 + $0x7c0] sm:$0xff]  ;;  %v379_v36 = vld [vmem:[%s8290_s27 + $0x888] sm:$0xff] }
  0x3b   :  { %4644 = vmatprep.subr.bf16.mxu1 %v4643_v26  ;;  %v4661_v26 = vpack.c.bf16 %v325_v15, %v318_v14  ;;  %v4575_v34 = vpack.c.bf16 %v380_v25, %v373_v24  ;;  %v394_v40 = vld [vmem:[%s8290_s27 + $0x900] sm:$0xff]  ;;  %v353_v44 = vld [vmem:[%s8290_s27 + $0x7b8] sm:$0xff]  ;;  %v368_v48 = vld [vmem:[%s8290_s27 + $0x830] sm:$0xff] }
  0x3c   :  { %4550 = vmatpush1.bf16.msra.mxu0 %v4549_v17  ;;  %v6032_v17 = vld [vmem:[%s8291_s28 + $0x20] sm:$0xff]  ;;  %v361_v47 = vld [vmem:[%s8290_s27 + $0x7f8] sm:$0xff]  ;;  %v6121_v52 = vld [vmem:[%s8291_s28 + $0x88] sm:$0xff] }
  0x3d   :  { %4552 = vmatprep.subr.bf16.mxu0 %v4551_v20  ;;  %v4571_v20 = vpack.c.bf16 %v366_v11, %v359_v10  ;;  %v346_v43 = vld [vmem:[%s8290_s27 + $0x780] sm:$0xff]  ;;  %v401_v53 = vld [vmem:[%s8290_s27 + $0x938] sm:$0xff]  ;;  %v4671_v56 = vpack.c.bf16 %v368_v48, %v361_v47  ;;  %v367_v58 = vld [vmem:[%s8290_s27 + $0x828] sm:$0xff] }
  0x3e   :  { %4646 = vmatpush1.bf16.msra.mxu1 %v4645_v37  ;;  %v6085_v37 = vld [vmem:[%s8291_s28 + $0x68] sm:$0xff]  ;;  %v6104_v46 = vld [vmem:[%s8291_s28 + $0x60] sm:$0xff]  ;;  %v4669_v55 = vpack.c.bf16 %v353_v44, %v346_v43  ;;  %v400_v0 = vld [vmem:[%s8290_s27 + $0x930] sm:$0xff] }
  0x3f   :  { %4648 = vmatprep.subr.bf16.mxu1 %v4647_v39  ;;  %v387_v39 = vld [vmem:[%s8290_s27 + $0x8c8] sm:$0xff]  ;;  %v6142_v60 = vld [vmem:[%s8291_s28 + $0x80] sm:$0xff]  ;;  %v381_v10 = vld [vmem:[%s8290_s27 + $0x898] sm:$0xff] }
  0x40   :  { %4554 = vmatpush1.bf16.msra.mxu0 %v4553_v29  ;;  %v339_v29 = vld [vmem:[%s8290_s27 + $0x748] sm:$0xff]  ;;  %v4579_v49 = vpack.c.bf16 %v394_v40, %v387_v39  ;;  %v422_v5 = vld [vmem:[%s8290_s27 + $0x9e0] sm:$0xff]  ;;  %v396_v14 = vld [vmem:[%s8290_s27 + $0x910] sm:$0xff] }
  0x41   :  { %4556 = vmatprep.subr.bf16.mxu0 %v4555_v32  ;;  %v347_v32 = vld [vmem:[%s8290_s27 + $0x788] sm:$0xff]  ;;  %v4665_v41 = vpack.c.bf16 %v339_v29, %v332_v28  ;;  %v374_v8 = vld [vmem:[%s8290_s27 + $0x860] sm:$0xff]  ;;  %v421_v18 = vld [vmem:[%s8290_s27 + $0x9d8] sm:$0xff] }
  0x42   :  { %4650 = vmatpush1.bf16.msra.mxu1 %v4649_v50  ;;  %v386_v50 = vld [vmem:[%s8290_s27 + $0x8c0] sm:$0xff]  ;;  %v375_v61 = vld [vmem:[%s8290_s27 + $0x868] sm:$0xff]  ;;  %v436_v21 = vld [vmem:[%s8290_s27 + $0xa50] sm:$0xff]  ;;  %v4677_v22 = vpack.c.bf16 %v381_v10, %v374_v8 }
  0x43   :  { %4652 = vmatprep.subr.bf16.mxu1 %v4651_v51  ;;  %v393_v51 = vld [vmem:[%s8290_s27 + $0x8f8] sm:$0xff]  ;;  %v407_v1 = vld [vmem:[%s8290_s27 + $0x968] sm:$0xff]  ;;  %v388_v25 = vld [vmem:[%s8290_s27 + $0x8d0] sm:$0xff] }
  0x44   :  { %4558 = vmatpush1.bf16.msra.mxu0 %v4557_v42  ;;  %v4667_v42 = vpack.c.bf16 %v354_v33, %v347_v32  ;;  %v4581_v59 = vpack.c.bf16 %v393_v51, %v386_v50  ;;  %v415_v4 = vld [vmem:[%s8290_s27 + $0x9a8] sm:$0xff]  ;;  %v4585_v11 = vpack.c.bf16 %v407_v1, %v400_v0  ;;  %v6218_v28 = vld [vmem:[%s8291_s28 + $0xc0] sm:$0xff]  ;;  %v428_v33 = vld [vmem:[%s8290_s27 + $0xa10] sm:$0xff] }
  0x45   :  { %4560 = vmatprep.subr.bf16.mxu0 %v4559_v45  ;;  %v4577_v45 = vpack.c.bf16 %v379_v36, %v372_v35  ;;  %v4587_v15 = vpack.c.bf16 %v422_v5, %v415_v4  ;;  %v6197_v19 = vld [vmem:[%s8291_s28 + $0xc8] sm:$0xff]  ;;  %v450_v39 = vld [vmem:[%s8290_s27 + $0xac0] sm:$0xff]  ;;  %v409_v43 = vld [vmem:[%s8290_s27 + $0x978] sm:$0xff] }
  0x46   :  { %4654 = vmatpush1.bf16.msra.mxu1 %v4653_v62  ;;  %v382_v62 = vld [vmem:[%s8290_s27 + $0x8a0] sm:$0xff]  ;;  %v403_v29 = vld [vmem:[%s8290_s27 + $0x948] sm:$0xff]  ;;  %v417_v47 = vld [vmem:[%s8290_s27 + $0x9b8] sm:$0xff] }
  0x47   :  { %4656 = vmatprep.subr.bf16.mxu1 %v4655_v63  ;;  %v4675_v7 = vpack.c.bf16 %v382_v62, %v375_v61  ;;  %v6235_v35 = vld [vmem:[%s8291_s28 + $0xe8] sm:$0xff]  ;;  %v424_v48 = vld [vmem:[%s8290_s27 + $0x9f0] sm:$0xff]  ;;  %v442_v50 = vld [vmem:[%s8290_s27 + $0xa80] sm:$0xff] }
  0x48   :  { %4562 = vmatpush1.bf16.msra.mxu0 %v4561_v54  ;;  %v408_v54 = vld [vmem:[%s8290_s27 + $0x970] sm:$0xff]  ;;  %v443_v36 = vld [vmem:[%s8290_s27 + $0xa88] sm:$0xff]  ;;  %v449_v51 = vld [vmem:[%s8290_s27 + $0xab8] sm:$0xff] }
  0x49   :  { %4564 = vmatprep.subr.bf16.mxu0 %v4563_v57  ;;  %v360_v57 = vld [vmem:[%s8290_s27 + $0x7f0] sm:$0xff]  ;;  %v4583_v63 = vpack.c.bf16 %v408_v54, %v401_v53  ;;  %v6273_v53 = vld [vmem:[%s8291_s28 + $0x18] sm:$0xff]  ;;  %v111_v54 = vld [vmem:[%s8290_s27 + $0x28] sm:$0xff]  ;;  %v4597_v61 = vpack.c.bf16 %v449_v51, %v442_v50 }
  0x4a   :  { %4658 = vmatpush1.bf16.msra.mxu1 %v4657_v12  ;;  %v6180_v12 = vld [vmem:[%s8291_s28 + $0xa0] sm:$0xff]  ;;  %v431_v62 = vld [vmem:[%s8290_s27 + $0xa28] sm:$0xff]  ;;  %v117_v4 = vld [vmem:[%s8290_s27 + $0x58] sm:$0xff] }
  0x4b   :  { %583 = vmatmul.mubr.f32.vlgmr.msra.gmra.mrb[0].mxu0 %v5996_v2  ;;  %4660 = vmatprep.subr.bf16.mxu1 %v4659_v13  ;;  %v389_v13 = vld [vmem:[%s8290_s27 + $0x8d8] sm:$0xff]  ;;  %v110_v1 = vld [vmem:[%s8290_s27 + $0x20] sm:$0xff]  ;;  %v119_v50 = vld [vmem:[%s8290_s27 + $0x68] sm:$0xff] }
  0x4c   :  { %4566 = vmatpush1.bf16.msra.mxu0 %v4565_v3  ;;  %588 = vmatprep.mubr.f32.mxu0 %v6013_v9  ;;  %v6159_v3 = vld [vmem:[%s8291_s28 + $0xa8] sm:$0xff]  ;;  %v4679_v24 = vpack.c.bf16 %v396_v14, %v389_v13  ;;  %v125_v5 = vld [vmem:[%s8290_s27 + $0x98] sm:$0xff]  ;;  %v430_v10 = vld [vmem:[%s8290_s27 + $0xa20] sm:$0xff]  ;;  %v4701_v14 = vpack.c.bf16 %v117_v4, %v110_v1 }
  0x4d   :  { %4568 = vmatprep.subr.bf16.mxu0 %v4567_v6  ;;  %v4673_v6 = vpack.c.bf16 %v367_v58, %v360_v57  ;;  %v4687_v57 = vpack.c.bf16 %v424_v48, %v417_v47  ;;  %v416_v58 = vld [vmem:[%s8290_s27 + $0x9b0] sm:$0xff]  ;;  %v126_v4 = vld [vmem:[%s8290_s27 + $0xa0] sm:$0xff] }
  0x4e   :  { %4662 = vmatpush1.bf16.msra.mxu1 %v4661_v26  ;;  %v395_v26 = vld [vmem:[%s8290_s27 + $0x908] sm:$0xff]  ;;  %v6321_v13 = vld [vmem:[%s8291_s28 + $0x10] sm:$0xff] }
  0x4f   :  { %589 = vmatmul.mubr.f32.gmra.mrb[2].mxu0 %v6032_v17  ;;  %4664 = vmatprep.subr.bf16.mxu1 %v4663_v27  ;;  %v4681_v40 = vpack.c.bf16 %v395_v26, %v388_v25  ;;  %v146_v25 = vld [vmem:[%s8290_s27 + $0x140] sm:$0xff]  ;;  %v6400_v51 = vld [vmem:[%s8291_s28 + $0x50] sm:$0xff] }
  0x50   :  { %4570 = vmatpush1.bf16.msra.mxu0 %v4569_v16  ;;  %594 = vmatprep.mubr.f32.mxu0 %v6049_v23  ;;  %v414_v16 = vld [vmem:[%s8290_s27 + $0x9a0] sm:$0xff] }
  0x51   :  { %4572 = vmatprep.subr.bf16.mxu0 %v4571_v20  ;;  %809 = vmatmul.mubr.f32.vlgmr.msra.gmra.mrb[0].mxu1 %v5996_v2  ;;  %v429_v20 = vld [vmem:[%s8290_s27 + $0xa18] sm:$0xff]  ;;  %v4589_v27 = vpack.c.bf16 %v421_v18, %v414_v16  ;;  %v452_v16 = vld [vmem:[%s8290_s27 + $0xad0] sm:$0xff] }
  0x52   :  { %4666 = vmatpush1.bf16.msra.mxu1 %v4665_v41  ;;  %814 = vmatprep.mubr.f32.mxu1 %v6013_v9  ;;  %v4591_v32 = vpack.c.bf16 %v436_v21, %v429_v20  ;;  %v6332_v18 = vld [vmem:[%s8291_s28 + $0x38] sm:$0xff]  ;;  %v124_v21 = vld [vmem:[%s8290_s27 + $0x90] sm:$0xff] }
  0x53   :  { %595 = vmatmul.mubr.f32.gmra.mrb[4].mxu0 %v6068_v31  ;;  %4668 = vmatprep.subr.bf16.mxu1 %v4667_v42  ;;  %v402_v42 = vld [vmem:[%s8290_s27 + $0x940] sm:$0xff] }
  0x54   :  { %4574 = vmatpush1.bf16.msra.mxu0 %v4573_v30  ;;  %600 = vmatprep.mubr.f32.mxu0 %v6085_v37  ;;  %v410_v30 = vld [vmem:[%s8290_s27 + $0x980] sm:$0xff] }
  0x55   :  { %4576 = vmatprep.subr.bf16.mxu0 %v4575_v34  ;;  %815 = vmatmul.mubr.f32.gmra.mrb[2].mxu1 %v6032_v17  ;;  %v435_v34 = vld [vmem:[%s8290_s27 + $0xa48] sm:$0xff]  ;;  %v4683_v41 = vpack.c.bf16 %v410_v30, %v403_v29  ;;  %v444_v29 = vld [vmem:[%s8290_s27 + $0xa90] sm:$0xff] }
  0x56   :  { %4670 = vmatpush1.bf16.msra.mxu1 %v4669_v55  ;;  %820 = vmatprep.mubr.f32.mxu1 %v6049_v23  ;;  %v4593_v44 = vpack.c.bf16 %v435_v34, %v428_v33  ;;  %v118_v55 = vld [vmem:[%s8290_s27 + $0x60] sm:$0xff]  ;;  %v451_v30 = vld [vmem:[%s8290_s27 + $0xac8] sm:$0xff]  ;;  %v224_v34 = vld [vmem:[%s8290_s27 + $0x3b0] sm:$0xff] }
  0x57   :  { %601 = vmatmul.mubr.f32.gmra.mrb[6].mxu0 %v6104_v46  ;;  %4672 = vmatprep.subr.bf16.mxu1 %v4671_v56  ;;  %v4685_v56 = vpack.c.bf16 %v409_v43, %v402_v42  ;;  %v4699_v0 = vpack.c.bf16 %v118_v55, %v111_v54  ;;  %v145_v42 = vld [vmem:[%s8290_s27 + $0x138] sm:$0xff]  ;;  %v4697_v47 = vpack.c.bf16 %v451_v30, %v444_v29  ;;  %v238_v55 = vld [vmem:[%s8290_s27 + $0x420] sm:$0xff] }
  0x58   :  { %4578 = vmatpush1.bf16.msra.mxu0 %v4577_v45  ;;  %606 = vmatprep.mubr.f32.mxu0 %v6121_v52  ;;  %v6256_v45 = vld [vmem:[%s8291_s28 + $0xe0] sm:$0xff]  ;;  %v153_v43 = vld [vmem:[%s8290_s27 + $0x178] sm:$0xff] }
  0x59   :  { %4580 = vmatprep.subr.bf16.mxu0 %v4579_v49  ;;  %821 = vmatmul.mubr.f32.gmra.mrb[4].mxu1 %v6068_v31  ;;  %v4595_v49 = vpack.c.bf16 %v450_v39, %v443_v36  ;;  %v231_v36 = vld [vmem:[%s8290_s27 + $0x3e8] sm:$0xff]  ;;  %v6371_v39 = vld [vmem:[%s8291_s28 + $0x58] sm:$0xff]  ;;  %v266_v30 = vld [vmem:[%s8290_s27 + $0x500] sm:$0xff] }
  0x5a   :  { %4674 = vmatpush1.bf16.msra.mxu1 %v4673_v6  ;;  %826 = vmatprep.mubr.f32.mxu1 %v6085_v37  ;;  %v132_v6 = vld [vmem:[%s8290_s27 + $0xd0] sm:$0xff]  ;;  %v4799_v48 = vpack.c.bf16 %v231_v36, %v224_v34  ;;  %v6488_v34 = vld [vmem:[%s8291_s28 + $0xb8] sm:$0xff] }
  0x5b   :  { %607 = vmatmul.mubr.f32.gmra.mrb[8].mxu0 %v6142_v60  ;;  %4676 = vmatprep.subr.bf16.mxu1 %v4675_v7  ;;  %v4703_v20 = vpack.c.bf16 %v132_v6, %v125_v5  ;;  %v133_v5 = vld [vmem:[%s8290_s27 + $0xd8] sm:$0xff]  ;;  %v6437_v6 = vld [vmem:[%s8291_s28 + $0x70] sm:$0xff] }
  0x5c   :  { %4582 = vmatpush1.bf16.msra.mxu0 %v4581_v59  ;;  %612 = vmatprep.mubr.f32.mxu0 %v6159_v3  ;;  %v423_v59 = vld [vmem:[%s8290_s27 + $0x9e8] sm:$0xff] }
  0x5d   :  { %4584 = vmatprep.subr.bf16.mxu0 %v4583_v63  ;;  %827 = vmatmul.mubr.f32.gmra.mrb[6].mxu1 %v6104_v46  ;;  %v438_v63 = vld [vmem:[%s8290_s27 + $0xa60] sm:$0xff]  ;;  %v4689_v7 = vpack.c.bf16 %v423_v59, %v416_v58  ;;  %v152_v59 = vld [vmem:[%s8290_s27 + $0x170] sm:$0xff] }
  0x5e   :  { %4678 = vmatpush1.bf16.msra.mxu1 %v4677_v22  ;;  %832 = vmatprep.mubr.f32.mxu1 %v6121_v52  ;;  %v4691_v8 = vpack.c.bf16 %v438_v63, %v431_v62  ;;  %v131_v22 = vld [vmem:[%s8290_s27 + $0xc8] sm:$0xff]  ;;  %v174_v63 = vld [vmem:[%s8290_s27 + $0x220] sm:$0xff] }
  0x5f   :  { %613 = vmatmul.mubr.f32.gmra.mrb[10].mxu0 %v6180_v12  ;;  %4680 = vmatprep.subr.bf16.mxu1 %v4679_v24  ;;  %v139_v24 = vld [vmem:[%s8290_s27 + $0x108] sm:$0xff]  ;;  %v4705_v33 = vpack.c.bf16 %v131_v22, %v124_v21  ;;  %v188_v21 = vld [vmem:[%s8290_s27 + $0x290] sm:$0xff]  ;;  %v4805_v22 = vpack.c.bf16 %v133_v5, %v126_v4 }
  0x60   :  { %4586 = vmatpush1.bf16.msra.mxu0 %v4585_v11  ;;  %618 = vmatprep.mubr.f32.mxu0 %v6197_v19  ;;  %v437_v11 = vld [vmem:[%s8290_s27 + $0xa58] sm:$0xff]  ;;  %v167_v62 = vld [vmem:[%s8290_s27 + $0x1e8] sm:$0xff]  ;;  %v168_v5 = vld [vmem:[%s8290_s27 + $0x1f0] sm:$0xff] }
  0x61   :  { %4588 = vmatprep.subr.bf16.mxu0 %v4587_v15  ;;  %833 = vmatmul.mubr.f32.gmra.mrb[8].mxu1 %v6142_v60  ;;  %v445_v15 = vld [vmem:[%s8290_s27 + $0xa98] sm:$0xff]  ;;  %v4693_v26 = vpack.c.bf16 %v437_v11, %v430_v10  ;;  %v259_v10 = vld [vmem:[%s8290_s27 + $0x4c8] sm:$0xff] }
  0x62   :  { %4682 = vmatpush1.bf16.msra.mxu1 %v4681_v40  ;;  %838 = vmatprep.mubr.f32.mxu1 %v6159_v3  ;;  %v4707_v40 = vpack.c.bf16 %v146_v25, %v139_v24  ;;  %v6448_v11 = vld [vmem:[%s8291_s28 + $0x98] sm:$0xff]  ;;  %v140_v25 = vld [vmem:[%s8290_s27 + $0x110] sm:$0xff] }
  0x63   :  { %619 = vmatmul.mubr.f32.gmra.mrb[12].mxu0 %v6218_v28  ;;  %4684 = vmatprep.subr.bf16.mxu1 %v4683_v41  ;;  %v138_v41 = vld [vmem:[%s8290_s27 + $0x100] sm:$0xff] }
  0x64   :  { %4590 = vmatpush1.bf16.msra.mxu0 %v4589_v27  ;;  %624 = vmatprep.mubr.f32.mxu0 %v6235_v35  ;;  %v4695_v27 = vpack.c.bf16 %v452_v16, %v445_v15  ;;  %v4709_v54 = vpack.c.bf16 %v145_v42, %v138_v41  ;;  %v166_v15 = vld [vmem:[%s8290_s27 + $0x1e0] sm:$0xff]  ;;  %v173_v16 = vld [vmem:[%s8290_s27 + $0x218] sm:$0xff]  ;;  %v187_v41 = vld [vmem:[%s8290_s27 + $0x288] sm:$0xff] }
  0x65   :  { %4592 = vmatprep.subr.bf16.mxu0 %v4591_v32  ;;  %839 = vmatmul.mubr.f32.gmra.mrb[10].mxu1 %v6180_v12  ;;  %v6360_v32 = vld [vmem:[%s8291_s28 + $0x30] sm:$0xff]  ;;  %v4717_v29 = vpack.c.bf16 %v173_v16, %v166_v15  ;;  %v195_v42 = vld [vmem:[%s8290_s27 + $0x2c8] sm:$0xff]  ;;  %v301_v15 = vld [vmem:[%s8290_s27 + $0x618] sm:$0xff] }
  0x66   :  { %4686 = vmatpush1.bf16.msra.mxu1 %v4685_v56  ;;  %844 = vmatprep.mubr.f32.mxu1 %v6197_v19  ;;  %v245_v56 = vld [vmem:[%s8290_s27 + $0x458] sm:$0xff] }
  0x67   :  { %625 = vmatmul.mubr.f32.gmra.mrb[14].mxu0 %v6256_v45  ;;  %4688 = vmatprep.subr.bf16.mxu1 %v4687_v57  ;;  %v6411_v57 = vld [vmem:[%s8291_s28 + $0x78] sm:$0xff]  ;;  %v4803_v1 = vpack.c.bf16 %v245_v56, %v238_v55  ;;  %v280_v55 = vld [vmem:[%s8290_s27 + $0x570] sm:$0xff]  ;;  %v287_v56 = vld [vmem:[%s8290_s27 + $0x5a8] sm:$0xff] }
  0x68   :  { %4594 = vmatpush1.bf16.msra.mxu0 %v4593_v44  ;;  %3968 = vmatprep.mubr.msk.f32.mxu0 %vm493_vm0, %v6273_v53  ;;  %v160_v44 = vld [vmem:[%s8290_s27 + $0x1b0] sm:$0xff]  ;;  %v4815_v4 = vpack.c.bf16 %v287_v56, %v280_v55  ;;  %v6568_v16 = vld [vmem:[%s8291_s28 + $0xf8] sm:$0xff] }
  0x69   :  { %4596 = vmatprep.subr.bf16.mxu0 %v4595_v49  ;;  %845 = vmatmul.mubr.f32.gmra.mrb[12].mxu1 %v6218_v28  ;;  %v112_v49 = vld [vmem:[%s8290_s27 + $0x30] sm:$0xff]  ;;  %v4711_v58 = vpack.c.bf16 %v160_v44, %v153_v43  ;;  %v202_v43 = vld [vmem:[%s8290_s27 + $0x300] sm:$0xff] }
  0x6a   :  { %4690 = vmatpush1.bf16.msra.mxu1 %v4689_v7  ;;  %850 = vmatprep.mubr.f32.mxu1 %v6235_v35  ;;  %v196_v56 = vld [vmem:[%s8290_s27 + $0x2d0] sm:$0xff] }
  0x6b   :  { %4692 = vmatprep.subr.bf16.mxu1 %v4691_v8  ;;  %v252_v8 = vld [vmem:[%s8290_s27 + $0x490] sm:$0xff] }
  0x6c   :  { %4598 = vmatpush1.bf16.msra.mxu0 %v4597_v61  ;;  %v159_v61 = vld [vmem:[%s8290_s27 + $0x1a8] sm:$0xff]  ;;  %v4807_v24 = vpack.c.bf16 %v259_v10, %v252_v8  ;;  %v6557_v8 = vld [vmem:[%s8291_s28 + $0xd0] sm:$0xff] }
  0x6d   :  { %4700 = vmatprep.subr.bf16.mxu0 %v4699_v0  ;;  %851 = vmatmul.mubr.f32.gmra.mrb[14].mxu1 %v6256_v45  ;;  %v4801_v0 = vpack.c.bf16 %v119_v50, %v112_v49  ;;  %v4713_v7 = vpack.c.bf16 %v159_v61, %v152_v59  ;;  %v161_v49 = vld [vmem:[%s8290_s27 + $0x1b8] sm:$0xff]  ;;  %v6517_v50 = vld [vmem:[%s8291_s28 + $0xb0] sm:$0xff]  ;;  %v4723_v59 = vpack.c.bf16 %v202_v43, %v195_v42  ;;  %v194_v61 = vld [vmem:[%s8290_s27 + $0x2c0] sm:$0xff] }
  0x6e   :  { %4694 = vmatpush1.bf16.msra.mxu1 %v4693_v26  ;;  %3976 = vmatprep.mubr.msk.f32.mxu1 %vm493_vm0, %v6273_v53  ;;  %v147_v26 = vld [vmem:[%s8290_s27 + $0x148] sm:$0xff] }
  0x6f   :  { %696 = vmatmul.mubr.f32.vlgmr.msra.gmra.mrb[0].mxu0 %v6321_v13  ;;  %4696 = vmatprep.subr.bf16.mxu1 %v4695_v27  ;;  %v6477_v27 = vld [vmem:[%s8291_s28 + $0x90] sm:$0xff]  ;;  %v4809_v44 = vpack.c.bf16 %v147_v26, %v140_v25  ;;  %v230_v25 = vld [vmem:[%s8290_s27 + $0x3e0] sm:$0xff]  ;;  %v315_v42 = vld [vmem:[%s8290_s27 + $0x688] sm:$0xff] }
  0x70   :  { %4702 = vmatpush1.bf16.msra.mxu0 %v4701_v14  ;;  %3969 = vmatprep.mubr.msk.f32.mxu0 %vm493_vm0, %v6332_v18  ;;  %v4715_v14 = vpack.c.bf16 %v174_v63, %v167_v62  ;;  %v201_v62 = vld [vmem:[%s8290_s27 + $0x2f8] sm:$0xff] }
  0x71   :  { %4704 = vmatprep.subr.bf16.mxu0 %v4703_v20  ;;  %v181_v20 = vld [vmem:[%s8290_s27 + $0x258] sm:$0xff]  ;;  %v4725_v10 = vpack.c.bf16 %v201_v62, %v194_v61  ;;  %v322_v62 = vld [vmem:[%s8290_s27 + $0x6c0] sm:$0xff] }
  0x72   :  { %4698 = vmatpush1.bf16.msra.mxu1 %v4697_v47  ;;  %v4719_v36 = vpack.c.bf16 %v188_v21, %v181_v20  ;;  %v209_v63 = vld [vmem:[%s8290_s27 + $0x338] sm:$0xff]  ;;  %v208_v21 = vld [vmem:[%s8290_s27 + $0x330] sm:$0xff] }
  0x73   :  { %702 = vmatmul.mubr.f32.gmra.mrb[2].mxu0 %v6360_v32  ;;  %4800 = vmatprep.subr.bf16.mxu1 %v4799_v48  ;;  %v154_v48 = vld [vmem:[%s8290_s27 + $0x180] sm:$0xff] }
  0x74   :  { %4706 = vmatpush1.bf16.msra.mxu0 %v4705_v33  ;;  %3970 = vmatprep.mubr.msk.f32.mxu0 %vm493_vm0, %v6371_v39  ;;  %v273_v33 = vld [vmem:[%s8290_s27 + $0x538] sm:$0xff] }
  0x75   :  { %4708 = vmatprep.subr.bf16.mxu0 %v4707_v40  ;;  %922 = vmatmul.mubr.f32.vlgmr.msra.gmra.mrb[0].mxu1 %v6321_v13  ;;  %v180_v40 = vld [vmem:[%s8290_s27 + $0x250] sm:$0xff]  ;;  %v4811_v47 = vpack.c.bf16 %v273_v33, %v266_v30  ;;  %v182_v30 = vld [vmem:[%s8290_s27 + $0x260] sm:$0xff]  ;;  %v189_v33 = vld [vmem:[%s8290_s27 + $0x298] sm:$0xff] }
  0x76   :  { %3977 = vmatprep.mubr.msk.f32.mxu1 %vm493_vm0, %v6332_v18  ;;  %4802 = vmatpush3.bf16.msra.mxu1 %v4801_v0  ;;  %v216_v0 = vld [vmem:[%s8290_s27 + $0x370] sm:$0xff] }
  0x77   :  { %708 = vmatmul.mubr.f32.gmra.mrb[4].mxu0 %v6400_v51  ;;  %4804 = vmatprep.subr.bf16.mxu1 %v4803_v1  ;;  %v4813_v1 = vpack.c.bf16 %v161_v49, %v154_v48  ;;  %v4727_v20 = vpack.c.bf16 %v216_v0, %v209_v63  ;;  %v237_v48 = vld [vmem:[%s8290_s27 + $0x418] sm:$0xff]  ;;  %v244_v49 = vld [vmem:[%s8290_s27 + $0x450] sm:$0xff] }
  0x78   :  { %4710 = vmatpush1.bf16.msra.mxu0 %v4709_v54  ;;  %3971 = vmatprep.mubr.msk.f32.mxu0 %vm493_vm0, %v6411_v57  ;;  %v4721_v54 = vpack.c.bf16 %v187_v41, %v180_v40  ;;  %v308_v41 = vld [vmem:[%s8290_s27 + $0x650] sm:$0xff]  ;;  %v329_v63 = vld [vmem:[%s8290_s27 + $0x6f8] sm:$0xff]  ;;  %v4735_v0 = vpack.c.bf16 %v244_v49, %v237_v48  ;;  %v5463_v48 = vld [vmem:[%s8291_s28 + $0x8] sm:$0xff] }
  0x79   :  { %4712 = vmatprep.subr.bf16.mxu0 %v4711_v58  ;;  %928 = vmatmul.mubr.f32.gmra.mrb[2].mxu1 %v6360_v32  ;;  %v6528_v58 = vld [vmem:[%s8291_s28 + $0xd8] sm:$0xff]  ;;  %v4823_v55 = vpack.c.bf16 %v315_v42, %v308_v41  ;;  %v264_v42 = vld [vmem:[%s8290_s27 + $0x4f0] sm:$0xff] }
  0x7a   :  { %3978 = vmatprep.mubr.msk.f32.mxu1 %vm493_vm0, %v6371_v39  ;;  %4806 = vmatpush3.bf16.msra.mxu1 %v4805_v22  ;;  %v215_v22 = vld [vmem:[%s8290_s27 + $0x368] sm:$0xff] }
  0x7b   :  { %714 = vmatmul.mubr.f32.gmra.mrb[6].mxu0 %v6437_v6  ;;  %4808 = vmatprep.subr.bf16.mxu1 %v4807_v24  ;;  %v223_v24 = vld [vmem:[%s8290_s27 + $0x3a8] sm:$0xff]  ;;  %v4729_v40 = vpack.c.bf16 %v215_v22, %v208_v21  ;;  %v250_v22 = vld [vmem:[%s8290_s27 + $0x480] sm:$0xff] }
  0x7c   :  { %4714 = vmatpush1.bf16.msra.mxu0 %v4713_v7  ;;  %3972 = vmatprep.mubr.msk.f32.mxu0 %vm493_vm0, %v6448_v11  ;;  %v175_v7 = vld [vmem:[%s8290_s27 + $0x228] sm:$0xff]  ;;  %v4731_v43 = vpack.c.bf16 %v230_v25, %v223_v24  ;;  %v257_v24 = vld [vmem:[%s8290_s27 + $0x4b8] sm:$0xff] }
  0x7d   :  { %4716 = vmatprep.subr.bf16.mxu0 %v4715_v14  ;;  %934 = vmatmul.mubr.f32.gmra.mrb[4].mxu1 %v6400_v51  ;;  %v294_v14 = vld [vmem:[%s8290_s27 + $0x5e0] sm:$0xff]  ;;  %v4817_v26 = vpack.c.bf16 %v175_v7, %v168_v5  ;;  %v265_v25 = vld [vmem:[%s8290_s27 + $0x4f8] sm:$0xff] }
  0x7e   :  { %3979 = vmatprep.mubr.msk.f32.mxu1 %vm493_vm0, %v6411_v57  ;;  %4810 = vmatpush3.bf16.msra.mxu1 %v4809_v44  ;;  %v222_v44 = vld [vmem:[%s8290_s27 + $0x3a0] sm:$0xff] }
  0x7f   :  { %720 = vmatmul.mubr.f32.gmra.mrb[8].mxu0 %v6477_v27  ;;  %4812 = vmatprep.subr.bf16.mxu1 %v4811_v47  ;;  %v229_v47 = vld [vmem:[%s8290_s27 + $0x3d8] sm:$0xff]  ;;  %v258_v5 = vld [vmem:[%s8290_s27 + $0x4c0] sm:$0xff] }
  0x80   :  { %4718 = vmatpush1.bf16.msra.mxu0 %v4717_v29  ;;  %3973 = vmatprep.mubr.msk.f32.mxu0 %vm493_vm0, %v6488_v34  ;;  %v4819_v29 = vpack.c.bf16 %v301_v15, %v294_v14  ;;  %v4733_v61 = vpack.c.bf16 %v229_v47, %v222_v44  ;;  %v210_v14 = vld [vmem:[%s8290_s27 + $0x340] sm:$0xff]  ;;  %v217_v15 = vld [vmem:[%s8290_s27 + $0x378] sm:$0xff]  ;;  %v279_v44 = vld [vmem:[%s8290_s27 + $0x568] sm:$0xff] }
  0x81   :  { %4720 = vmatprep.subr.bf16.mxu0 %v4719_v36  ;;  %940 = vmatmul.mubr.f32.gmra.mrb[6].mxu1 %v6437_v6  ;;  %v6597_v36 = vld [vmem:[%s8291_s28 + $0xf0] sm:$0xff]  ;;  %v286_v47 = vld [vmem:[%s8290_s27 + $0x5a0] sm:$0xff]  ;;  %s8292_s28 = sld [smem:[#allocation4_spill]] }
  0x82   :  { %3980 = vmatprep.mubr.msk.f32.mxu1 %vm493_vm0, %v6448_v11  ;;  %4814 = vmatpush3.bf16.msra.mxu1 %v4813_v1  ;;  %v236_v1 = vld [vmem:[%s8290_s27 + $0x410] sm:$0xff] }
  0x83   :  { %726 = vmatmul.mubr.f32.gmra.mrb[10].mxu0 %v6517_v50  ;;  %4816 = vmatprep.subr.bf16.mxu1 %v4815_v4  ;;  %v243_v4 = vld [vmem:[%s8290_s27 + $0x448] sm:$0xff] }
  0x84   :  { %4722 = vmatpush1.bf16.msra.mxu0 %v4721_v54  ;;  %3974 = vmatprep.mubr.msk.f32.mxu0 %vm493_vm0, %v6528_v58  ;;  %v4821_v54 = vpack.c.bf16 %v189_v33, %v182_v30  ;;  %v336_v30 = vld [vmem:[%s8290_s27 + $0x730] sm:$0xff]  ;;  %v343_v33 = vld [vmem:[%s8290_s27 + $0x768] sm:$0xff] }
  0x85   :  { %4724 = vmatprep.subr.bf16.mxu0 %v4723_v59  ;;  %946 = vmatmul.mubr.f32.gmra.mrb[8].mxu1 %v6477_v27  ;;  %v203_v59 = vld [vmem:[%s8290_s27 + $0x308] sm:$0xff]  ;;  %v4832_v49 = vpack.c.bf16 %v343_v33, %v336_v30  ;;  %v306_v30 = vld [vmem:[%s8290_s27 + $0x640] sm:$0xff]  ;;  %v313_v33 = vld [vmem:[%s8290_s27 + $0x678] sm:$0xff] }
  0x86   :  { %3981 = vmatprep.mubr.msk.f32.mxu1 %vm493_vm0, %v6488_v34  ;;  %4818 = vmatpush3.bf16.msra.mxu1 %v4817_v26  ;;  %v4825_v7 = vpack.c.bf16 %v203_v59, %v196_v56  ;;  %v272_v26 = vld [vmem:[%s8290_s27 + $0x530] sm:$0xff]  ;;  %v357_v56 = vld [vmem:[%s8290_s27 + $0x7d8] sm:$0xff] }
  0x87   :  { %732 = vmatmul.mubr.f32.gmra.mrb[12].mxu0 %v6557_v8  ;;  %4820 = vmatprep.subr.bf16.mxu1 %v4819_v29  ;;  %v4829_v29 = vpack.c.bf16 %v217_v15, %v210_v14  ;;  %v4743_v41 = vpack.c.bf16 %v272_v26, %v265_v25  ;;  %v292_v14 = vld [vmem:[%s8290_s27 + $0x5d0] sm:$0xff]  ;;  %v299_v15 = vld [vmem:[%s8290_s27 + $0x608] sm:$0xff]  ;;  %v385_v25 = vld [vmem:[%s8290_s27 + $0x8b8] sm:$0xff] }
  0x88   :  { %4726 = vmatpush1.bf16.msra.mxu0 %v4725_v10  ;;  %3975 = vmatprep.mubr.msk.f32.mxu0 %vm493_vm0, %v6568_v16  ;;  %v4827_v10 = vpack.c.bf16 %v329_v63, %v322_v62  ;;  %v278_v62 = vld [vmem:[%s8290_s27 + $0x560] sm:$0xff]  ;;  %v285_v63 = vld [vmem:[%s8290_s27 + $0x598] sm:$0xff]  ;;  %v4753_v26 = vpack.c.bf16 %v299_v15, %v292_v14  ;;  %v420_v14 = vld [vmem:[%s8290_s27 + $0x9d0] sm:$0xff] }
  0x89   :  { %4728 = vmatprep.subr.bf16.mxu0 %v4727_v20  ;;  %952 = vmatmul.mubr.f32.gmra.mrb[10].mxu1 %v6517_v50  ;;  %v4737_v20 = vpack.c.bf16 %v243_v4, %v236_v1  ;;  %v300_v1 = vld [vmem:[%s8290_s27 + $0x610] sm:$0xff]  ;;  %v427_v15 = vld [vmem:[%s8290_s27 + $0xa08] sm:$0xff] }
  0x8a   :  { %3982 = vmatprep.mubr.msk.f32.mxu1 %vm493_vm0, %v6528_v58  ;;  %4822 = vmatpush3.bf16.msra.mxu1 %v4821_v54  ;;  %v5464_v54 = vmov 0.0|0.0  }
  0x8b   :  { %738 = vmatmul.mubr.f32.gmra.mrb[14].mxu0 %v6597_v36  ;;  %4824 = vmatprep.subr.bf16.mxu1 %v4823_v55  ;;  %v350_v55 = vld [vmem:[%s8290_s27 + $0x7a0] sm:$0xff] }
  0x8c   :  { %4730 = vmatpush1.bf16.msra.mxu0 %v4729_v40  ;;  %1034 = vmatprep.mubr.f32.mxu0 %v5809_v38  ;;  %v251_v38 = vld [vmem:[%s8290_s27 + $0x488] sm:$0xff]  ;;  %v4741_v40 = vpack.c.bf16 %v257_v24, %v250_v22  ;;  %v4835_v4 = vpack.c.bf16 %v357_v56, %v350_v55  ;;  %v378_v24 = vld [vmem:[%s8290_s27 + $0x880] sm:$0xff] }
  0x8d   :  { %4732 = vmatprep.subr.bf16.mxu0 %v4731_v43  ;;  %v4739_v21 = vpack.c.bf16 %v258_v5, %v251_v38  ;;  %958 = vmatmul.mubr.f32.gmra.mrb[12].mxu1 %v6557_v8  ;;  %v271_v43 = vld [vmem:[%s8290_s27 + $0x528] sm:$0xff]  ;;  %v364_v38 = vld [vmem:[%s8290_s27 + $0x810] sm:$0xff] }
  0x8e   :  { %3983 = vmatprep.mubr.msk.f32.mxu1 %vm493_vm0, %v6568_v16  ;;  %4826 = vmatpush3.bf16.msra.mxu1 %v4825_v7  ;;  %v4745_v59 = vpack.c.bf16 %v271_v43, %v264_v42  ;;  %v371_v5 = vld [vmem:[%s8290_s27 + $0x848] sm:$0xff]  ;;  %v4749_v7 = vpack.c.bf16 %v285_v63, %v278_v62  ;;  %v4841_v42 = vpack.c.bf16 %v385_v25, %v378_v24  ;;  %v392_v43 = vld [vmem:[%s8290_s27 + $0x8f0] sm:$0xff]  ;;  %v406_v62 = vld [vmem:[%s8290_s27 + $0x960] sm:$0xff] }
  0x8f   :  { %4828 = vmatprep.subr.bf16.mxu1 %v4827_v10  ;;  %v4838_v22 = vpack.c.bf16 %v371_v5, %v364_v38  ;;  %v327_v55 = vld [vmem:[%s8290_s27 + $0x6e8] sm:$0xff]  ;;  %v413_v63 = vld [vmem:[%s8290_s27 + $0x998] sm:$0xff] }
  0x90   :  { %4734 = vmatpush1.bf16.msra.mxu0 %v4733_v61  ;;  %v4747_v61 = vpack.c.bf16 %v286_v47, %v279_v44  ;;  %v399_v44 = vld [vmem:[%s8290_s27 + $0x928] sm:$0xff]  ;;  %v4757_v47 = vpack.c.bf16 %v313_v33, %v306_v30  ;;  %v341_v38 = vld [vmem:[%s8290_s27 + $0x758] sm:$0xff]  ;;  %v434_v30 = vld [vmem:[%s8290_s27 + $0xa40] sm:$0xff] }
  0x91   :  { %4736 = vmatprep.subr.bf16.mxu0 %v4735_v0  ;;  %964 = vmatmul.mubr.f32.gmra.mrb[14].mxu1 %v6597_v36  ;;  %v293_v0 = vld [vmem:[%s8290_s27 + $0x5d8] sm:$0xff]  ;;  %v335_v56 = vld [vmem:[%s8290_s27 + $0x728] sm:$0xff] }
  0x92   :  { %4830 = vmatpush3.bf16.msra.mxu1 %v4829_v29  ;;  %1260 = vmatprep.mubr.f32.mxu1 %v5463_v48  ;;  %v4751_v10 = vpack.c.bf16 %v300_v1, %v293_v0  ;;  %v349_v5 = vld [vmem:[%s8290_s27 + $0x798] sm:$0xff]  ;;  %v355_v24 = vld [vmem:[%s8290_s27 + $0x7c8] sm:$0xff] }
  0x93   :  { %4831 = vmatprep.subr.bf16.mxu1 %v5464_v54  ;;  %v363_v25 = vld [vmem:[%s8290_s27 + $0x808] sm:$0xff]  ;;  %v441_v33 = vld [vmem:[%s8290_s27 + $0xa78] sm:$0xff] }
  0x94   :  { %4738 = vmatpush1.bf16.msra.mxu0 %v4737_v20  ;;  %v307_v20 = vld [vmem:[%s8290_s27 + $0x648] sm:$0xff] }
  0x95   :  { %4740 = vmatprep.subr.bf16.mxu0 %v4739_v21  ;;  %1261 = vmatmul.mubr.f32.vlgmr.msra.gmra.mrb[16].mxu1 %v5996_v2  ;;  %v314_v21 = vld [vmem:[%s8290_s27 + $0x680] sm:$0xff] }
  0x96   :  { %4833 = vmatpush1.bf16.msra.mxu1 %v4832_v49  ;;  %1265 = vmatprep.mubr.f32.mxu1 %v6013_v9  ;;  %v4755_v29 = vpack.c.bf16 %v314_v21, %v307_v20  ;;  %v320_v49 = vld [vmem:[%s8290_s27 + $0x6b0] sm:$0xff] }
  0x97   :  { %4834 = vmatprep.subr.bf16.mxu1 %v5464_v54  ;;  %v4761_v0 = vpack.c.bf16 %v327_v55, %v320_v49  ;;  %v1463_v55 = vld [vmem:[%s8292_s28 + $0x8] sm:$0xff] }
  0x98   :  { %4742 = vmatpush1.bf16.msra.mxu0 %v4741_v40  ;;  %v321_v40 = vld [vmem:[%s8290_s27 + $0x6b8] sm:$0xff] }
  0x99   :  { %4744 = vmatprep.subr.bf16.mxu0 %v4743_v41  ;;  %1266 = vmatmul.mubr.f32.gmra.mrb[18].mxu1 %v6032_v17  ;;  %v328_v41 = vld [vmem:[%s8290_s27 + $0x6f0] sm:$0xff] }
  0x9a   :  { %4836 = vmatpush1.bf16.msra.mxu1 %v4835_v4  ;;  %1270 = vmatprep.mubr.f32.mxu1 %v6049_v23  ;;  %v4759_v48 = vpack.c.bf16 %v328_v41, %v321_v40  ;;  %v334_v4 = vld [vmem:[%s8290_s27 + $0x720] sm:$0xff] }
  0x9b   :  { %4837 = vmatprep.subr.bf16.mxu1 %v5464_v54  ;;  %v4765_v20 = vpack.c.bf16 %v341_v38, %v334_v4  ;;  %v1464_v4 = vld [vmem:[%s8292_s28 + $0x10] sm:$0xff] }
  0x9c   :  { %4746 = vmatpush1.bf16.msra.mxu0 %v4745_v59  ;;  %v342_v59 = vld [vmem:[%s8290_s27 + $0x760] sm:$0xff] }
  0x9d   :  { %4748 = vmatprep.subr.bf16.mxu0 %v4747_v61  ;;  %1271 = vmatmul.mubr.f32.gmra.mrb[20].mxu1 %v6068_v31  ;;  %v4844_v61 = vpack.c.bf16 %v399_v44, %v392_v43  ;;  %v4763_v1 = vpack.c.bf16 %v342_v59, %v335_v56  ;;  %v377_v43 = vld [vmem:[%s8290_s27 + $0x878] sm:$0xff]  ;;  %v4853_v44 = vpack.c.bf16 %v441_v33, %v434_v30  ;;  %v376_v59 = vld [vmem:[%s8290_s27 + $0x870] sm:$0xff]  ;;  %v411_v33 = vld [vmem:[%s8290_s27 + $0x988] sm:$0xff] }
  0x9e   :  { %4839 = vmatpush1.bf16.msra.mxu1 %v4838_v22  ;;  %1275 = vmatprep.mubr.f32.mxu1 %v6085_v37  ;;  %v348_v22 = vld [vmem:[%s8290_s27 + $0x790] sm:$0xff] }
  0x9f   :  { %4840 = vmatprep.subr.bf16.mxu1 %v5464_v54  ;;  %v4769_v40 = vpack.c.bf16 %v355_v24, %v348_v22  ;;  %v1466_v22 = vld [vmem:[%s8292_s28 + $0x20] sm:$0xff]  ;;  %v1468_v24 = vld [vmem:[%s8292_s28 + $0x30] sm:$0xff] }
  0xa0   :  { %4750 = vmatpush1.bf16.msra.mxu0 %v4749_v7  ;;  %v356_v7 = vld [vmem:[%s8290_s27 + $0x7d0] sm:$0xff] }
  0xa1   :  { %4752 = vmatprep.subr.bf16.mxu0 %v4751_v10  ;;  %1276 = vmatmul.mubr.f32.gmra.mrb[22].mxu1 %v6104_v46  ;;  %v4847_v10 = vpack.c.bf16 %v413_v63, %v406_v62  ;;  %v4767_v21 = vpack.c.bf16 %v356_v7, %v349_v5  ;;  %v398_v62 = vld [vmem:[%s8290_s27 + $0x920] sm:$0xff]  ;;  %v1467_v5 = vld [vmem:[%s8292_s28 + $0x28] sm:$0xff]  ;;  %v404_v30 = vld [vmem:[%s8290_s27 + $0x950] sm:$0xff] }
  0xa2   :  { %4842 = vmatpush1.bf16.msra.mxu1 %v4841_v42  ;;  %1280 = vmatprep.mubr.f32.mxu1 %v6121_v52  ;;  %v369_v42 = vld [vmem:[%s8290_s27 + $0x838] sm:$0xff] }
  0xa3   :  { %4843 = vmatprep.subr.bf16.mxu1 %v5464_v54 }
  0xa4   :  { %4754 = vmatpush1.bf16.msra.mxu0 %v4753_v26  ;;  %v370_v26 = vld [vmem:[%s8290_s27 + $0x840] sm:$0xff] }
  0xa5   :  { %4756 = vmatprep.subr.bf16.mxu0 %v4755_v29  ;;  %1281 = vmatmul.mubr.f32.gmra.mrb[24].mxu1 %v6142_v60  ;;  %v4850_v29 = vpack.c.bf16 %v427_v15, %v420_v14  ;;  %v4771_v41 = vpack.c.bf16 %v370_v26, %v363_v25  ;;  %v397_v14 = vld [vmem:[%s8290_s27 + $0x918] sm:$0xff]  ;;  %v412_v15 = vld [vmem:[%s8290_s27 + $0x990] sm:$0xff]  ;;  %v1471_v26 = vld [vmem:[%s8292_s28 + $0x48] sm:$0xff] }
  0xa6   :  { %4845 = vmatpush1.bf16.msra.mxu1 %v4844_v61  ;;  %1285 = vmatprep.mubr.f32.mxu1 %v6159_v3  ;;  %v383_v61 = vld [vmem:[%s8290_s27 + $0x8a8] sm:$0xff] }
  0xa7   :  { %4846 = vmatprep.subr.bf16.mxu1 %v5464_v54  ;;  %v4777_v38 = vpack.c.bf16 %v383_v61, %v376_v59  ;;  %v1474_v59 = vld [vmem:[%s8292_s28 + $0x60] sm:$0xff]  ;;  %v1476_v61 = vld [vmem:[%s8292_s28 + $0x70] sm:$0xff] }
  0xa8   :  { %4758 = vmatpush1.bf16.msra.mxu0 %v4757_v47  ;;  %v448_v47 = vld [vmem:[%s8290_s27 + $0xab0] sm:$0xff] }
  0xa9   :  { %4760 = vmatprep.subr.bf16.mxu0 %v4759_v48  ;;  %1286 = vmatmul.mubr.f32.gmra.mrb[26].mxu1 %v6180_v12  ;;  %v455_v48 = vld [vmem:[%s8290_s27 + $0xae8] sm:$0xff] }
  0xaa   :  { %4848 = vmatpush1.bf16.msra.mxu1 %v4847_v10  ;;  %1290 = vmatprep.mubr.f32.mxu1 %v6197_v19  ;;  %v4856_v63 = vpack.c.bf16 %v455_v48, %v448_v47  ;;  %v390_v10 = vld [vmem:[%s8290_s27 + $0x8e0] sm:$0xff] }
  0xab   :  { %4849 = vmatprep.subr.bf16.mxu1 %v5464_v54  ;;  %v4781_v25 = vpack.c.bf16 %v397_v14, %v390_v10  ;;  %v418_v48 = vld [vmem:[%s8290_s27 + $0x9c0] sm:$0xff]  ;;  %v1483_v14 = vld [vmem:[%s8292_s28 + $0xa8] sm:$0xff] }
  0xac   :  { %4762 = vmatpush1.bf16.msra.mxu0 %v4761_v0 }
  0xad   :  { %4764 = vmatprep.subr.bf16.mxu0 %v4763_v1  ;;  %1291 = vmatmul.mubr.f32.gmra.mrb[28].mxu1 %v6218_v28  ;;  %v1462_v1 = vld [vmem:[%s8292_s28] sm:$0xff] }
  0xae   :  { %4851 = vmatpush1.bf16.msra.mxu1 %v4850_v29  ;;  %1295 = vmatprep.mubr.f32.mxu1 %v6235_v35 }
  0xaf   :  { %1035 = vmatmul.mubr.f32.vlgmr.msra.gmra.mrb[16].mxu0 %v5996_v2  ;;  %v362_v2 = vld [vmem:[%s8290_s27 + $0x800] sm:$0xff]  ;;  %4852 = vmatprep.subr.bf16.mxu1 %v5464_v54 }
  0xb0   :  { %4766 = vmatpush1.bf16.msra.mxu0 %v4765_v20  ;;  %1040 = vmatprep.mubr.f32.mxu0 %v6013_v9  ;;  %v384_v9 = vld [vmem:[%s8290_s27 + $0x8b0] sm:$0xff]  ;;  %v4773_v49 = vpack.c.bf16 %v369_v42, %v362_v2  ;;  %v4860_v20 = vpack.c.bf16 %v1464_v4, %v1462_v1  ;;  %v1470_v42 = vld [vmem:[%s8292_s28 + $0x40] sm:$0xff]  ;;  %v439_v1 = vld [vmem:[%s8290_s27 + $0xa68] sm:$0xff] }
  0xb1   :  { %4768 = vmatprep.subr.bf16.mxu0 %v4767_v21  ;;  %v4775_v56 = vpack.c.bf16 %v384_v9, %v377_v43  ;;  %1296 = vmatmul.mubr.f32.gmra.mrb[30].mxu1 %v6256_v45  ;;  %v1472_v43 = vld [vmem:[%s8292_s28 + $0x50] sm:$0xff]  ;;  %v4785_v9 = vpack.c.bf16 %v411_v33, %v404_v30  ;;  %v454_v4 = vld [vmem:[%s8290_s27 + $0xae0] sm:$0xff]  ;;  %v1491_v33 = vld [vmem:[%s8292_s28 + $0xe8] sm:$0xff] }
  0xb2   :  { %4854 = vmatpush1.bf16.msra.mxu1 %v4853_v44  ;;  %3992 = vmatprep.mubr.msk.f32.mxu1 %vm493_vm0, %v6273_v53  ;;  %v1475_v44 = vld [vmem:[%s8292_s28 + $0x68] sm:$0xff]  ;;  %v1488_v30 = vld [vmem:[%s8292_s28 + $0xd0] sm:$0xff] }
  0xb3   :  { %1041 = vmatmul.mubr.f32.gmra.mrb[18].mxu0 %v6032_v17  ;;  %v1465_v17 = vld [vmem:[%s8292_s28 + $0x18] sm:$0xff]  ;;  %4855 = vmatprep.subr.bf16.mxu1 %v5464_v54 }
  0xb4   :  { %4770 = vmatpush1.bf16.msra.mxu0 %v4769_v40  ;;  %1046 = vmatprep.mubr.f32.mxu0 %v6049_v23  ;;  %v391_v23 = vld [vmem:[%s8290_s27 + $0x8e8] sm:$0xff]  ;;  %v4858_v0 = vpack.c.bf16 %v1465_v17, %v1463_v55  ;;  %v426_v40 = vld [vmem:[%s8290_s27 + $0xa00] sm:$0xff]  ;;  %v440_v55 = vld [vmem:[%s8290_s27 + $0xa70] sm:$0xff]  ;;  %v4868_v17 = vpack.c.bf16 %v1472_v43, %v1470_v42 }
  0xb5   :  { %4772 = vmatprep.subr.bf16.mxu0 %v4771_v41  ;;  %v4779_v7 = vpack.c.bf16 %v398_v62, %v391_v23  ;;  %v4864_v41 = vpack.c.bf16 %v1468_v24, %v1466_v22  ;;  %v1479_v62 = vld [vmem:[%s8292_s28 + $0x88] sm:$0xff]  ;;  %v1482_v22 = vld [vmem:[%s8292_s28 + $0xa0] sm:$0xff]  ;;  %v1484_v24 = vld [vmem:[%s8292_s28 + $0xb0] sm:$0xff] }
  0xb6   :  { %4857 = vmatpush1.bf16.msra.mxu1 %v4856_v63  ;;  %v1492_v42 = vld [vmem:[%s8292_s28 + $0xf0] sm:$0xff]  ;;  %v1495_v43 = vld [vmem:[%s8292_s28 + $0x108] sm:$0xff] }
  0xb7   :  { %1047 = vmatmul.mubr.f32.gmra.mrb[20].mxu0 %v6068_v31  ;;  %v1469_v31 = vld [vmem:[%s8292_s28 + $0x38] sm:$0xff]  ;;  %4859 = vmatprep.subr.bf16.mxu1 %v4858_v0  ;;  %v432_v0 = vld [vmem:[%s8290_s27 + $0xa30] sm:$0xff] }
  0xb8   :  { %4774 = vmatpush1.bf16.msra.mxu0 %v4773_v49  ;;  %1052 = vmatprep.mubr.f32.mxu0 %v6085_v37  ;;  %v405_v37 = vld [vmem:[%s8290_s27 + $0x958] sm:$0xff]  ;;  %v4862_v21 = vpack.c.bf16 %v1469_v31, %v1467_v5  ;;  %v1478_v31 = vld [vmem:[%s8292_s28 + $0x80] sm:$0xff]  ;;  %v4793_v10 = vpack.c.bf16 %v439_v1, %v432_v0 }
  0xb9   :  { %4776 = vmatprep.subr.bf16.mxu0 %v4775_v56  ;;  %v4783_v29 = vpack.c.bf16 %v412_v15, %v405_v37  ;;  %1366 = vmatmul.mubr.f32.vlgmr.msra.gmra.mrb[32].mxu1 %v6321_v13  ;;  %v425_v49 = vld [vmem:[%s8290_s27 + $0x9f8] sm:$0xff]  ;;  %v446_v15 = vld [vmem:[%s8290_s27 + $0xaa0] sm:$0xff] }
  0xba   :  { %3993 = vmatprep.mubr.msk.f32.mxu1 %vm493_vm0, %v6332_v18  ;;  %4861 = vmatpush1.bf16.msra.mxu1 %v4860_v20  ;;  %v4789_v23 = vpack.c.bf16 %v425_v49, %v418_v48  ;;  %v453_v20 = vld [vmem:[%s8290_s27 + $0xad8] sm:$0xff] }
  0xbb   :  { %1053 = vmatmul.mubr.f32.gmra.mrb[22].mxu0 %v6104_v46  ;;  %v1473_v46 = vld [vmem:[%s8292_s28 + $0x58] sm:$0xff]  ;;  %4863 = vmatprep.subr.bf16.mxu1 %v4862_v21 }
  0xbc   :  { %4778 = vmatpush1.bf16.msra.mxu0 %v4777_v38  ;;  %1058 = vmatprep.mubr.f32.mxu0 %v6121_v52  ;;  %v419_v52 = vld [vmem:[%s8290_s27 + $0x9c8] sm:$0xff]  ;;  %v4866_v2 = vpack.c.bf16 %v1473_v46, %v1471_v26  ;;  %v4872_v38 = vpack.c.bf16 %v1476_v61, %v1474_v59  ;;  %v4880_v46 = vpack.c.bf16 %v1484_v24, %v1482_v22  ;;  %v1502_v59 = vld [vmem:[%s8292_s28 + $0x140] sm:$0xff]  ;;  %v1529_v24 = vld [vmem:[%s8292_s28 + $0x218] sm:$0xff] }
  0xbd   :  { %4780 = vmatprep.subr.bf16.mxu0 %v4779_v7  ;;  %v4787_v47 = vpack.c.bf16 %v426_v40, %v419_v52  ;;  %1371 = vmatmul.mubr.f32.gmra.mrb[34].mxu1 %v6360_v32  ;;  %v1480_v7 = vld [vmem:[%s8292_s28 + $0x90] sm:$0xff]  ;;  %v1487_v26 = vld [vmem:[%s8292_s28 + $0xc8] sm:$0xff]  ;;  %v1493_v52 = vld [vmem:[%s8292_s28 + $0xf8] sm:$0xff] }
  0xbe   :  { %3994 = vmatprep.mubr.msk.f32.mxu1 %vm493_vm0, %v6371_v39  ;;  %4865 = vmatpush1.bf16.msra.mxu1 %v4864_v41  ;;  %v4886_v41 = vpack.c.bf16 %v1493_v52, %v1491_v33  ;;  %v1507_v61 = vld [vmem:[%s8292_s28 + $0x168] sm:$0xff] }
  0xbf   :  { %1059 = vmatmul.mubr.f32.gmra.mrb[24].mxu0 %v6142_v60  ;;  %v1477_v60 = vld [vmem:[%s8292_s28 + $0x78] sm:$0xff]  ;;  %4867 = vmatprep.subr.bf16.mxu1 %v4866_v2  ;;  %v1490_v2 = vld [vmem:[%s8292_s28 + $0xe0] sm:$0xff]  ;;  %v1527_v22 = vld [vmem:[%s8292_s28 + $0x208] sm:$0xff] }
  0xc0   :  { %4782 = vmatpush1.bf16.msra.mxu0 %v4781_v25  ;;  %1064 = vmatprep.mubr.f32.mxu0 %v6159_v3  ;;  %v433_v3 = vld [vmem:[%s8290_s27 + $0xa38] sm:$0xff]  ;;  %v4870_v56 = vpack.c.bf16 %v1477_v60, %v1475_v44  ;;  %v4797_v25 = vpack.c.bf16 %v453_v20, %v446_v15  ;;  %v1496_v60 = vld [vmem:[%s8292_s28 + $0x110] sm:$0xff] }
  0xc1   :  { %4784 = vmatprep.subr.bf16.mxu0 %v4783_v29  ;;  %v4791_v63 = vpack.c.bf16 %v440_v55, %v433_v3  ;;  %1376 = vmatmul.mubr.f32.gmra.mrb[36].mxu1 %v6400_v51  ;;  %v1500_v3 = vld [vmem:[%s8292_s28 + $0x130] sm:$0xff]  ;;  %v1503_v55 = vld [vmem:[%s8292_s28 + $0x148] sm:$0xff]  ;;  %v1525_v15 = vld [vmem:[%s8292_s28 + $0x1f8] sm:$0xff] }
  0xc2   :  { %3995 = vmatprep.mubr.msk.f32.mxu1 %vm493_vm0, %v6411_v57  ;;  %4869 = vmatpush1.bf16.msra.mxu1 %v4868_v17 }
  0xc3   :  { %1065 = vmatmul.mubr.f32.gmra.mrb[26].mxu0 %v6180_v12  ;;  %v1481_v12 = vld [vmem:[%s8292_s28 + $0x98] sm:$0xff]  ;;  %4871 = vmatprep.subr.bf16.mxu1 %v4870_v56 }
  0xc4   :  { %4786 = vmatpush1.bf16.msra.mxu0 %v4785_v9  ;;  %1070 = vmatprep.mubr.f32.mxu0 %v6197_v19  ;;  %v447_v19 = vld [vmem:[%s8290_s27 + $0xaa8] sm:$0xff]  ;;  %v4874_v5 = vpack.c.bf16 %v1481_v12, %v1479_v62  ;;  %v4888_v9 = vpack.c.bf16 %v1492_v42, %v1490_v2  ;;  %v1506_v12 = vld [vmem:[%s8292_s28 + $0x160] sm:$0xff] }
  0xc5   :  { %4788 = vmatprep.subr.bf16.mxu0 %v4787_v47  ;;  %v4795_v37 = vpack.c.bf16 %v454_v4, %v447_v19  ;;  %1381 = vmatmul.mubr.f32.gmra.mrb[38].mxu1 %v6437_v6  ;;  %v1499_v47 = vld [vmem:[%s8292_s28 + $0x128] sm:$0xff]  ;;  %v1510_v19 = vld [vmem:[%s8292_s28 + $0x180] sm:$0xff] }
  0xc6   :  { %3996 = vmatprep.mubr.msk.f32.mxu1 %vm493_vm0, %v6448_v11  ;;  %4873 = vmatpush1.bf16.msra.mxu1 %v4872_v38  ;;  %v1515_v4 = vld [vmem:[%s8292_s28 + $0x1a8] sm:$0xff]  ;;  %v1526_v42 = vld [vmem:[%s8292_s28 + $0x200] sm:$0xff] }
  0xc7   :  { %1071 = vmatmul.mubr.f32.gmra.mrb[28].mxu0 %v6218_v28  ;;  %v1485_v28 = vld [vmem:[%s8292_s28 + $0xb8] sm:$0xff]  ;;  %4875 = vmatprep.subr.bf16.mxu1 %v4874_v5 }
  0xc8   :  { %4790 = vmatpush1.bf16.msra.mxu0 %v4789_v23  ;;  %1076 = vmatprep.mubr.f32.mxu0 %v6235_v35  ;;  %v4876_v35 = vpack.c.bf16 %v1480_v7, %v1478_v31  ;;  %v4878_v21 = vpack.c.bf16 %v1485_v28, %v1483_v14  ;;  %v1514_v31 = vld [vmem:[%s8292_s28 + $0x1a0] sm:$0xff]  ;;  %v1519_v7 = vld [vmem:[%s8292_s28 + $0x1c8] sm:$0xff] }
  0xc9   :  { %4792 = vmatprep.subr.bf16.mxu0 %v4791_v63  ;;  %1386 = vmatmul.mubr.f32.gmra.mrb[40].mxu1 %v6477_v27  ;;  %v1511_v63 = vld [vmem:[%s8292_s28 + $0x188] sm:$0xff]  ;;  %v1518_v28 = vld [vmem:[%s8292_s28 + $0x1c0] sm:$0xff] }
  0xca   :  { %3997 = vmatprep.mubr.msk.f32.mxu1 %vm493_vm0, %v6488_v34  ;;  %4877 = vmatpush1.bf16.msra.mxu1 %v4876_v35  ;;  %v1522_v35 = vld [vmem:[%s8292_s28 + $0x1e0] sm:$0xff] }
  0xcb   :  { %1077 = vmatmul.mubr.f32.gmra.mrb[30].mxu0 %v6256_v45  ;;  %v1489_v45 = vld [vmem:[%s8292_s28 + $0xd8] sm:$0xff]  ;;  %4879 = vmatprep.subr.bf16.mxu1 %v4878_v21  ;;  %v1524_v21 = vld [vmem:[%s8292_s28 + $0x1f0] sm:$0xff] }
  0xcc   :  { %4794 = vmatpush1.bf16.msra.mxu0 %v4793_v10  ;;  %3984 = vmatprep.mubr.msk.f32.mxu0 %vm493_vm0, %v6273_v53  ;;  %v4882_v29 = vpack.c.bf16 %v1489_v45, %v1487_v26  ;;  %v1486_v53 = vld [vmem:[%s8292_s28 + $0xc0] sm:$0xff]  ;;  %v4922_v26 = vpack.c.bf16 %v1529_v24, %v1527_v22  ;;  %v458_v45 = vlaneseq }
  0xcd   :  { %4796 = vmatprep.subr.bf16.mxu0 %v4795_v37  ;;  %1391 = vmatmul.mubr.f32.gmra.mrb[42].mxu1 %v6517_v50  ;;  %v4884_v40 = vpack.c.bf16 %v1488_v30, %v1486_v53  ;;  %v1523_v37 = vld [vmem:[%s8292_s28 + $0x1e8] sm:$0xff]  ;;  %v7182_v53 = vld [vmem:[%s8293_s4] sm:$0x7f] }
  0xce   :  { %3998 = vmatprep.mubr.msk.f32.mxu1 %vm493_vm0, %v6528_v58  ;;  %4881 = vmatpush1.bf16.msra.mxu1 %v4880_v46  ;;  %v4918_v20 = vpack.c.bf16 %v1525_v15, %v1523_v37  ;;  %v7176_v46 = vshrl.u32 %v458_v45, 7  ;;  %v1544_v45 = vld [vmem:[%s8292_s28 + $0x290] sm:$0xff] }
  0xcf   :  { %4883 = vmatprep.subr.bf16.mxu1 %v4882_v29 }
  0xd0   :  { %4798 = vmatpush1.bf16.msra.mxu0 %v4797_v25  ;;  %v4920_v25 = vpack.c.bf16 %v1524_v21, %v1522_v35  ;;  %v460_v29 = vsub.s32 0, %v7176_v46  ;;  %v464_v30 = vsub.s32 1, %v7176_v46 }
  0xd1   :  { %5054 = vmatprep.subr.bf16.mxu0 %v5464_v54  ;;  %1396 = vmatmul.mubr.f32.gmra.mrb[44].mxu1 %v6557_v8 }
  0xd2   :  { %3999 = vmatprep.mubr.msk.f32.mxu1 %vm493_vm0, %v6568_v16  ;;  %4885 = vmatpush1.bf16.msra.mxu1 %v4884_v40  ;;  %v7188_v33 = vrot.slane %v7182_v53, %v460_v29  ;;  %v7193_v52 = vrot.slane %v7182_v53, %v464_v30 }
  0xd3   :  { %1148 = vmatmul.mubr.f32.vlgmr.msra.gmra.mrb[16].mxu0 %v6321_v13  ;;  %v1497_v13 = vld [vmem:[%s8292_s28 + $0x118] sm:$0xff]  ;;  %4887 = vmatprep.subr.bf16.mxu1 %v4886_v41 }
  0xd4   :  { %3985 = vmatprep.mubr.msk.f32.mxu0 %vm493_vm0, %v6332_v18  ;;  %v4890_v44 = vpack.c.bf16 %v1497_v13, %v1495_v43  ;;  %v1494_v18 = vld [vmem:[%s8292_s28 + $0x100] sm:$0xff]  ;;  %v1528_v43 = vld [vmem:[%s8292_s28 + $0x210] sm:$0xff] }
  0xd5   :  { %1401 = vmatmul.mubr.f32.gmra.mrb[46].mxu1 %v6597_v36  ;;  %v4892_v48 = vpack.c.bf16 %v1496_v60, %v1494_v18 }
  0xd6   :  { %4889 = vmatpush1.bf16.msra.mxu1 %v4888_v9  ;;  %v1531_v9 = vld [vmem:[%s8292_s28 + $0x228] sm:$0xff] }
  0xd7   :  { %1154 = vmatmul.mubr.f32.gmra.mrb[18].mxu0 %v6360_v32  ;;  %v1501_v32 = vld [vmem:[%s8292_s28 + $0x138] sm:$0xff]  ;;  %4891 = vmatprep.subr.bf16.mxu1 %v4890_v44 }
  0xd8   :  { %3986 = vmatprep.mubr.msk.f32.mxu0 %vm493_vm0, %v6371_v39  ;;  %v4894_v49 = vpack.c.bf16 %v1501_v32, %v1499_v47  ;;  %v1498_v39 = vld [vmem:[%s8292_s28 + $0x120] sm:$0xff]  ;;  %v1533_v44 = vld [vmem:[%s8292_s28 + $0x238] sm:$0xff]  ;;  %v4924_v47 = vpack.c.bf16 %v1528_v43, %v1526_v42 }
  0xd9   :  { %v4896_v17 = vpack.c.bf16 %v1500_v3, %v1498_v39  ;;  %v4926_v39 = vpack.c.bf16 %v1533_v44, %v1531_v9  ;;  %v1530_v3 = vld [vmem:[%s8292_s28 + $0x220] sm:$0xff] }
  0xda   :  { %4893 = vmatpush1.bf16.msra.mxu1 %v4892_v48 }
  0xdb   :  { %1160 = vmatmul.mubr.f32.gmra.mrb[20].mxu0 %v6400_v51  ;;  %v1505_v51 = vld [vmem:[%s8292_s28 + $0x158] sm:$0xff]  ;;  %4895 = vmatprep.subr.bf16.mxu1 %v4894_v49 }
  0xdc   :  { %3987 = vmatprep.mubr.msk.f32.mxu0 %vm493_vm0, %v6411_v57  ;;  %v4898_v56 = vpack.c.bf16 %v1505_v51, %v1503_v55  ;;  %v1504_v57 = vld [vmem:[%s8292_s28 + $0x150] sm:$0xff] }
  0xdd   :  { %v4900_v23 = vpack.c.bf16 %v1504_v57, %v1502_v59  ;;  %v1532_v55 = vld [vmem:[%s8292_s28 + $0x230] sm:$0xff] }
  0xde   :  { %4897 = vmatpush1.bf16.msra.mxu1 %v4896_v17  ;;  %v1535_v17 = vld [vmem:[%s8292_s28 + $0x248] sm:$0xff] }
  0xdf   :  { %1166 = vmatmul.mubr.f32.gmra.mrb[22].mxu0 %v6437_v6  ;;  %v1509_v6 = vld [vmem:[%s8292_s28 + $0x178] sm:$0xff]  ;;  %4899 = vmatprep.subr.bf16.mxu1 %v4898_v56 }
  0xe0   :  { %3988 = vmatprep.mubr.msk.f32.mxu0 %vm493_vm0, %v6448_v11  ;;  %v4902_v62 = vpack.c.bf16 %v1509_v6, %v1507_v61  ;;  %v1508_v11 = vld [vmem:[%s8292_s28 + $0x170] sm:$0xff]  ;;  %v1537_v56 = vld [vmem:[%s8292_s28 + $0x258] sm:$0xff]  ;;  %v4928_v61 = vpack.c.bf16 %v1532_v55, %v1530_v3  ;;  %v472_v3 = vsub.s32 3, %v7176_v46  ;;  %v1551_v55 = vld [vmem:[%s8292_s28 + $0x2c8] sm:$0xff] }
  0xe1   :  { %v4904_v0 = vpack.c.bf16 %v1508_v11, %v1506_v12  ;;  %v4930_v12 = vpack.c.bf16 %v1537_v56, %v1535_v17  ;;  %v1534_v11 = vld [vmem:[%s8292_s28 + $0x240] sm:$0xff] }
  0xe2   :  { %4901 = vmatpush1.bf16.msra.mxu1 %v4900_v23 }
  0xe3   :  { %1172 = vmatmul.mubr.f32.gmra.mrb[24].mxu0 %v6477_v27  ;;  %v1513_v27 = vld [vmem:[%s8292_s28 + $0x198] sm:$0xff]  ;;  %4903 = vmatprep.subr.bf16.mxu1 %v4902_v62 }
  0xe4   :  { %3989 = vmatprep.mubr.msk.f32.mxu0 %vm493_vm0, %v6488_v34  ;;  %v4906_v1 = vpack.c.bf16 %v1513_v27, %v1511_v63  ;;  %v1512_v34 = vld [vmem:[%s8292_s28 + $0x190] sm:$0xff] }
  0xe5   :  { %v4908_v38 = vpack.c.bf16 %v1512_v34, %v1510_v19  ;;  %v1536_v63 = vld [vmem:[%s8292_s28 + $0x250] sm:$0xff] }
  0xe6   :  { %4905 = vmatpush1.bf16.msra.mxu1 %v4904_v0  ;;  %v1539_v0 = vld [vmem:[%s8292_s28 + $0x268] sm:$0xff] }
  0xe7   :  { %1178 = vmatmul.mubr.f32.gmra.mrb[26].mxu0 %v6517_v50  ;;  %v1517_v50 = vld [vmem:[%s8292_s28 + $0x1b8] sm:$0xff]  ;;  %4907 = vmatprep.subr.bf16.mxu1 %v4906_v1 }
  0xe8   :  { %3990 = vmatprep.mubr.msk.f32.mxu0 %vm493_vm0, %v6528_v58  ;;  %v4910_v5 = vpack.c.bf16 %v1517_v50, %v1515_v4  ;;  %v1516_v58 = vld [vmem:[%s8292_s28 + $0x1b0] sm:$0xff]  ;;  %v1541_v1 = vld [vmem:[%s8292_s28 + $0x278] sm:$0xff] }
  0xe9   :  { %v4912_v10 = vpack.c.bf16 %v1516_v58, %v1514_v31 }
  0xea   :  { %4909 = vmatpush1.bf16.msra.mxu1 %v4908_v38  ;;  %v4932_v38 = vpack.c.bf16 %v1536_v63, %v1534_v11  ;;  %v1550_v11 = vld [vmem:[%s8292_s28 + $0x2c0] sm:$0xff]  ;;  %v1552_v63 = vld [vmem:[%s8292_s28 + $0x2d0] sm:$0xff] }
  0xeb   :  { %1184 = vmatmul.mubr.f32.gmra.mrb[28].mxu0 %v6557_v8  ;;  %v1521_v8 = vld [vmem:[%s8292_s28 + $0x1d8] sm:$0xff]  ;;  %4911 = vmatprep.subr.bf16.mxu1 %v4910_v5 }
  0xec   :  { %3991 = vmatprep.mubr.msk.f32.mxu0 %vm493_vm0, %v6568_v16  ;;  %v4914_v14 = vpack.c.bf16 %v1521_v8, %v1519_v7  ;;  %v1520_v16 = vld [vmem:[%s8292_s28 + $0x1d0] sm:$0xff]  ;;  %v4934_v7 = vpack.c.bf16 %v1541_v1, %v1539_v0  ;;  %v1538_v8 = vld [vmem:[%s8292_s28 + $0x260] sm:$0xff]  ;;  %v7305_v0 = vrot.slane %v7182_v53, %v472_v3  ;;  %v1555_v1 = vld [vmem:[%s8292_s28 + $0x2e8] sm:$0xff] }
  0xee   :  { %4913 = vmatpush1.bf16.msra.mxu1 %v4912_v10  ;;  %v1540_v10 = vld [vmem:[%s8292_s28 + $0x270] sm:$0xff] }
  0xef   :  { %1190 = vmatmul.mubr.f32.gmra.mrb[30].mxu0 %v6597_v36  ;;  %v4916_v36 = vpack.c.bf16 %v1520_v16, %v1518_v28  ;;  %4915 = vmatprep.subr.bf16.mxu1 %v4914_v14  ;;  %v1543_v28 = vld [vmem:[%s8292_s28 + $0x288] sm:$0xff]  ;;  %v1545_v16 = vld [vmem:[%s8292_s28 + $0x298] sm:$0xff]  ;;  %v4936_v35 = vpack.c.bf16 %v1540_v10, %v1538_v8 }
  0xf2   :  { %4917 = vmatpush1.bf16.msra.mxu1 %v4916_v36 }
  0xf3   :  { %4919 = vmatprep.subr.bf16.mxu1 %v4918_v20 }
  0xf6   :  { %4921 = vmatpush1.bf16.msra.mxu1 %v4920_v25  ;;  %v4938_v25 = vpack.c.bf16 %v1545_v16, %v1543_v28  ;;  %v1554_v28 = vld [vmem:[%s8292_s28 + $0x2e0] sm:$0xff]  ;;  %v1556_v16 = vld [vmem:[%s8292_s28 + $0x2f0] sm:$0xff] }
  0xf7   :  { %4923 = vmatprep.subr.bf16.mxu1 %v4922_v26  ;;  %v1542_v26 = vld [vmem:[%s8292_s28 + $0x280] sm:$0xff] }
  0xf8   :  { %v4940_v44 = vpack.c.bf16 %v1544_v45, %v1542_v26  ;;  %v1558_v26 = vld [vmem:[%s8292_s28 + $0x300] sm:$0xff]  ;;  %v1560_v45 = vld [vmem:[%s8292_s28 + $0x310] sm:$0xff] }
 0x142   :  { %v697_v40 = vpop.f32.mrb[0].mxu0 }
 0x143   :  { %v5223_v41 = vadd.f32 %v697_v40, %v7188_v33  ;;  %v699_v2 = vpop.f32.mrb[1].mxu0 }
 0x144   :  { %v5224_v13 = vadd.f32 %v699_v2, %v7193_v52  ;;  %v1549_v2 = vld [vmem:[%s8292_s28 + $0x2b8] sm:$0xff] }
 0x145   :  { %v1406_v32 = vmax.f32 %v5223_v41, 0.0  ;;  %v1547_v41 = vld [vmem:[%s8292_s28 + $0x2a8] sm:$0xff] }
 0x146   :  { %v1407_v18 = vmax.f32 %v5224_v13, 0.0  ;;  %v703_v60 = vpop.f32.mrb[2].mxu0 }
 0x147   :  { %v5225_v48 = vadd.f32 %v703_v60, %v7188_v33  ;;  %v705_v49 = vpop.f32.mrb[3].mxu0 }
 0x148   :  { %v5226_v51 = vadd.f32 %v705_v49, %v7193_v52  ;;  %1758 = vmatprep.mubr.f32.mxu1 %v1407_v18  ;;  %v7237_v19 = vpop.f32.mrb[0].mxu1  ;;  %v1548_v49 = vld [vmem:[%s8292_s28 + $0x2b0] sm:$0xff] }
 0x149   :  { %1759 = vmatmul.mubr.f32.vlgmr.msra.gmra.mrb[48].mxu1 %v1406_v32  ;;  %v1413_v6 = vmax.f32 %v5225_v48, 0.0  ;;  %v7239_v34 = vpop.f32.mrb[1].mxu1  ;;  %v4942_v32 = vpack.c.bf16 %v1549_v2, %v1547_v41  ;;  %v1546_v48 = vld [vmem:[%s8292_s28 + $0x2a0] sm:$0xff]  ;;  %v1563_v41 = vld [vmem:[%s8292_s28 + $0x328] sm:$0xff]  ;;  %v1565_v2 = vld [vmem:[%s8292_s28 + $0x338] sm:$0xff] }
 0x14a   :  { %v1414_v59 = vmax.f32 %v5226_v51, 0.0  ;;  %4925 = vmatpush1.bf16.msra.mxu1 %v4924_v47  ;;  %v709_v57 = vpop.f32.mrb[4].mxu0  ;;  %v1553_v51 = vld [vmem:[%s8292_s28 + $0x2d8] sm:$0xff] }
 0x14b   :  { %v5227_v23 = vadd.f32 %v709_v57, %v7188_v33  ;;  %v711_v62 = vpop.f32.mrb[5].mxu0  ;;  %4927 = vmatprep.subr.bf16.mxu1 %v4926_v39 }
 0x14c   :  { %v5228_v27 = vadd.f32 %v711_v62, %v7193_v52  ;;  %1764 = vmatprep.mubr.f32.mxu1 %v1414_v59  ;;  %v7255_v37 = vpop.f32.mrb[2].mxu1 }
 0x14d   :  { %1765 = vmatmul.mubr.f32.gmra.mrb[50].mxu1 %v1413_v6  ;;  %v1420_v5 = vmax.f32 %v5227_v23, 0.0  ;;  %v7257_v15 = vpop.f32.mrb[3].mxu1 }
 0x14e   :  { %v1421_v4 = vmax.f32 %v5228_v27, 0.0  ;;  %4929 = vmatpush1.bf16.msra.mxu1 %v4928_v61  ;;  %v715_v50 = vpop.f32.mrb[6].mxu0  ;;  %v4944_v61 = vpack.c.bf16 %v1548_v49, %v1546_v48  ;;  %v1569_v48 = vld [vmem:[%s8292_s28 + $0x358] sm:$0xff] }
 0x14f   :  { %v5229_v31 = vadd.f32 %v715_v50, %v7188_v33  ;;  %v717_v58 = vpop.f32.mrb[7].mxu0  ;;  %4931 = vmatprep.subr.bf16.mxu1 %v4930_v12  ;;  %v4946_v12 = vpack.c.bf16 %v1553_v51, %v1551_v55  ;;  %v1566_v51 = vld [vmem:[%s8292_s28 + $0x340] sm:$0xff] }
 0x150   :  { %v5230_v14 = vadd.f32 %v717_v58, %v7193_v52  ;;  %1770 = vmatprep.mubr.f32.mxu1 %v1421_v4  ;;  %v7273_v42 = vpop.f32.mrb[4].mxu1  ;;  %v1557_v4 = vld [vmem:[%s8292_s28 + $0x2f8] sm:$0xff]  ;;  %v4948_v58 = vpack.c.bf16 %v1552_v63, %v1550_v11  ;;  %v1570_v63 = vld [vmem:[%s8292_s28 + $0x360] sm:$0xff] }
 0x151   :  { %1771 = vmatmul.mubr.f32.gmra.mrb[52].mxu1 %v1420_v5  ;;  %v1427_v21 = vmax.f32 %v5229_v31, 0.0  ;;  %v7275_v43 = vpop.f32.mrb[5].mxu1 }
 0x152   :  { %v1428_v36 = vmax.f32 %v5230_v14, 0.0  ;;  %4933 = vmatpush1.bf16.msra.mxu1 %v4932_v38  ;;  %v721_v20 = vpop.f32.mrb[8].mxu0  ;;  %v4950_v14 = vpack.c.bf16 %v1557_v4, %v1555_v1  ;;  %v1575_v1 = vld [vmem:[%s8292_s28 + $0x388] sm:$0xff]  ;;  %v1577_v4 = vld [vmem:[%s8292_s28 + $0x398] sm:$0xff] }
 0x153   :  { %v5231_v22 = vadd.f32 %v721_v20, %v7188_v33  ;;  %v723_v24 = vpop.f32.mrb[9].mxu0  ;;  %4935 = vmatprep.subr.bf16.mxu1 %v4934_v7  ;;  %v5240_v20 = vadd.f32 %v7239_v34, %v7305_v0 }
 0x154   :  { %v5232_v40 = vadd.f32 %v723_v24, %v7193_v52  ;;  %1776 = vmatprep.mubr.f32.mxu1 %v1428_v36  ;;  %v7292_v17 = vpop.f32.mrb[6].mxu1 }
 0x155   :  { %1777 = vmatmul.mubr.f32.gmra.mrb[54].mxu1 %v1427_v21  ;;  %v1434_v18 = vmax.f32 %v5231_v22, 0.0  ;;  %v7294_v56 = vpop.f32.mrb[7].mxu1 }
 0x156   :  { %v1435_v13 = vmax.f32 %v5232_v40, 0.0  ;;  %4937 = vmatpush1.bf16.msra.mxu1 %v4936_v35  ;;  %v727_v9 = vpop.f32.mrb[10].mxu0  ;;  %v1561_v35 = vld [vmem:[%s8292_s28 + $0x318] sm:$0xff]  ;;  %v1409_v40 = vmax.f32 %v5240_v20, 0.0 }
 0x157   :  { %v5233_v60 = vadd.f32 %v727_v9, %v7188_v33  ;;  %v729_v47 = vpop.f32.mrb[11].mxu0  ;;  %4939 = vmatprep.subr.bf16.mxu1 %v4938_v25 }
 0x158   :  { %v5234_v39 = vadd.f32 %v729_v47, %v7193_v52  ;;  %1782 = vmatprep.mubr.f32.mxu1 %v1435_v13  ;;  %v7313_v50 = vpop.f32.mrb[8].mxu1  ;;  %v1564_v47 = vld [vmem:[%s8292_s28 + $0x330] sm:$0xff] }
 0x159   :  { %1783 = vmatmul.mubr.f32.gmra.mrb[56].mxu1 %v1434_v18  ;;  %v1441_v6 = vmax.f32 %v5233_v60, 0.0  ;;  %v7315_v38 = vpop.f32.mrb[9].mxu1  ;;  %v4958_v18 = vpack.c.bf16 %v1565_v2, %v1563_v41  ;;  %v1562_v60 = vld [vmem:[%s8292_s28 + $0x320] sm:$0xff] }
 0x15a   :  { %v1442_v59 = vmax.f32 %v5234_v39, 0.0  ;;  %4941 = vmatpush1.bf16.msra.mxu1 %v4940_v44  ;;  %v733_v57 = vpop.f32.mrb[12].mxu0  ;;  %v4956_v44 = vpack.c.bf16 %v1560_v45, %v1558_v26  ;;  %v4960_v3 = vpack.c.bf16 %v1564_v47, %v1562_v60  ;;  %v1585_v26 = vld [vmem:[%s8292_s28 + $0x3d8] sm:$0xff]  ;;  %v1582_v60 = vld [vmem:[%s8292_s28 + $0x3c0] sm:$0xff]  ;;  %v1584_v47 = vld [vmem:[%s8292_s28 + $0x3d0] sm:$0xff] }
 0x15b   :  { %v5235_v23 = vadd.f32 %v733_v57, %v7188_v33  ;;  %v735_v62 = vpop.f32.mrb[13].mxu0  ;;  %4943 = vmatprep.subr.bf16.mxu1 %v4942_v32  ;;  %v1567_v32 = vld [vmem:[%s8292_s28 + $0x348] sm:$0xff] }
 0x15c   :  { %v5236_v27 = vadd.f32 %v735_v62, %v7193_v52  ;;  %1788 = vmatprep.mubr.f32.mxu1 %v1442_v59  ;;  %v7333_v21 = vpop.f32.mrb[10].mxu1  ;;  %v4962_v55 = vpack.c.bf16 %v1569_v48, %v1567_v32  ;;  %v1568_v59 = vld [vmem:[%s8292_s28 + $0x350] sm:$0xff]  ;;  %v1571_v57 = vld [vmem:[%s8292_s28 + $0x368] sm:$0xff]  ;;  %v1589_v48 = vld [vmem:[%s8292_s28 + $0x3f8] sm:$0xff] }
 0x15d   :  { %1789 = vmatmul.mubr.f32.gmra.mrb[58].mxu1 %v1441_v6  ;;  %v1448_v7 = vmax.f32 %v5235_v23, 0.0  ;;  %v7335_v22 = vpop.f32.mrb[11].mxu1  ;;  %v4964_v62 = vpack.c.bf16 %v1568_v59, %v1566_v51  ;;  %v1587_v32 = vld [vmem:[%s8292_s28 + $0x3e8] sm:$0xff]  ;;  %v4980_v51 = vpack.c.bf16 %v1584_v47, %v1582_v60  ;;  %v5244_v60 = vadd.f32 %v7275_v43, %v7305_v0  ;;  %v1601_v47 = vld [vmem:[%s8292_s28 + $0x458] sm:$0xff] }
 0x15e   :  { %v1449_v5 = vmax.f32 %v5236_v27, 0.0  ;;  %4945 = vmatpush1.bf16.msra.mxu1 %v4944_v61  ;;  %v739_v31 = vpop.f32.mrb[14].mxu0  ;;  %v1573_v61 = vld [vmem:[%s8292_s28 + $0x378] sm:$0xff]  ;;  %v1572_v27 = vld [vmem:[%s8292_s28 + $0x370] sm:$0xff] }
 0x15f   :  { %v5237_v8 = vadd.f32 %v739_v31, %v7188_v33  ;;  %v741_v10 = vpop.f32.mrb[15].mxu0  ;;  %4947 = vmatprep.subr.bf16.mxu1 %v4946_v12  ;;  %v1559_v33 = vld [vmem:[%s8292_s28 + $0x308] sm:$0xff]  ;;  %v4966_v11 = vpack.c.bf16 %v1573_v61, %v1571_v57  ;;  %v4982_v61 = vpack.c.bf16 %v1589_v48, %v1587_v32 }
 0x160   :  { %v5238_v36 = vadd.f32 %v741_v10, %v7193_v52  ;;  %1794 = vmatprep.mubr.f32.mxu1 %v1449_v5  ;;  %v4952_v52 = vpack.c.bf16 %v1556_v16, %v1554_v28  ;;  %v4954_v34 = vpack.c.bf16 %v1561_v35, %v1559_v33  ;;  %v7349_v13 = vpop.f32.mrb[12].mxu1  ;;  %v1574_v10 = vld [vmem:[%s8292_s28 + $0x380] sm:$0xff]  ;;  %v1579_v28 = vld [vmem:[%s8292_s28 + $0x3a8] sm:$0xff]  ;;  %v1581_v16 = vld [vmem:[%s8292_s28 + $0x3b8] sm:$0xff] }
 0x161   :  { %1795 = vmatmul.mubr.f32.gmra.mrb[60].mxu1 %v1448_v7  ;;  %v1455_v25 = vmax.f32 %v5237_v8, 0.0  ;;  %v7351_v9 = vpop.f32.mrb[13].mxu1  ;;  %v4970_v8 = vpack.c.bf16 %v1577_v4, %v1575_v1 }
 0x162   :  { %v1456_v24 = vmax.f32 %v5238_v36, 0.0  ;;  %4949 = vmatpush1.bf16.msra.mxu1 %v4948_v58  ;;  %v4968_v58 = vpack.c.bf16 %v1572_v27, %v1570_v63 }
 0x163   :  { %4951 = vmatprep.subr.bf16.mxu1 %v4950_v14  ;;  %v1576_v14 = vld [vmem:[%s8292_s28 + $0x390] sm:$0xff] }
 0x164   :  { %1800 = vmatprep.mubr.f32.mxu1 %v1456_v24  ;;  %v7365_v49 = vpop.f32.mrb[14].mxu1  ;;  %v4972_v33 = vpack.c.bf16 %v1576_v14, %v1574_v10  ;;  %v4974_v24 = vpack.c.bf16 %v1581_v16, %v1579_v28  ;;  %v5242_v10 = vadd.f32 %v7257_v15, %v7305_v0  ;;  %v1595_v14 = vld [vmem:[%s8292_s28 + $0x428] sm:$0xff]  ;;  %v2162_v15 = vld [vmem:[%s8294_s29] sm:$0xff] }
 0x165   :  { %1801 = vmatmul.mubr.f32.gmra.mrb[62].mxu1 %v1455_v25  ;;  %v7367_v39 = vpop.f32.mrb[15].mxu1  ;;  %v1580_v25 = vld [vmem:[%s8292_s28 + $0x3b0] sm:$0xff] }
 0x166   :  { %4953 = vmatpush1.bf16.msra.mxu1 %v4952_v52  ;;  %1871 = vmatprep.mubr.f32.mxu1 %v1409_v40  ;;  %v1578_v52 = vld [vmem:[%s8292_s28 + $0x3a0] sm:$0xff] }
 0x167   :  { %4955 = vmatprep.subr.bf16.mxu1 %v4954_v34  ;;  %v1583_v34 = vld [vmem:[%s8292_s28 + $0x3c8] sm:$0xff]  ;;  %v4976_v41 = vpack.c.bf16 %v1580_v25, %v1578_v52  ;;  %v2164_v52 = vld [vmem:[%s8294_s29 + $0x10] sm:$0xff] }
 0x168   :  { %v4096_v6 = vpop.f32.mrb[16].mxu1 }
 0x169   :  { %v4097_v23 = vpop.f32.mrb[17].mxu1 }
 0x16a   :  { %4957 = vmatpush1.bf16.msra.mxu1 %v4956_v44  ;;  %v7381_v12 = vadd.f32 %v4097_v23, %v4096_v6  ;;  %v468_v44 = vsub.s32 2, %v7176_v46  ;;  %v1586_v6 = vld [vmem:[%s8292_s28 + $0x3e0] sm:$0xff]  ;;  %v1588_v23 = vld [vmem:[%s8292_s28 + $0x3f0] sm:$0xff] }
 0x16b   :  { %4959 = vmatprep.subr.bf16.mxu1 %v4958_v18  ;;  %v4978_v18 = vpack.c.bf16 %v1585_v26, %v1583_v34  ;;  %v4984_v1 = vpack.c.bf16 %v1588_v23, %v1586_v6  ;;  %v2167_v6 = vld [vmem:[%s8294_s29 + $0x28] sm:$0xff] }
 0x16c   :  { %v4099_v5 = vpop.f32.mrb[18].mxu1  ;;  %v7441_v57 = vrot.slane %v7182_v53, %v468_v44  ;;  %v2165_v44 = vld [vmem:[%s8294_s29 + $0x18] sm:$0xff] }
 0x16d   :  { %v4100_v31 = vpop.f32.mrb[19].mxu1 }
 0x16e   :  { %4961 = vmatpush1.bf16.msra.mxu1 %v4960_v3  ;;  %v7395_v7 = vadd.f32 %v4100_v31, %v4099_v5  ;;  %v5239_v5 = vadd.f32 %v7237_v19, %v7441_v57  ;;  %v1597_v19 = vld [vmem:[%s8292_s28 + $0x438] sm:$0xff]  ;;  %v5241_v34 = vadd.f32 %v7255_v37, %v7441_v57  ;;  %v1599_v37 = vld [vmem:[%s8292_s28 + $0x448] sm:$0xff] }
 0x16f   :  { %4963 = vmatprep.subr.bf16.mxu1 %v4962_v55  ;;  %v4990_v26 = vpack.c.bf16 %v1597_v19, %v1595_v14  ;;  %v2169_v14 = vld [vmem:[%s8294_s29 + $0x38] sm:$0xff] }
 0x170   :  { %v4102_v36 = vpop.f32.mrb[20].mxu1  ;;  %v1408_v25 = vmax.f32 %v5239_v5, 0.0  ;;  %v1415_v23 = vmax.f32 %v5241_v34, 0.0  ;;  %v5246_v5 = vadd.f32 %v7294_v56, %v7305_v0  ;;  %v2168_v56 = vld [vmem:[%s8294_s29 + $0x30] sm:$0xff] }
 0x171   :  { %v4103_v20 = vpop.f32.mrb[21].mxu1 }
 0x172   :  { %4965 = vmatpush1.bf16.msra.mxu1 %v4964_v62  ;;  %v7409_v35 = vadd.f32 %v4103_v20, %v4102_v36  ;;  %v1591_v62 = vld [vmem:[%s8292_s28 + $0x408] sm:$0xff]  ;;  %v484_v36 = vsub.s32 6, %v7176_v46 }
 0x173   :  { %4967 = vmatprep.subr.bf16.mxu1 %v4966_v11  ;;  %v1593_v11 = vld [vmem:[%s8292_s28 + $0x418] sm:$0xff] }
 0x174   :  { %v4105_v45 = vpop.f32.mrb[22].mxu1  ;;  %v4986_v31 = vpack.c.bf16 %v1593_v11, %v1591_v62  ;;  %v5243_v62 = vadd.f32 %v7273_v42, %v7441_v57  ;;  %v4994_v11 = vpack.c.bf16 %v1601_v47, %v1599_v37  ;;  %v1603_v42 = vld [vmem:[%s8292_s28 + $0x468] sm:$0xff]  ;;  %v1608_v37 = vld [vmem:[%s8292_s28 + $0x490] sm:$0xff] }
 0x175   :  { %v4106_v40 = vpop.f32.mrb[23].mxu1 }
 0x176   :  { %4969 = vmatpush1.bf16.msra.mxu1 %v4968_v58  ;;  %v7423_v2 = vadd.f32 %v4106_v40, %v4105_v45  ;;  %v1590_v58 = vld [vmem:[%s8292_s28 + $0x400] sm:$0xff]  ;;  %v1596_v40 = vld [vmem:[%s8292_s28 + $0x430] sm:$0xff]  ;;  %v1422_v19 = vmax.f32 %v5243_v62, 0.0 }
 0x177   :  { %4971 = vmatprep.subr.bf16.mxu1 %v4970_v8  ;;  %v1592_v8 = vld [vmem:[%s8292_s28 + $0x410] sm:$0xff]  ;;  %v1594_v45 = vld [vmem:[%s8292_s28 + $0x420] sm:$0xff] }
 0x178   :  { %v4108_v3 = vpop.f32.mrb[24].mxu1  ;;  %v4988_v20 = vpack.c.bf16 %v1592_v8, %v1590_v58  ;;  %v2172_v62 = vld [vmem:[%s8294_s29 + $0x50] sm:$0xff] }
 0x179   :  { %v4109_v55 = vpop.f32.mrb[25].mxu1 }
 0x17a   :  { %4973 = vmatpush1.bf16.msra.mxu1 %v4972_v33  ;;  %v7438_v59 = vadd.f32 %v4109_v55, %v4108_v3  ;;  %v7505_v3 = vrot.slane %v7182_v53, %v484_v36  ;;  %v5058_v55 = vpack.c.bf16 %v2165_v44, %v2164_v52  ;;  %v1604_v36 = vld [vmem:[%s8292_s28 + $0x470] sm:$0xff] }
 0x17b   :  { %4975 = vmatprep.subr.bf16.mxu1 %v4974_v24  ;;  %v2163_v24 = vld [vmem:[%s8294_s29 + $0x8] sm:$0xff] }
 0x17c   :  { %v4111_v63 = vpop.f32.mrb[26].mxu1  ;;  %v1263_v58 = vadd.f32 %v7381_v12, %v7505_v3  ;;  %v1602_v12 = vld [vmem:[%s8292_s28 + $0x460] sm:$0xff] }
 0x17d   :  { %v4112_v27 = vpop.f32.mrb[27].mxu1 }
 0x17e   :  { %4977 = vmatpush1.bf16.msra.mxu1 %v4976_v41  ;;  %v7455_v4 = vadd.f32 %v4112_v27, %v4111_v63  ;;  %v5055_v41 = vpack.c.bf16 %v2163_v24, %v2162_v15  ;;  %v1598_v63 = vld [vmem:[%s8292_s28 + $0x440] sm:$0xff]  ;;  %v1600_v27 = vld [vmem:[%s8292_s28 + $0x450] sm:$0xff]  ;;  %v5248_v15 = vadd.f32 %v7315_v38, %v7305_v0  ;;  %v1609_v24 = vld [vmem:[%s8292_s28 + $0x498] sm:$0xff]  ;;  %v5000_v38 = vpack.c.bf16 %v1604_v36, %v1602_v12 }
 0x17f   :  { %4979 = vmatprep.subr.bf16.mxu1 %v4978_v18  ;;  %v1416_v18 = vmax.f32 %v5242_v10, 0.0  ;;  %v4996_v10 = vpack.c.bf16 %v1600_v27, %v1598_v63  ;;  %v5249_v27 = vadd.f32 %v7333_v21, %v7441_v57  ;;  %v1615_v21 = vld [vmem:[%s8292_s28 + $0x4c8] sm:$0xff]  ;;  %v5251_v36 = vadd.f32 %v7349_v13, %v7441_v57 }
 0x180   :  { %v4114_v28 = vpop.f32.mrb[28].mxu1  ;;  %5056 = vmatpush1.bf16.msra.mxu0 %v5055_v41  ;;  %v2171_v41 = vld [vmem:[%s8294_s29 + $0x48] sm:$0xff]  ;;  %v1437_v47 = vmax.f32 %v5248_v15, 0.0  ;;  %v1616_v15 = vld [vmem:[%s8292_s28 + $0x4d0] sm:$0xff] }
 0x181   :  { %v4115_v16 = vpop.f32.mrb[29].mxu1  ;;  %5057 = vmatprep.subr.bf16.mxu0 %v5464_v54  ;;  %v1443_v12 = vmax.f32 %v5249_v27, 0.0  ;;  %v1619_v13 = vld [vmem:[%s8292_s28 + $0x4e8] sm:$0xff] }
 0x182   :  { %4981 = vmatpush1.bf16.msra.mxu1 %v4980_v51  ;;  %v7474_v33 = vadd.f32 %v4115_v16, %v4114_v28  ;;  %v4992_v51 = vpack.c.bf16 %v1596_v40, %v1594_v45  ;;  %v5245_v28 = vadd.f32 %v7292_v17, %v7441_v57  ;;  %v1607_v17 = vld [vmem:[%s8292_s28 + $0x488] sm:$0xff]  ;;  %v5064_v45 = vpack.c.bf16 %v2169_v14, %v2168_v56  ;;  %v2170_v40 = vld [vmem:[%s8294_s29 + $0x40] sm:$0xff] }
 0x183   :  { %4983 = vmatprep.subr.bf16.mxu1 %v4982_v61  ;;  %v2166_v61 = vld [vmem:[%s8294_s29 + $0x20] sm:$0xff]  ;;  %v1278_v14 = vadd.f32 %v7423_v2, %v7505_v3 }
 0x184   :  { %v4117_v32 = vpop.f32.mrb[30].mxu1  ;;  %5059 = vmatpush1.bf16.msra.mxu0 %v5058_v55  ;;  %v5061_v8 = vpack.c.bf16 %v2167_v6, %v2166_v61  ;;  %v1429_v44 = vmax.f32 %v5245_v28, 0.0  ;;  %v1273_v6 = vadd.f32 %v7409_v35, %v7505_v3  ;;  %v1610_v35 = vld [vmem:[%s8292_s28 + $0x4a0] sm:$0xff] }
 0x185   :  { %v4118_v48 = vpop.f32.mrb[31].mxu1  ;;  %5060 = vmatprep.subr.bf16.mxu0 %v5464_v54  ;;  %v2174_v28 = vld [vmem:[%s8294_s29 + $0x60] sm:$0xff] }
 0x186   :  { %4985 = vmatpush1.bf16.msra.mxu1 %v4984_v1  ;;  %v7507_v43 = vadd.f32 %v4118_v48, %v4117_v32  ;;  %v1423_v1 = vmax.f32 %v5244_v60, 0.0  ;;  %v5002_v60 = vpack.c.bf16 %v1609_v24, %v1607_v17  ;;  %v5250_v32 = vadd.f32 %v7335_v22, %v7305_v0  ;;  %v1613_v48 = vld [vmem:[%s8292_s28 + $0x4b8] sm:$0xff]  ;;  %v1614_v2 = vld [vmem:[%s8292_s28 + $0x4c0] sm:$0xff] }
 0x187   :  { %4987 = vmatprep.subr.bf16.mxu1 %v4986_v31  ;;  %v1605_v31 = vld [vmem:[%s8292_s28 + $0x478] sm:$0xff]  ;;  %v5254_v24 = vadd.f32 %v7367_v39, %v7305_v0  ;;  %v1450_v39 = vmax.f32 %v5251_v36, 0.0 }
 0x188   :  { %v4998_v16 = vpack.c.bf16 %v1605_v31, %v1603_v42  ;;  %5062 = vmatpush1.bf16.msra.mxu0 %v5061_v8  ;;  %v1444_v42 = vmax.f32 %v5250_v32, 0.0  ;;  %v5252_v31 = vadd.f32 %v7351_v9, %v7305_v0  ;;  %v5012_v0 = vpack.c.bf16 %v1616_v15, %v1614_v2  ;;  %v1630_v15 = vld [vmem:[%s8292_s28 + $0x540] sm:$0xff] }
 0x189   :  { %1872 = vmatmul.mubr.f32.vlgmr.msra.gmra.mrb[48].mxu1 %v1408_v25  ;;  %5063 = vmatprep.subr.bf16.mxu0 %v5464_v54 }
 0x18a   :  { %1877 = vmatprep.mubr.f32.mxu1 %v1416_v18  ;;  %4989 = vmatpush1.bf16.msra.mxu1 %v4988_v20  ;;  %v1430_v20 = vmax.f32 %v5246_v5, 0.0  ;;  %v5247_v18 = vadd.f32 %v7313_v50, %v7441_v57  ;;  %v1611_v50 = vld [vmem:[%s8292_s28 + $0x4a8] sm:$0xff]  ;;  %v1612_v5 = vld [vmem:[%s8292_s28 + $0x4b0] sm:$0xff]  ;;  %v1451_v17 = vmax.f32 %v5252_v31, 0.0 }
 0x18b   :  { %4991 = vmatprep.subr.bf16.mxu1 %v4990_v26  ;;  %v1268_v26 = vadd.f32 %v7395_v7, %v7505_v3  ;;  %v1606_v7 = vld [vmem:[%s8292_s28 + $0x480] sm:$0xff]  ;;  %v5008_v9 = vpack.c.bf16 %v1612_v5, %v1610_v35 }
 0x18c   :  { %v1367_v52 = vpop.f32.mrb[32].mxu1  ;;  %5065 = vmatpush1.bf16.msra.mxu0 %v5064_v45  ;;  %v5004_v22 = vpack.c.bf16 %v1608_v37, %v1606_v7  ;;  %v1436_v63 = vmax.f32 %v5247_v18, 0.0  ;;  %v1618_v18 = vld [vmem:[%s8292_s28 + $0x4e0] sm:$0xff]  ;;  %v480_v7 = vsub.s32 5, %v7176_v46  ;;  %v1623_v37 = vld [vmem:[%s8292_s28 + $0x508] sm:$0xff] }
 0x18d   :  { %1878 = vmatmul.mubr.f32.gmra.mrb[50].mxu1 %v1415_v23  ;;  %v7557_v25 = vadd.f32 %v1367_v52, %v1263_v58  ;;  %v1369_v34 = vpop.f32.mrb[33].mxu1  ;;  %v5067_v23 = vpack.c.bf16 %v2171_v41, %v2170_v40  ;;  %5066 = vmatprep.subr.bf16.mxu0 %v5464_v54  ;;  %v1617_v58 = vld [vmem:[%s8292_s28 + $0x4d8] sm:$0xff]  ;;  %v5253_v41 = vadd.f32 %v7365_v49, %v7441_v57 }
 0x18e   :  { %1883 = vmatprep.mubr.f32.mxu1 %v1423_v1  ;;  %4993 = vmatpush1.bf16.msra.mxu1 %v4992_v51  ;;  %v5006_v1 = vpack.c.bf16 %v1613_v48, %v1611_v50  ;;  %v1621_v52 = vld [vmem:[%s8292_s28 + $0x4f8] sm:$0xff]  ;;  %v1288_v50 = vadd.f32 %v7455_v4, %v7505_v3  ;;  %v1627_v4 = vld [vmem:[%s8292_s28 + $0x528] sm:$0xff] }
 0x18f   :  { %4995 = vmatprep.subr.bf16.mxu1 %v4994_v11  ;;  %v2173_v11 = vld [vmem:[%s8294_s29 + $0x58] sm:$0xff] }
 0x190   :  { %v1372_v55 = vpop.f32.mrb[34].mxu1  ;;  %5068 = vmatpush1.bf16.msra.mxu0 %v5067_v23  ;;  %v1625_v49 = vld [vmem:[%s8292_s28 + $0x518] sm:$0xff]  ;;  %v1624_v23 = vld [vmem:[%s8292_s28 + $0x510] sm:$0xff] }
 0x191   :  { %1884 = vmatmul.mubr.f32.gmra.mrb[52].mxu1 %v1422_v19  ;;  %v7584_v51 = vadd.f32 %v1372_v55, %v1268_v26  ;;  %v1374_v61 = vpop.f32.mrb[35].mxu1  ;;  %v5070_v19 = vpack.c.bf16 %v2173_v11, %v2172_v62  ;;  %5069 = vmatprep.subr.bf16.mxu0 %v5464_v54  ;;  %v1457_v55 = vmax.f32 %v5253_v41, 0.0  ;;  %v1629_v62 = vld [vmem:[%s8292_s28 + $0x538] sm:$0xff]  ;;  %v1639_v41 = vld [vmem:[%s8292_s28 + $0x588] sm:$0xff] }
 0x192   :  { %1889 = vmatprep.mubr.f32.mxu1 %v1430_v20  ;;  %4997 = vmatpush1.bf16.msra.mxu1 %v4996_v10  ;;  %v5010_v20 = vpack.c.bf16 %v1617_v58, %v1615_v21  ;;  %v5018_v61 = vpack.c.bf16 %v1625_v49, %v1623_v37  ;;  %v5022_v31 = vpack.c.bf16 %v1629_v62, %v1627_v4  ;;  %v1626_v21 = vld [vmem:[%s8292_s28 + $0x520] sm:$0xff]  ;;  %v1628_v58 = vld [vmem:[%s8292_s28 + $0x530] sm:$0xff]  ;;  %v1647_v4 = vld [vmem:[%s8292_s28 + $0x5c8] sm:$0xff] }
 0x193   :  { %4999 = vmatprep.subr.bf16.mxu1 %v4998_v16  ;;  %v2175_v16 = vld [vmem:[%s8294_s29 + $0x68] sm:$0xff]  ;;  %v5024_v36 = vpack.c.bf16 %v1628_v58, %v1626_v21  ;;  %v1638_v37 = vld [vmem:[%s8292_s28 + $0x580] sm:$0xff]  ;;  %v1640_v49 = vld [vmem:[%s8292_s28 + $0x590] sm:$0xff] }
 0x194   :  { %v1377_v8 = vpop.f32.mrb[36].mxu1  ;;  %5071 = vmatpush1.bf16.msra.mxu0 %v5070_v19  ;;  %v5073_v40 = vpack.c.bf16 %v2175_v16, %v2174_v28  ;;  %v1298_v28 = vadd.f32 %v7507_v43, %v7505_v3  ;;  %v1637_v43 = vld [vmem:[%s8292_s28 + $0x578] sm:$0xff]  ;;  %v1648_v21 = vld [vmem:[%s8292_s28 + $0x5d0] sm:$0xff]  ;;  %v1651_v58 = vld [vmem:[%s8292_s28 + $0x5e8] sm:$0xff] }
 0x195   :  { %1890 = vmatmul.mubr.f32.gmra.mrb[54].mxu1 %v1429_v44  ;;  %v7611_v10 = vadd.f32 %v1377_v8, %v1273_v6  ;;  %v1379_v56 = vpop.f32.mrb[37].mxu1  ;;  %v5014_v44 = vpack.c.bf16 %v1621_v52, %v1619_v13  ;;  %5072 = vmatprep.subr.bf16.mxu0 %v5464_v54  ;;  %v1622_v6 = vld [vmem:[%s8292_s28 + $0x500] sm:$0xff]  ;;  %v1649_v62 = vld [vmem:[%s8292_s28 + $0x5d8] sm:$0xff] }
 0x196   :  { %1895 = vmatprep.mubr.f32.mxu1 %v1437_v47  ;;  %5001 = vmatpush1.bf16.msra.mxu1 %v5000_v38  ;;  %v1283_v38 = vadd.f32 %v7438_v59, %v7505_v3  ;;  %v1458_v59 = vmax.f32 %v5254_v24, 0.0  ;;  %v5020_v5 = vpack.c.bf16 %v1624_v23, %v1622_v6  ;;  %v1633_v56 = vld [vmem:[%s8292_s28 + $0x558] sm:$0xff]  ;;  %v1642_v6 = vld [vmem:[%s8292_s28 + $0x5a0] sm:$0xff]  ;;  %v1644_v23 = vld [vmem:[%s8292_s28 + $0x5b0] sm:$0xff] }
 0x197   :  { %5003 = vmatprep.subr.bf16.mxu1 %v5002_v60  ;;  %v1620_v60 = vld [vmem:[%s8292_s28 + $0x4f0] sm:$0xff] }
 0x198   :  { %v1382_v34 = vpop.f32.mrb[38].mxu1  ;;  %5074 = vmatpush1.bf16.msra.mxu0 %v5073_v40  ;;  %v5016_v48 = vpack.c.bf16 %v1620_v60, %v1618_v18 }
 0x199   :  { %1896 = vmatmul.mubr.f32.gmra.mrb[56].mxu1 %v1436_v63  ;;  %v7638_v26 = vadd.f32 %v1382_v34, %v1278_v14  ;;  %v1384_v45 = vpop.f32.mrb[39].mxu1  ;;  %5075 = vmatprep.subr.bf16.mxu0 %v5464_v54 }
 0x19a   :  { %1901 = vmatprep.mubr.f32.mxu1 %v1444_v42  ;;  %5005 = vmatpush1.bf16.msra.mxu1 %v5004_v22  ;;  %v7670_v22 = vrot.slane %v7182_v53, %v480_v7 }
 0x19b   :  { %5007 = vmatprep.subr.bf16.mxu1 %v5006_v1  ;;  %v1293_v1 = vadd.f32 %v7474_v33, %v7505_v3  ;;  %v1631_v33 = vld [vmem:[%s8292_s28 + $0x548] sm:$0xff] }
 0x19c   :  { %v1387_v57 = vpop.f32.mrb[40].mxu1  ;;  %v5026_v2 = vpack.c.bf16 %v1633_v56, %v1631_v33  ;;  %v1635_v3 = vld [vmem:[%s8292_s28 + $0x568] sm:$0xff] }
 0x19d   :  { %1902 = vmatmul.mubr.f32.gmra.mrb[58].mxu1 %v1443_v12  ;;  %v7658_v47 = vadd.f32 %v1387_v57, %v1283_v38  ;;  %v1389_v32 = vpop.f32.mrb[41].mxu1  ;;  %v5030_v40 = vpack.c.bf16 %v1637_v43, %v1635_v3  ;;  %v1643_v57 = vld [vmem:[%s8292_s28 + $0x5a8] sm:$0xff] }
 0x19e   :  { %1907 = vmatprep.mubr.f32.mxu1 %v1451_v17  ;;  %5009 = vmatpush1.bf16.msra.mxu1 %v5008_v9  ;;  %v1632_v17 = vld [vmem:[%s8292_s28 + $0x550] sm:$0xff]  ;;  %v1645_v32 = vld [vmem:[%s8292_s28 + $0x5b8] sm:$0xff] }
 0x19f   :  { %5011 = vmatprep.subr.bf16.mxu1 %v5010_v20  ;;  %v5028_v45 = vpack.c.bf16 %v1632_v17, %v1630_v15  ;;  %v1657_v15 = vld [vmem:[%s8292_s28 + $0x618] sm:$0xff] }
 0x1a0   :  { %v1392_v11 = vpop.f32.mrb[42].mxu1 }
 0x1a1   :  { %1908 = vmatmul.mubr.f32.gmra.mrb[60].mxu1 %v1450_v39  ;;  %v7678_v63 = vadd.f32 %v1392_v11, %v1288_v50  ;;  %v1394_v27 = vpop.f32.mrb[43].mxu1  ;;  %v1636_v39 = vld [vmem:[%s8292_s28 + $0x570] sm:$0xff] }
 0x1a2   :  { %1913 = vmatprep.mubr.f32.mxu1 %v1458_v59  ;;  %5013 = vmatpush1.bf16.msra.mxu1 %v5012_v0  ;;  %v1634_v0 = vld [vmem:[%s8292_s28 + $0x560] sm:$0xff]  ;;  %v5040_v27 = vpack.c.bf16 %v1644_v23, %v1642_v6 }
 0x1a3   :  { %5015 = vmatprep.subr.bf16.mxu1 %v5014_v44  ;;  %v1641_v44 = vld [vmem:[%s8292_s28 + $0x598] sm:$0xff]  ;;  %v5032_v60 = vpack.c.bf16 %v1636_v39, %v1634_v0 }
 0x1a4   :  { %v1397_v14 = vpop.f32.mrb[44].mxu1  ;;  %v5034_v7 = vpack.c.bf16 %v1641_v44, %v1639_v41 }
 0x1a5   :  { %1914 = vmatmul.mubr.f32.gmra.mrb[62].mxu1 %v1457_v55  ;;  %v7697_v19 = vadd.f32 %v1397_v14, %v1293_v1  ;;  %v1399_v9 = vpop.f32.mrb[45].mxu1  ;;  %v476_v1 = vsub.s32 4, %v7176_v46 }
 0x1a6   :  { %5017 = vmatpush1.bf16.msra.mxu1 %v5016_v48  ;;  %v7682_v35 = vpop.f32.mrb[16].mxu0  ;;  %v5036_v48 = vpack.c.bf16 %v1640_v49, %v1638_v37 }
 0x1a7   :  { %v1151_v42 = vpop.f32.mrb[17].mxu0  ;;  %5019 = vmatprep.subr.bf16.mxu1 %v5018_v61  ;;  %v5038_v61 = vpack.c.bf16 %v1645_v32, %v1643_v57  ;;  %v477_v14 = vrot.slane %v7182_v53, %v476_v1 }
 0x1a8   :  { %v5256_v8 = vadd.f32 %v1151_v42, %v7670_v22  ;;  %v1402_v24 = vpop.f32.mrb[46].mxu1  ;;  %v5042_v42 = vpack.c.bf16 %v1649_v62, %v1647_v4 }
 0x1a9   :  { %v7717_v13 = vadd.f32 %v1402_v24, %v1298_v28  ;;  %v1404_v52 = vpop.f32.mrb[47].mxu1  ;;  %v5255_v3 = vadd.f32 %v7682_v35, %v477_v14 }
 0x1aa   :  { %v1411_v16 = vmax.f32 %v5256_v8, 0.0  ;;  %5021 = vmatpush1.bf16.msra.mxu1 %v5020_v5  ;;  %v7701_v12 = vpop.f32.mrb[18].mxu0  ;;  %v1653_v8 = vld [vmem:[%s8292_s28 + $0x5f8] sm:$0xff]  ;;  %v1654_v52 = vld [vmem:[%s8292_s28 + $0x600] sm:$0xff] }
 0x1ab   :  { %v7703_v20 = vpop.f32.mrb[19].mxu0  ;;  %5023 = vmatprep.subr.bf16.mxu1 %v5022_v31  ;;  %v1646_v31 = vld [vmem:[%s8292_s28 + $0x5c0] sm:$0xff]  ;;  %v5046_v28 = vpack.c.bf16 %v1653_v8, %v1651_v58  ;;  %v1410_v39 = vmax.f32 %v5255_v3, 0.0  ;;  %v5257_v41 = vadd.f32 %v7701_v12, %v477_v14  ;;  %v1433_v58 = vmax.f32 %v7638_v26, 0.0 }
 0x1ac   :  { %1984 = vmatprep.mubr.f32.mxu1 %v1411_v16  ;;  %v5044_v56 = vpack.c.bf16 %v1648_v21, %v1646_v31  ;;  %v1650_v16 = vld [vmem:[%s8292_s28 + $0x5e0] sm:$0xff]  ;;  %v1412_v31 = vmax.f32 %v7557_v25, 0.0  ;;  %v1426_v21 = vmax.f32 %v7611_v10, 0.0  ;;  %v1440_v25 = vmax.f32 %v7658_v47, 0.0  ;;  %v2176_v47 = vld [vmem:[%s8294_s29 + $0x70] sm:$0xff] }
 0x1ad   :  { %v1454_v10 = vmax.f32 %v7697_v19, 0.0  ;;  %v1461_v26 = vmax.f32 %v7717_v13, 0.0  ;;  %v2178_v19 = vld [vmem:[%s8294_s29 + $0x80] sm:$0xff]  ;;  %v2179_v13 = vld [vmem:[%s8294_s29 + $0x88] sm:$0xff] }
 0x1ae   :  { %5025 = vmatpush1.bf16.msra.mxu1 %v5024_v36  ;;  %v7719_v34 = vpop.f32.mrb[20].mxu0  ;;  %v1652_v36 = vld [vmem:[%s8292_s28 + $0x5f0] sm:$0xff] }
 0x1af   :  { %v7721_v38 = vpop.f32.mrb[21].mxu0  ;;  %5027 = vmatprep.subr.bf16.mxu1 %v5026_v2  ;;  %v1655_v2 = vld [vmem:[%s8292_s28 + $0x608] sm:$0xff]  ;;  %v5048_v17 = vpack.c.bf16 %v1652_v36, %v1650_v16 }
 0x1b0   :  { %v5050_v24 = vpack.c.bf16 %v1657_v15, %v1655_v2  ;;  %v5260_v44 = vadd.f32 %v7721_v38, %v7670_v22 }
 0x1b2   :  { %5029 = vmatpush1.bf16.msra.mxu1 %v5028_v45  ;;  %v7735_v18 = vpop.f32.mrb[22].mxu0  ;;  %v1656_v45 = vld [vmem:[%s8292_s28 + $0x610] sm:$0xff]  ;;  %v1425_v37 = vmax.f32 %v5260_v44, 0.0 }
 0x1b3   :  { %v7737_v59 = vpop.f32.mrb[23].mxu0  ;;  %5031 = vmatprep.subr.bf16.mxu1 %v5030_v40  ;;  %v5258_v40 = vadd.f32 %v7703_v20, %v7670_v22  ;;  %v5052_v0 = vpack.c.bf16 %v1656_v45, %v1654_v52  ;;  %v5261_v49 = vadd.f32 %v7735_v18, %v477_v14 }
 0x1b4   :  { %v5262_v20 = vadd.f32 %v7737_v59, %v7670_v22 }
 0x1b5   :  { %v1418_v35 = vmax.f32 %v5258_v40, 0.0  ;;  %v1431_v32 = vmax.f32 %v5261_v49, 0.0 }
 0x1b6   :  { %5033 = vmatpush1.bf16.msra.mxu1 %v5032_v60  ;;  %v7751_v50 = vpop.f32.mrb[24].mxu0  ;;  %v1417_v60 = vmax.f32 %v5257_v41, 0.0  ;;  %v1432_v57 = vmax.f32 %v5262_v20, 0.0 }
 0x1b7   :  { %v1175_v55 = vpop.f32.mrb[25].mxu0  ;;  %5035 = vmatprep.subr.bf16.mxu1 %v5034_v7  ;;  %v5259_v7 = vadd.f32 %v7719_v34, %v477_v14 }
 0x1b8   :  { %v5264_v38 = vadd.f32 %v1175_v55, %v7670_v22 }
 0x1b9   :  { %v1424_v12 = vmax.f32 %v5259_v7, 0.0 }
 0x1ba   :  { %5037 = vmatpush1.bf16.msra.mxu1 %v5036_v48  ;;  %v1179_v11 = vpop.f32.mrb[26].mxu0  ;;  %v5263_v48 = vadd.f32 %v7751_v50, %v477_v14  ;;  %v1439_v34 = vmax.f32 %v5264_v38, 0.0 }
 0x1bb   :  { %v1181_v5 = vpop.f32.mrb[27].mxu0  ;;  %5039 = vmatprep.subr.bf16.mxu1 %v5038_v61  ;;  %v5265_v59 = vadd.f32 %v1179_v11, %v477_v14  ;;  %v5465_v11 = vmov 0.0  }
 0x1bc   :  { %v5266_v61 = vadd.f32 %v1181_v5, %v7670_v22  ;;  %v1438_v6 = vmax.f32 %v5263_v48, 0.0 }
 0x1bd   :  { %v1445_v18 = vmax.f32 %v5265_v59, 0.0 }
 0x1be   :  { %5041 = vmatpush1.bf16.msra.mxu1 %v5040_v27  ;;  %v1185_v33 = vpop.f32.mrb[28].mxu0  ;;  %v1446_v23 = vmax.f32 %v5266_v61, 0.0 }
 0x1bf   :  { %v1187_v9 = vpop.f32.mrb[29].mxu0  ;;  %5043 = vmatprep.subr.bf16.mxu1 %v5042_v42  ;;  %v5267_v62 = vadd.f32 %v1185_v33, %v477_v14  ;;  %v5079_v33 = vpack.c.bf16 %v2179_v13, %v2178_v19  ;;  %v2331_v19 = vld [vmem:[%s8297_s10 + $0x38] sm:$0xff]  ;;  %v2482_v13 = vld [vmem:[%s8298_s6] sm:$0xff] }
 0x1c0   :  { %v5268_v4 = vadd.f32 %v1187_v9, %v7670_v22 }
 0x1c1   :  { %v1452_v50 = vmax.f32 %v5267_v62, 0.0 }
 0x1c2   :  { %5045 = vmatpush1.bf16.msra.mxu1 %v5044_v56  ;;  %v1191_v53 = vpop.f32.mrb[30].mxu0  ;;  %v1453_v55 = vmax.f32 %v5268_v4, 0.0  ;;  %v2332_v56 = vld [vmem:[%s8295_s25] sm:$0x3f] }
 0x1c3   :  { %v1193_v43 = vpop.f32.mrb[31].mxu0  ;;  %5047 = vmatprep.subr.bf16.mxu1 %v5046_v28  ;;  %v5269_v1 = vadd.f32 %v1191_v53, %v477_v14  ;;  %v1658_v14 = vld [vmem:[%s8296_s0] sm:$0x3] }
 0x1c4   :  { %v5270_v27 = vadd.f32 %v1193_v43, %v7670_v22  ;;  %v1419_v22 = vmax.f32 %v7584_v51, 0.0  ;;  %v1447_v51 = vmax.f32 %v7678_v63, 0.0  ;;  %v2177_v63 = vld [vmem:[%s8294_s29 + $0x78] sm:$0xff]  ;;  %v1663_v9 = vrot.slane %v1658_v14, %v460_v29 }
 0x1c5   :  { %v1459_v5 = vmax.f32 %v5269_v1, 0.0  ;;  %v5076_v8 = vpack.c.bf16 %v2177_v63, %v2176_v47  ;;  %v1667_v28 = vrot.slane %v1658_v14, %v464_v30  ;;  %v2328_v47 = vld [vmem:[%s8297_s10 + $0x20] sm:$0xff]  ;;  %v2329_v63 = vld [vmem:[%s8297_s10 + $0x28] sm:$0xff]  ;;  %v2484_v14 = vld [vmem:[%s8298_s6 + $0x10] sm:$0xff] }
 0x1c6   :  { %5049 = vmatpush1.bf16.msra.mxu1 %v5048_v17  ;;  %v1460_v42 = vmax.f32 %v5270_v27, 0.0 }
 0x1c7   :  { %5051 = vmatprep.subr.bf16.mxu1 %v5050_v24  ;;  %5077 = vmatpush1.bf16.msra.mxu0 %v5076_v8  ;;  %v2330_v8 = vld [vmem:[%s8297_s10 + $0x30] sm:$0xff] }
 0x1c8   :  { %5078 = vmatprep.subr.bf16.mxu0 %v5464_v54 }
 0x1c9   :  { %1985 = vmatmul.mubr.f32.vlgmr.msra.gmra.mrb[48].mxu1 %v1410_v39 }
 0x1ca   :  { %1990 = vmatprep.mubr.f32.mxu1 %v1418_v35  ;;  %5053 = vmatpush1.bf16.msra.mxu1 %v5052_v0 }
 0x1cb   :  { %5205 = vmatprep.subr.bf16.mxu1 %v5464_v54  ;;  %5080 = vmatpush1.bf16.msra.mxu0 %v5079_v33  ;;  %v2483_v33 = vld [vmem:[%s8298_s6 + $0x8] sm:$0xff] }
 0x1cc   :  { %4250 = vmatprep.subr.msk.mxu0 %vm2365_vm1, %v2332_v56 }
 0x1cd   :  { %1991 = vmatmul.mubr.f32.gmra.mrb[50].mxu1 %v1417_v60 }
 0x1ce   :  { %1996 = vmatprep.mubr.f32.mxu1 %v1425_v37 }
 0x1d1   :  { %1997 = vmatmul.mubr.f32.gmra.mrb[52].mxu1 %v1424_v12 }
 0x1d2   :  { %2002 = vmatprep.mubr.f32.mxu1 %v1432_v57 }
 0x1d5   :  { %2003 = vmatmul.mubr.f32.gmra.mrb[54].mxu1 %v1431_v32 }
 0x1d6   :  { %2008 = vmatprep.mubr.f32.mxu1 %v1439_v34 }
 0x1d9   :  { %2009 = vmatmul.mubr.f32.gmra.mrb[56].mxu1 %v1438_v6 }
 0x1da   :  { %2014 = vmatprep.mubr.f32.mxu1 %v1446_v23 }
 0x1dd   :  { %2015 = vmatmul.mubr.f32.gmra.mrb[58].mxu1 %v1445_v18 }
 0x1de   :  { %2020 = vmatprep.mubr.f32.mxu1 %v1453_v55 }
 0x1e1   :  { %2021 = vmatmul.mubr.f32.gmra.mrb[60].mxu1 %v1452_v50 }
 0x1e2   :  { %2026 = vmatprep.mubr.f32.mxu1 %v1460_v42 }
 0x1e5   :  { %2027 = vmatmul.mubr.f32.gmra.mrb[62].mxu1 %v1459_v5 }
 0x1e6   :  { %2097 = vmatprep.mubr.f32.mxu1 %v5465_v11 }
 0x1e9   :  { %4000 = vmatmul.mubr.msk.f32.vlgmr.msra.gmra.mrb[48].mxu1 %vm493_vm0, %v1412_v31 }
 0x1ea   :  { %2103 = vmatprep.mubr.f32.mxu1 %v5465_v11 }
 0x1ed   :  { %4001 = vmatmul.mubr.msk.f32.gmra.mrb[50].mxu1 %vm493_vm0, %v1419_v22 }
 0x1ee   :  { %2109 = vmatprep.mubr.f32.mxu1 %v5465_v11 }
 0x1f1   :  { %4002 = vmatmul.mubr.msk.f32.gmra.mrb[52].mxu1 %vm493_vm0, %v1426_v21 }
 0x1f2   :  { %2115 = vmatprep.mubr.f32.mxu1 %v5465_v11 }
 0x1f5   :  { %4003 = vmatmul.mubr.msk.f32.gmra.mrb[54].mxu1 %vm493_vm0, %v1433_v58 }
 0x1f6   :  { %2121 = vmatprep.mubr.f32.mxu1 %v5465_v11 }
 0x1f9   :  { %4004 = vmatmul.mubr.msk.f32.gmra.mrb[56].mxu1 %vm493_vm0, %v1440_v25  ;;  %v2324_v25 = vld [vmem:[%s8297_s10] sm:$0xff] }
 0x1fa   :  { %2127 = vmatprep.mubr.f32.mxu1 %v5465_v11 }
 0x1fd   :  { %4005 = vmatmul.mubr.msk.f32.gmra.mrb[58].mxu1 %vm493_vm0, %v1447_v51  ;;  %v2325_v51 = vld [vmem:[%s8297_s10 + $0x8] sm:$0xff] }
 0x1fe   :  { %2133 = vmatprep.mubr.f32.mxu1 %v5465_v11 }
 0x201   :  { %4006 = vmatmul.mubr.msk.f32.gmra.mrb[60].mxu1 %vm493_vm0, %v1454_v10  ;;  %v2326_v10 = vld [vmem:[%s8297_s10 + $0x10] sm:$0xff] }
 0x202   :  { %2139 = vmatprep.mubr.f32.mxu1 %v5465_v11 }
 0x205   :  { %4007 = vmatmul.mubr.msk.f32.gmra.mrb[62].mxu1 %vm493_vm0, %v1461_v26  ;;  %v2327_v26 = vld [vmem:[%s8297_s10 + $0x18] sm:$0xff] }
 0x206   :  { %4474 = vmatprep.mubr.msk.f32.mxu1 %vm5466_vm5, %v5465_v11 }
 0x2bc   :  { %v2099_v16 = vpop.f32.mrb[48].mxu1 }
 0x2bd   :  { %v5271_v36 = vadd.f32 %v2099_v16, %v1663_v9  ;;  %v2101_v2 = vpop.f32.mrb[49].mxu1  ;;  %v2486_v16 = vld [vmem:[%s8298_s6 + $0x20] sm:$0xff] }
 0x2be   :  { %v5272_v15 = vadd.f32 %v2101_v2, %v1667_v28 }
 0x2bf   :  { %v2146_v3 = vmax.f32 %v5271_v36, 0.0  ;;  %v2487_v36 = vld [vmem:[%s8298_s6 + $0x28] sm:$0xff] }
 0x2c0   :  { %v2147_v53 = vmax.f32 %v5272_v15, 0.0  ;;  %v2105_v17 = vpop.f32.mrb[50].mxu1  ;;  %v5089_v2 = vpack.c.bf16 %v2487_v36, %v2486_v16  ;;  %v2488_v15 = vld [vmem:[%s8298_s6 + $0x30] sm:$0xff]  ;;  %v2646_v36 = vld [vmem:[%s8259_s14 + $0x58] sm:$0xff] }
 0x2c1   :  { %v5273_v43 = vadd.f32 %v2105_v17, %v1663_v9  ;;  %v2107_v24 = vpop.f32.mrb[51].mxu1  ;;  %v2645_v16 = vld [vmem:[%s8259_s14 + $0x50] sm:$0xff] }
 0x2c2   :  { %v5274_v52 = vadd.f32 %v2107_v24, %v1667_v28  ;;  %4009 = vmatprep.mubr.msk.f32.mxu0 %vm493_vm0, %v2147_v53  ;;  %v2489_v53 = vld [vmem:[%s8298_s6 + $0x38] sm:$0xff] }
 0x2c3   :  { %2276 = vmatmul.mubr.f32.vlgmr.msra.gmra.mrb[32].mxu0 %v2146_v3  ;;  %v2148_v29 = vmax.f32 %v5273_v43, 0.0  ;;  %v5093_v17 = vpack.c.bf16 %v2489_v53, %v2488_v15  ;;  %v2635_v3 = vld [vmem:[%s8259_s14] sm:$0xff]  ;;  %v2636_v43 = vld [vmem:[%s8259_s14 + $0x8] sm:$0xff] }
 0x2c4   :  { %v2149_v45 = vmax.f32 %v5274_v52, 0.0  ;;  %v2111_v40 = vpop.f32.mrb[52].mxu1  ;;  %4251 = vmatpush3.msk.msra.mxu0 %vm2365_vm1, %v2332_v56  ;;  %v5081_v56 = vpack.c.bf16 %v2483_v33, %v2482_v13  ;;  %v5097_v24 = vpack.c.bf16 %v2636_v43, %v2635_v3  ;;  %v2643_v33 = vld [vmem:[%s8259_s14 + $0x40] sm:$0xff]  ;;  %v2648_v53 = vld [vmem:[%s8259_s14 + $0x68] sm:$0xff]  ;;  %v2649_v3 = vld [vmem:[%s8259_s14 + $0x70] sm:$0xff] }
 0x2c5   :  { %v5275_v46 = vadd.f32 %v2111_v40, %v1663_v9  ;;  %v2113_v30 = vpop.f32.mrb[53].mxu1  ;;  %v2647_v15 = vld [vmem:[%s8259_s14 + $0x60] sm:$0xff]  ;;  %v2650_v43 = vld [vmem:[%s8259_s14 + $0x78] sm:$0xff] }
 0x2c6   :  { %v5276_v0 = vadd.f32 %v2113_v30, %v1667_v28  ;;  %4010 = vmatprep.mubr.msk.f32.mxu0 %vm493_vm0, %v2149_v45  ;;  %5082 = vmatprep.subr.bf16.mxu0 %v5081_v56 }
 0x2c7   :  { %2281 = vmatmul.mubr.f32.gmra.mrb[34].mxu0 %v2148_v29  ;;  %v2150_v35 = vmax.f32 %v5275_v46, 0.0 }
 0x2c8   :  { %v2151_v39 = vmax.f32 %v5276_v0, 0.0  ;;  %v2117_v41 = vpop.f32.mrb[54].mxu1 }
 0x2c9   :  { %v5277_v44 = vadd.f32 %v2117_v41, %v1663_v9  ;;  %v2119_v60 = vpop.f32.mrb[55].mxu1 }
 0x2ca   :  { %v5278_v7 = vadd.f32 %v2119_v60, %v1667_v28  ;;  %4011 = vmatprep.mubr.msk.f32.mxu0 %vm493_vm0, %v2151_v39 }
 0x2cb   :  { %2286 = vmatmul.mubr.f32.gmra.mrb[36].mxu0 %v2150_v35  ;;  %v2152_v12 = vmax.f32 %v5277_v44, 0.0 }
 0x2cc   :  { %v2153_v37 = vmax.f32 %v5278_v7, 0.0  ;;  %v2123_v20 = vpop.f32.mrb[56].mxu1 }
 0x2cd   :  { %v5279_v49 = vadd.f32 %v2123_v20, %v1663_v9  ;;  %v2125_v57 = vpop.f32.mrb[57].mxu1 }
 0x2ce   :  { %v5280_v38 = vadd.f32 %v2125_v57, %v1667_v28  ;;  %4012 = vmatprep.mubr.msk.f32.mxu0 %vm493_vm0, %v2153_v37 }
 0x2cf   :  { %2291 = vmatmul.mubr.f32.gmra.mrb[38].mxu0 %v2152_v12  ;;  %v2154_v34 = vmax.f32 %v5279_v49, 0.0  ;;  %v4017_v49 = vld [vmem:[%s8260_s11] ss:$0 sm:$0xff] }
 0x2d0   :  { %v2155_v32 = vmax.f32 %v5280_v38, 0.0  ;;  %v2129_v48 = vpop.f32.mrb[58].mxu1 }
 0x2d1   :  { %v5281_v61 = vadd.f32 %v2129_v48, %v1663_v9  ;;  %v2131_v6 = vpop.f32.mrb[59].mxu1 }
 0x2d2   :  { %v5282_v59 = vadd.f32 %v2131_v6, %v1667_v28  ;;  %4013 = vmatprep.mubr.msk.f32.mxu0 %vm493_vm0, %v2155_v32 }
 0x2d3   :  { %2296 = vmatmul.mubr.f32.gmra.mrb[40].mxu0 %v2154_v34  ;;  %v2156_v18 = vmax.f32 %v5281_v61, 0.0  ;;  %v2637_v34 = vld [vmem:[%s8259_s14 + $0x10] sm:$0xff]  ;;  %v2638_v61 = vld [vmem:[%s8259_s14 + $0x18] sm:$0xff] }
 0x2d4   :  { %v2157_v23 = vmax.f32 %v5282_v59, 0.0  ;;  %v2135_v4 = vpop.f32.mrb[60].mxu1 }
 0x2d5   :  { %v5283_v62 = vadd.f32 %v2135_v4, %v1663_v9  ;;  %v2137_v55 = vpop.f32.mrb[61].mxu1 }
 0x2d6   :  { %v5284_v27 = vadd.f32 %v2137_v55, %v1667_v28  ;;  %4014 = vmatprep.mubr.msk.f32.mxu0 %vm493_vm0, %v2157_v23 }
 0x2d7   :  { %2301 = vmatmul.mubr.f32.gmra.mrb[42].mxu0 %v2156_v18  ;;  %v2158_v42 = vmax.f32 %v5283_v62, 0.0  ;;  %v5101_v62 = vpack.c.bf16 %v2638_v61, %v2637_v34 }
 0x2d8   :  { %v2159_v50 = vmax.f32 %v5284_v27, 0.0  ;;  %v2141_v1 = vpop.f32.mrb[62].mxu1  ;;  %v2639_v27 = vld [vmem:[%s8259_s14 + $0x20] sm:$0xff] }
 0x2d9   :  { %v5285_v5 = vadd.f32 %v2141_v1, %v1663_v9  ;;  %v2143_v31 = vpop.f32.mrb[63].mxu1  ;;  %v2485_v9 = vld [vmem:[%s8298_s6 + $0x18] sm:$0xff] }
 0x2da   :  { %v5286_v22 = vadd.f32 %v2143_v31, %v1667_v28  ;;  %4015 = vmatprep.mubr.msk.f32.mxu0 %vm493_vm0, %v2159_v50  ;;  %v5085_v28 = vpack.c.bf16 %v2485_v9, %v2484_v14  ;;  %v2640_v50 = vld [vmem:[%s8259_s14 + $0x28] sm:$0xff] }
 0x2db   :  { %2306 = vmatmul.mubr.f32.gmra.mrb[44].mxu0 %v2158_v42  ;;  %v2160_v58 = vmax.f32 %v5285_v5, 0.0 }
 0x2dc   :  { %v2161_v21 = vmax.f32 %v5286_v22, 0.0 }
 0x2de   :  { %4016 = vmatprep.mubr.msk.f32.mxu0 %vm493_vm0, %v2161_v21  ;;  %v5105_v21 = vpack.c.bf16 %v2640_v50, %v2639_v27 }
 0x2df   :  { %2311 = vmatmul.mubr.f32.gmra.mrb[46].mxu0 %v2160_v58 }
 0x2e0   :  { %4252 = vmatprep.mubr.msk.f32.mxu0 %vm2340_vm2, %v2324_v25  ;;  %v2641_v25 = vld [vmem:[%s8259_s14 + $0x30] sm:$0xff] }
 0x2e3   :  { %4253 = vmatmul.mubr.msk.f32.vlgmr.msra.gmra.mrb[48].mxu0 %vm2340_vm2, %v2325_v51  ;;  %v2642_v51 = vld [vmem:[%s8259_s14 + $0x38] sm:$0xff] }
 0x2e4   :  { %4255 = vmatprep.mubr.msk.f32.mxu0 %vm2340_vm2, %v2326_v10  ;;  %5084 = vmatpush3.bf16.msra.mxu0 %v5081_v56  ;;  %v2644_v56 = vld [vmem:[%s8259_s14 + $0x48] sm:$0xff] }
 0x2e5   :  { %5086 = vmatprep.subr.bf16.mxu0 %v5085_v28 }
 0x2e7   :  { %4256 = vmatmul.mubr.msk.f32.gmra.mrb[50].mxu0 %vm2340_vm2, %v2327_v26 }
 0x2e8   :  { %4258 = vmatprep.mubr.msk.f32.mxu0 %vm2340_vm2, %v2328_v47  ;;  %5088 = vmatpush3.bf16.msra.mxu0 %v5085_v28  ;;  %v5113_v28 = vpack.c.bf16 %v2644_v56, %v2643_v33 }
 0x2e9   :  { %5090 = vmatprep.subr.bf16.mxu0 %v5089_v2 }
 0x2eb   :  { %4259 = vmatmul.mubr.msk.f32.gmra.mrb[52].mxu0 %vm2340_vm2, %v2329_v63 }
 0x2ec   :  { %4261 = vmatprep.mubr.msk.f32.mxu0 %vm2340_vm2, %v2330_v8  ;;  %5092 = vmatpush3.bf16.msra.mxu0 %v5089_v2  ;;  %v5117_v2 = vpack.c.bf16 %v2646_v36, %v2645_v16 }
 0x2ed   :  { %5094 = vmatprep.subr.bf16.mxu0 %v5093_v17 }
 0x2ef   :  { %4262 = vmatmul.mubr.msk.f32.gmra.mrb[54].mxu0 %vm2340_vm2, %v2331_v19  ;;  %v5109_v19 = vpack.c.bf16 %v2642_v51, %v2641_v25 }
 0x2f0   :  { %5096 = vmatpush3.bf16.msra.mxu0 %v5093_v17  ;;  %v5121_v17 = vpack.c.bf16 %v2648_v53, %v2647_v15  ;;  %v2777_v15 = vld [vmem:[%s8263_s16 + $0x30] sm:$0xff]  ;;  %v2778_v53 = vld [vmem:[%s8263_s16 + $0x38] sm:$0xff] }
 0x2f1   :  { %5098 = vmatprep.subr.bf16.mxu0 %v5097_v24 }
 0x396   :  { %v7932_v52 = vpop.f32.mrb[32].mxu0 }
 0x397   :  { %v2279_v45 = vpop.f32.mrb[33].mxu0 }
 0x398   :  { %v2787_v45 = vld [vmem:[%s8261_s17] sm:$0xff] }
 0x39a   :  { %v7934_v40 = vpop.f32.mrb[34].mxu0 }
 0x39b   :  { %v2284_v29 = vpop.f32.mrb[35].mxu0 }
 0x39c   :  { %v2788_v29 = vld [vmem:[%s8261_s17 + $0x8] sm:$0xff] }
 0x39e   :  { %v7936_v46 = vpop.f32.mrb[36].mxu0 }
 0x39f   :  { %v2289_v30 = vpop.f32.mrb[37].mxu0 }
 0x3a0   :  { %v5129_v30 = vpack.c.bf16 %v2788_v29, %v2787_v45 }
 0x3a2   :  { %v7938_v0 = vpop.f32.mrb[38].mxu0 }
 0x3a3   :  { %v2294_v39 = vpop.f32.mrb[39].mxu0 }
 0x3a4   :  { %v4027_v39 = vld [vmem:[%s8262_s13] ss:$0 sm:$0xff] }
 0x3a6   :  { %v7940_v41 = vpop.f32.mrb[40].mxu0 }
 0x3a7   :  { %v2299_v35 = vpop.f32.mrb[41].mxu0 }
 0x3aa   :  { %v7942_v44 = vpop.f32.mrb[42].mxu0 }
 0x3ab   :  { %v2304_v60 = vpop.f32.mrb[43].mxu0 }
 0x3ae   :  { %v7944_v7 = vpop.f32.mrb[44].mxu0 }
 0x3af   :  { %v2309_v37 = vpop.f32.mrb[45].mxu0 }
 0x3b2   :  { %v7946_v20 = vpop.f32.mrb[46].mxu0 }
 0x3b3   :  { %v2314_v12 = vpop.f32.mrb[47].mxu0 }
 0x3b6   :  { %v4254_v57 = vpop.f32.mrb[48].mxu0 }
 0x3b7   :  { %v2441_v38 = vadd.f32 %v4254_v57, %v4017_v49  ;;  %v2435_v32 = vpop.f32.mrb[49].mxu0  ;;  %v2790_v57 = vld [vmem:[%s8261_s17 + $0x18] sm:$0xff] }
 0x3b8   :  { %v2436_v48 = vadd.f32 %v4017_v49, %v2435_v32 }
 0x3b9   :  { %v2475_v23 = vmax.f32 %v2441_v38, 0.0 }
 0x3ba   :  { %v2474_v6 = vmax.f32 %v2436_v48, 0.0  ;;  %v4257_v59 = vpop.f32.mrb[50].mxu0 }
 0x3bb   :  { %v2451_v4 = vadd.f32 %v4257_v59, %v4017_v49  ;;  %v2445_v18 = vpop.f32.mrb[51].mxu0 }
 0x3bc   :  { %v2446_v55 = vadd.f32 %v4017_v49, %v2445_v18  ;;  %4280 = vmatprep.mubr.msk.f32.mxu0 %vm2497_vm3, %v2474_v6 }
 0x3bd   :  { %4281 = vmatmul.mubr.msk.f32.vlgmr.msra.gmra.mrb[56].mxu0 %vm2497_vm3, %v2475_v23  ;;  %v2477_v5 = vmax.f32 %v2451_v4, 0.0  ;;  %v2771_v23 = vld [vmem:[%s8263_s16] sm:$0xff]  ;;  %v2772_v4 = vld [vmem:[%s8263_s16 + $0x8] sm:$0xff] }
 0x3be   :  { %v2476_v1 = vmax.f32 %v2446_v55, 0.0  ;;  %v4260_v42 = vpop.f32.mrb[52].mxu0  ;;  %5100 = vmatpush3.bf16.msra.mxu0 %v5097_v24  ;;  %v5125_v24 = vpack.c.bf16 %v2650_v43, %v2649_v3  ;;  %v5149_v3 = vpack.c.bf16 %v2778_v53, %v2777_v15 }
 0x3bf   :  { %v2461_v31 = vadd.f32 %v4260_v42, %v4017_v49  ;;  %v2455_v22 = vpop.f32.mrb[53].mxu0  ;;  %5102 = vmatprep.subr.bf16.mxu0 %v5101_v62 }
 0x3c0   :  { %v2456_v58 = vadd.f32 %v4017_v49, %v2455_v22  ;;  %4283 = vmatprep.mubr.msk.f32.mxu0 %vm2497_vm3, %v2476_v1  ;;  %v5137_v1 = vpack.c.bf16 %v2772_v4, %v2771_v23 }
 0x3c1   :  { %4284 = vmatmul.mubr.msk.f32.gmra.mrb[58].mxu0 %vm2497_vm3, %v2477_v5  ;;  %v2479_v47 = vmax.f32 %v2461_v31, 0.0  ;;  %v4008_v5 = vld [vmem:[%s8264_s9] ss:$0 sm:$0xff]  ;;  %s5468_s9 = smov 32  }
 0x3c2   :  { %v2478_v10 = vmax.f32 %v2456_v58, 0.0  ;;  %v4263_v26 = vpop.f32.mrb[54].mxu0  ;;  %5104 = vmatpush3.bf16.msra.mxu0 %v5101_v62  ;;  %v2278_v51 = vadd.f32 %v4008_v5, %v7932_v52  ;;  %v2774_v52 = vld [vmem:[%s8263_s16 + $0x18] sm:$0xff] }
 0x3c3   :  { %v2471_v63 = vadd.f32 %v4263_v26, %v4017_v49  ;;  %v2465_v8 = vpop.f32.mrb[55].mxu0  ;;  %5106 = vmatprep.subr.bf16.mxu0 %v5105_v21 }
 0x3c4   :  { %v2466_v13 = vadd.f32 %v4017_v49, %v2465_v8  ;;  %4286 = vmatprep.mubr.msk.f32.mxu0 %vm2497_vm3, %v2478_v10  ;;  %v2789_v49 = vld [vmem:[%s8261_s17 + $0x10] sm:$0xff]  ;;  %v2316_v8 = vmax.f32 %v2278_v51, 0.0 }
 0x3c5   :  { %4287 = vmatmul.mubr.msk.f32.gmra.mrb[60].mxu0 %vm2497_vm3, %v2479_v47  ;;  %v2481_v9 = vmax.f32 %v2471_v63, 0.0  ;;  %v5133_v6 = vpack.c.bf16 %v2790_v57, %v2789_v49  ;;  %v2283_v47 = vadd.f32 %v4008_v5, %v7934_v40  ;;  %v2293_v40 = vadd.f32 %v4008_v5, %v7938_v0  ;;  %v2786_v49 = vld [vmem:[%s8263_s16 + $0x78] sm:$0xff] }
 0x3c6   :  { %v2480_v14 = vmax.f32 %v2466_v13, 0.0  ;;  %5108 = vmatpush3.bf16.msra.mxu0 %v5105_v21  ;;  %v2773_v13 = vld [vmem:[%s8263_s16 + $0x10] sm:$0xff]  ;;  %v2303_v0 = vadd.f32 %v4008_v5, %v7942_v44  ;;  %v2313_v44 = vadd.f32 %v4008_v5, %v7946_v20 }
 0x3c7   :  { %5110 = vmatprep.subr.bf16.mxu0 %v5109_v19  ;;  %v2317_v33 = vmax.f32 %v2283_v47, 0.0  ;;  %v5141_v56 = vpack.c.bf16 %v2774_v52, %v2773_v13  ;;  %v2319_v16 = vmax.f32 %v2293_v40, 0.0  ;;  %v2781_v20 = vld [vmem:[%s8263_s16 + $0x50] sm:$0xff]  ;;  %v4045_v40 = vld [vmem:[%s8268_s18] ss:$0 sm:$0xff] }
 0x3c8   :  { %4289 = vmatprep.mubr.msk.f32.mxu0 %vm2497_vm3, %v2480_v14  ;;  %v2323_v45 = vmax.f32 %v2313_v44, 0.0 }
 0x3c9   :  { %4290 = vmatmul.mubr.msk.f32.gmra.mrb[62].mxu0 %vm2497_vm3, %v2481_v9  ;;  %v2298_v9 = vadd.f32 %v4008_v5, %v7940_v41  ;;  %v2308_v41 = vadd.f32 %v4008_v5, %v7944_v7  ;;  %v2779_v7 = vld [vmem:[%s8263_s16 + $0x40] sm:$0xff] }
 0x3ca   :  { %5112 = vmatpush3.bf16.msra.mxu0 %v5109_v19  ;;  %v2288_v19 = vadd.f32 %v4008_v5, %v7936_v46  ;;  %v2775_v46 = vld [vmem:[%s8263_s16 + $0x20] sm:$0xff] }
 0x3cb   :  { %5114 = vmatprep.subr.bf16.mxu0 %v5113_v28  ;;  %v2322_v43 = vmax.f32 %v2308_v41, 0.0 }
 0x3cc   :  { %v2318_v14 = vmax.f32 %v2288_v19, 0.0 }
 0x3ce   :  { %5116 = vmatpush3.bf16.msra.mxu0 %v5113_v28  ;;  %v2776_v28 = vld [vmem:[%s8263_s16 + $0x28] sm:$0xff] }
 0x3cf   :  { %5118 = vmatprep.subr.bf16.mxu0 %v5117_v2  ;;  %v5145_v36 = vpack.c.bf16 %v2776_v28, %v2775_v46 }
 0x3d2   :  { %5120 = vmatpush3.bf16.msra.mxu0 %v5117_v2  ;;  %v2320_v2 = vmax.f32 %v2298_v9, 0.0 }
 0x3d3   :  { %5122 = vmatprep.subr.bf16.mxu0 %v5121_v17 }
 0x3d6   :  { %5124 = vmatpush3.bf16.msra.mxu0 %v5121_v17  ;;  %v2321_v17 = vmax.f32 %v2303_v0, 0.0 }
 0x3d7   :  { %5126 = vmatprep.subr.bf16.mxu0 %v5125_v24 }
 0x3da   :  { %5128 = vmatpush3.bf16.msra.mxu0 %v5125_v24  ;;  %v2780_v24 = vld [vmem:[%s8263_s16 + $0x48] sm:$0xff] }
 0x3db   :  { %5130 = vmatprep.subr.bf16.mxu0 %v5129_v30  ;;  %v5153_v29 = vpack.c.bf16 %v2780_v24, %v2779_v7 }
 0x490   :  { %v4282_v35 = vpop.f32.mrb[56].mxu0 }
 0x491   :  { %v2594_v60 = vadd.f32 %v4282_v35, %v4027_v39  ;;  %v2588_v37 = vpop.f32.mrb[57].mxu0  ;;  %v2783_v35 = vld [vmem:[%s8263_s16 + $0x60] sm:$0xff] }
 0x492   :  { %v2589_v12 = vadd.f32 %v4027_v39, %v2588_v37 }
 0x493   :  { %v2628_v48 = vmax.f32 %v2594_v60, 0.0  ;;  %v2784_v60 = vld [vmem:[%s8263_s16 + $0x68] sm:$0xff] }
 0x494   :  { %v2627_v38 = vmax.f32 %v2589_v12, 0.0  ;;  %v4285_v32 = vpop.f32.mrb[58].mxu0  ;;  %v5161_v37 = vpack.c.bf16 %v2784_v60, %v2783_v35  ;;  %v2785_v12 = vld [vmem:[%s8263_s16 + $0x70] sm:$0xff] }
 0x495   :  { %v2604_v34 = vadd.f32 %v4285_v32, %v4027_v39  ;;  %v2598_v61 = vpop.f32.mrb[59].mxu0  ;;  %v5165_v57 = vpack.c.bf16 %v2786_v49, %v2785_v12  ;;  %v3042_v32 = vld [vmem:[%s8265_s19 + $0x8] sm:$0xff] }
 0x496   :  { %v2599_v59 = vadd.f32 %v4027_v39, %v2598_v61  ;;  %4324 = vmatprep.mubr.f32.mxu0 %v2627_v38  ;;  %v3041_v38 = vld [vmem:[%s8265_s19] sm:$0xff]  ;;  %v3044_v61 = vld [vmem:[%s8265_s19 + $0x18] sm:$0xff] }
 0x497   :  { %4325 = vmatmul.mubr.f32.vlgmr.msra.gmra.mrb[64].mxu0 %v2628_v48  ;;  %v2630_v55 = vmax.f32 %v2604_v34, 0.0  ;;  %v8090_v48 = vpack.c.bf16 %v3042_v32, %v3041_v38  ;;  %v3043_v34 = vld [vmem:[%s8265_s19 + $0x10] sm:$0xff] }
 0x498   :  { %v2629_v18 = vmax.f32 %v2599_v59, 0.0  ;;  %v4288_v62 = vpop.f32.mrb[60].mxu0  ;;  %5132 = vmatpush3.bf16.msra.mxu0 %v5129_v30  ;;  %v2782_v30 = vld [vmem:[%s8263_s16 + $0x58] sm:$0xff]  ;;  %v4036_v59 = vld [vmem:[%s8266_s15] ss:$0 sm:$0xff] }
 0x499   :  { %v2614_v27 = vadd.f32 %v4288_v62, %v4027_v39  ;;  %v2608_v50 = vpop.f32.mrb[61].mxu0  ;;  %5134 = vmatprep.subr.bf16.mxu0 %v5133_v6  ;;  %5207 = vmatpush3.bf16.msra.mxu1 %v8090_v48 }
 0x49a   :  { %v2609_v42 = vadd.f32 %v4027_v39, %v2608_v50  ;;  %4327 = vmatprep.mubr.f32.mxu0 %v2629_v18  ;;  %5208 = vmatprep.subr.bf16.mxu1 %v5464_v54 }
 0x49b   :  { %4328 = vmatmul.mubr.f32.gmra.mrb[66].mxu0 %v2630_v55  ;;  %v2632_v21 = vmax.f32 %v2614_v27, 0.0 }
 0x49c   :  { %v2631_v31 = vmax.f32 %v2609_v42, 0.0  ;;  %v4291_v22 = vpop.f32.mrb[62].mxu0  ;;  %5136 = vmatpush3.bf16.msra.mxu0 %v5133_v6  ;;  %v8100_v6 = vpack.c.bf16 %v3044_v61, %v3043_v34 }
 0x49d   :  { %v2624_v58 = vadd.f32 %v4291_v22, %v4027_v39  ;;  %v2618_v25 = vpop.f32.mrb[63].mxu0  ;;  %5138 = vmatprep.subr.bf16.mxu0 %v5137_v1 }
 0x49e   :  { %v2619_v10 = vadd.f32 %v4027_v39, %v2618_v25  ;;  %4330 = vmatprep.mubr.f32.mxu0 %v2631_v31  ;;  %v5157_v39 = vpack.c.bf16 %v2782_v30, %v2781_v20  ;;  %5210 = vmatpush3.bf16.msra.mxu1 %v8100_v6  ;;  %v3046_v20 = vld [vmem:[%s8269_s3] sm:$0xff] }
 0x49f   :  { %4331 = vmatmul.mubr.f32.gmra.mrb[68].mxu0 %v2632_v21  ;;  %v2634_v63 = vmax.f32 %v2624_v58, 0.0  ;;  %5217 = vmatprep.subr.bf16.mxu1 %v5464_v54 }
 0x4a0   :  { %v2633_v26 = vmax.f32 %v2619_v10, 0.0 }
 0x4a2   :  { %4333 = vmatprep.mubr.f32.mxu0 %v2633_v26 }
 0x4a3   :  { %4334 = vmatmul.mubr.f32.gmra.mrb[70].mxu0 %v2634_v63 }
 0x4a4   :  { %4344 = vmatprep.mubr.msk.f32.mxu0 %vm2791_vm4, %v2316_v8 }
 0x4a7   :  { %4345 = vmatmul.mubr.msk.f32.vlgmr.msra.gmra.mrb[72].mxu0 %vm2791_vm4, %v2317_v33  ;;  %v3045_v33 = vld [vmem:[%s8267_s2] sm:$0xff]  ;;  %s5467_s2 = smov 64  }
 0x4a8   :  { %4347 = vmatprep.mubr.msk.f32.mxu0 %vm2791_vm4, %v2318_v14  ;;  %5140 = vmatpush3.bf16.msra.mxu0 %v5137_v1 }
 0x4a9   :  { %5142 = vmatprep.subr.bf16.mxu0 %v5141_v56 }
 0x4ab   :  { %4348 = vmatmul.mubr.msk.f32.gmra.mrb[74].mxu0 %vm2791_vm4, %v2319_v16 }
 0x4ac   :  { %4350 = vmatprep.mubr.msk.f32.mxu0 %vm2791_vm4, %v2320_v2  ;;  %5144 = vmatpush3.bf16.msra.mxu0 %v5141_v56 }
 0x4ad   :  { %5146 = vmatprep.subr.bf16.mxu0 %v5145_v36 }
 0x4af   :  { %4351 = vmatmul.mubr.msk.f32.gmra.mrb[76].mxu0 %vm2791_vm4, %v2321_v17 }
 0x4b0   :  { %4353 = vmatprep.mubr.msk.f32.mxu0 %vm2791_vm4, %v2322_v43  ;;  %5148 = vmatpush3.bf16.msra.mxu0 %v5145_v36 }
 0x4b1   :  { %5150 = vmatprep.subr.bf16.mxu0 %v5149_v3 }
 0x4b3   :  { %4354 = vmatmul.mubr.msk.f32.gmra.mrb[78].mxu0 %vm2791_vm4, %v2323_v45 }
 0x4b4   :  { %5152 = vmatpush3.bf16.msra.mxu0 %v5149_v3 }
 0x4b5   :  { %5154 = vmatprep.subr.bf16.mxu0 %v5153_v29 }
 0x4b8   :  { %5156 = vmatpush3.bf16.msra.mxu0 %v5153_v29 }
 0x4b9   :  { %5158 = vmatprep.subr.bf16.mxu0 %v5157_v39 }
 0x4bc   :  { %5160 = vmatpush3.bf16.msra.mxu0 %v5157_v39 }
 0x4bd   :  { %5162 = vmatprep.subr.bf16.mxu0 %v5161_v37 }
 0x4c0   :  { %5164 = vmatpush3.bf16.msra.mxu0 %v5161_v37 }
 0x4c1   :  { %5166 = vmatprep.subr.bf16.mxu0 %v5165_v57 }
 0x4c4   :  { %5168 = vmatpush3.bf16.msra.mxu0 %v5165_v57 }
 0x4c5   :  { %5169 = vmatprep.subr.bf16.mxu0 %v5464_v54 }
 0x56a   :  { %v4326_v23 = vpop.f32.mrb[64].mxu0 }
 0x56b   :  { %v2730_v4 = vadd.f32 %v4326_v23, %v4036_v59  ;;  %v2724_v18 = vpop.f32.mrb[65].mxu0 }
 0x56c   :  { %v2725_v62 = vadd.f32 %v4036_v59, %v2724_v18 }
 0x56d   :  { %v2764_v50 = vmax.f32 %v2730_v4, 0.0 }
 0x56e   :  { %v2763_v55 = vmax.f32 %v2725_v62, 0.0  ;;  %v4329_v27 = vpop.f32.mrb[66].mxu0 }
 0x56f   :  { %v2740_v1 = vadd.f32 %v4329_v27, %v4036_v59  ;;  %v2734_v42 = vpop.f32.mrb[67].mxu0 }
 0x570   :  { %v2735_v5 = vadd.f32 %v4036_v59, %v2734_v42  ;;  %4388 = vmatprep.mubr.f32.mxu0 %v2763_v55 }
 0x571   :  { %4389 = vmatmul.mubr.f32.vlgmr.msra.gmra.mrb[72].mxu0 %v2764_v50  ;;  %v2766_v21 = vmax.f32 %v2740_v1, 0.0 }
 0x572   :  { %v2765_v31 = vmax.f32 %v2735_v5, 0.0  ;;  %v4332_v22 = vpop.f32.mrb[68].mxu0  ;;  %5171 = vmatpush3.bf16.msra.mxu0 %v8090_v48 }
 0x573   :  { %v2750_v58 = vadd.f32 %v4332_v22, %v4036_v59  ;;  %v2744_v25 = vpop.f32.mrb[69].mxu0  ;;  %5172 = vmatprep.subr.bf16.mxu0 %v5464_v54 }
 0x574   :  { %v2745_v51 = vadd.f32 %v4036_v59, %v2744_v25  ;;  %4391 = vmatprep.mubr.f32.mxu0 %v2765_v31 }
 0x575   :  { %4392 = vmatmul.mubr.f32.gmra.mrb[74].mxu0 %v2766_v21  ;;  %v2768_v47 = vmax.f32 %v2750_v58, 0.0 }
 0x576   :  { %v2767_v10 = vmax.f32 %v2745_v51, 0.0  ;;  %v4335_v26 = vpop.f32.mrb[70].mxu0  ;;  %5174 = vmatpush3.bf16.msra.mxu0 %v8100_v6 }
 0x577   :  { %v2760_v63 = vadd.f32 %v4335_v26, %v4036_v59  ;;  %v2754_v8 = vpop.f32.mrb[71].mxu0  ;;  %5175 = vmatprep.subr.bf16.mxu0 %v5464_v54 }
 0x578   :  { %v2755_v19 = vadd.f32 %v4036_v59, %v2754_v8  ;;  %4394 = vmatprep.mubr.f32.mxu0 %v2767_v10 }
 0x579   :  { %4395 = vmatmul.mubr.f32.gmra.mrb[76].mxu0 %v2768_v47  ;;  %v2770_v52 = vmax.f32 %v2760_v63, 0.0 }
 0x57a   :  { %v2769_v13 = vmax.f32 %v2755_v19, 0.0 }
 0x57c   :  { %4397 = vmatprep.mubr.f32.mxu0 %v2769_v13 }
 0x57d   :  { %4398 = vmatmul.mubr.f32.gmra.mrb[78].mxu0 %v2770_v52 }
 0x57e   :  { %4408 = vmatprep.mubr.msk.f32.mxu0 %vm5466_vm5, %v5465_v11 }
 0x581   :  { %4409 = vmatmul.mubr.msk.f32.vlgmr.msra.gmra.mrb[80].mxu0 %vm2791_vm4, %v3045_v33 }
 0x582   :  { %5177 = vmatpush3.bf16.msra.mxu0 %v8090_v48  ;;  %4419 = vmatprep.mubr.msk.f32.mxu0 %vm5466_vm5, %v5465_v11 }
 0x583   :  { %5178 = vmatprep.subr.bf16.mxu0 %v5464_v54 }
 0x586   :  { %5180 = vmatpush3.bf16.msra.mxu0 %v8100_v6 }
 0x587   :  { %5181 = vmatprep.subr.bf16.mxu0 %v5464_v54 }
 0x644   :  { %v4390_v56 = vpop.f32.mrb[72].mxu0 }
 0x645   :  { %v3034_v14 = vadd.f32 %v4390_v56, %v4045_v40  ;;  %v2987_v9 = vpop.f32.mrb[73].mxu0 }
 0x646   :  { %v3033_v43 = vadd.f32 %v4045_v40, %v2987_v9 }
 0x648   :  { %v4393_v46 = vpop.f32.mrb[74].mxu0 }
 0x649   :  { %v8128_v28 = vadd.f32 %v4393_v46, %v4045_v40  ;;  %v2997_v16 = vpop.f32.mrb[75].mxu0 }
 0x64a   :  { %v8130_v0 = vadd.f32 %v4045_v40, %v2997_v16 }
 0x64c   :  { %v4396_v36 = vpop.f32.mrb[76].mxu0 }
 0x64d   :  { %v8132_v2 = vadd.f32 %v4396_v36, %v4045_v40  ;;  %v3007_v41 = vpop.f32.mrb[77].mxu0 }
 0x64e   :  { %v8134_v15 = vadd.f32 %v4045_v40, %v3007_v41 }
 0x650   :  { %v4399_v53 = vpop.f32.mrb[78].mxu0 }
 0x651   :  { %v8136_v17 = vadd.f32 %v4399_v53, %v4045_v40  ;;  %v3017_v44 = vpop.f32.mrb[79].mxu0 }
 0x652   :  { %v8138_v3 = vadd.f32 %v4045_v40, %v3017_v44 }
 0x654   :  { %v3116_v7 = vpop.f32.mrb[80].mxu0 }
 0x655   :  { %v3120_v24 = vadd.f32 %v3116_v7, %v3033_v43  ;;  %v4410_v45 = vpop.f32.mrb[81].mxu0 }
 0x657   :  { %5399 = vtanh.f32 %v3120_v24  ;;  %v4047_v30 = vmul.f32 -1.442695, %v3120_v24 }
 0x659   :  { %5401 = vpow2.f32 %v4047_v30 }
 0x661   :  { %v5400_v29 = vpop.eup %5399 }
 0x662   :  { %3134 = vrot.lane.b32.xlu0 %v5400_v29, %s5467_s2 }
 0x663   :  { %v5402_v39 = vpop.eup %5401 }
 0x664   :  { %v3124_v35 = vadd.f32 1.0, %v5402_v39 }
 0x666   :  { %3129 = vrot.lane.b32.xlu0 %v3046_v20, %s5468_s9  ;;  %5403 = vrcp.f32 %v3124_v35 }
 0x670   :  { %v5404_v60 = vpop.eup %5403 }
 0x6d4   :  { %v3135_v37 = vpop.permute.xlu0 %3134 }
 0x6d5   :  { %v3137_v12 = vmul.f32 %v5404_v60, %v3135_v37 }
 0x6d7   :  { %3139 = vrot.lane.b32.xlu1 %v3137_v12, %s5468_s9 }
 0x6d8   :  { %v3130_v49 = vpop.permute.xlu0 %3129 }
 0x6d9   :  { %v3132_v57 = vmul.f32 %v5404_v60, %v3130_v49 }
 0x749   :  { %v3140_v38 = vpop.permute.xlu1 %3139 }
 0x74a   :  { %v3142_v32 = vadd.f32 %v3140_v38, %v3132_v57 }
 0x74c   :  { %5405 = vtanh.f32 %v3142_v32 }
 0x756   :  { %v5406_v34 = vpop.eup %5405 }
 0x757   :  { %3145 = vrot.lane.b32.xlu1 %v5406_v34, %s5467_s2 }
 0x7c9   :  { %v3146_v61 = vpop.permute.xlu1 %3145 }
 0x7ca   :  { %v3148_v59 = vmul.f32 %v5404_v60, %v3146_v61 }
 0x7cc   :  { %3150 = vrot.lane.b32.xlu0 %v3148_v59, %s5468_s9 }
 0x83e   :  { %v3151_v23 = vpop.permute.xlu0 %3150 }
 0x83f   :  { %4420 = vmatmul.mubr.msk.f32.vlgmr.msra.gmra.mrb[82].mxu0 %vm2791_vm4, %v3151_v23 }
 0x840   :  { %5183 = vmatpush3.bf16.msra.mxu0 %v8090_v48  ;;  %4430 = vmatprep.mubr.msk.f32.mxu0 %vm5466_vm5, %v5465_v11 }
 0x841   :  { %5184 = vmatprep.subr.bf16.mxu0 %v5464_v54 }
 0x844   :  { %5186 = vmatpush3.bf16.msra.mxu0 %v8100_v6 }
 0x845   :  { %5187 = vmatprep.subr.bf16.mxu0 %v5464_v54 }
 0x912   :  { %v3220_v4 = vpop.f32.mrb[82].mxu0 }
 0x913   :  { %v3224_v18 = vadd.f32 %v3220_v4, %v3034_v14  ;;  %v4421_v62 = vpop.f32.mrb[83].mxu0 }
 0x915   :  { %5407 = vtanh.f32 %v3224_v18  ;;  %v4049_v27 = vmul.f32 -1.442695, %v3224_v18 }
 0x917   :  { %5409 = vpow2.f32 %v4049_v27 }
 0x91f   :  { %v5408_v55 = vpop.eup %5407 }
 0x920   :  { %3234 = vrot.lane.b32.xlu1 %v5408_v55, %s5467_s2 }
 0x921   :  { %v5410_v50 = vpop.eup %5409 }
 0x922   :  { %v3228_v1 = vadd.f32 1.0, %v5410_v50 }
 0x924   :  { %5411 = vrcp.f32 %v3228_v1 }
 0x92e   :  { %v5412_v42 = vpop.eup %5411 }
 0x92f   :  { %v3232_v22 = vmul.f32 %v5412_v42, %v3142_v32 }
 0x992   :  { %v3235_v5 = vpop.permute.xlu1 %3234 }
 0x993   :  { %v3237_v31 = vmul.f32 %v5412_v42, %v3235_v5 }
 0x995   :  { %3239 = vrot.lane.b32.xlu0 %v3237_v31, %s5468_s9 }
 0xa07   :  { %v3240_v21 = vpop.permute.xlu0 %3239 }
 0xa08   :  { %v3242_v58 = vadd.f32 %v3240_v21, %v3232_v22 }
 0xa0a   :  { %5413 = vtanh.f32 %v3242_v58 }
 0xa14   :  { %v5414_v25 = vpop.eup %5413 }
 0xa15   :  { %3245 = vrot.lane.b32.xlu1 %v5414_v25, %s5467_s2 }
 0xa87   :  { %v3246_v51 = vpop.permute.xlu1 %3245 }
 0xa88   :  { %v3248_v10 = vmul.f32 %v5412_v42, %v3246_v51 }
 0xa8a   :  { %3250 = vrot.lane.b32.xlu0 %v3248_v10, %s5468_s9 }
 0xafc   :  { %v3251_v26 = vpop.permute.xlu0 %3250 }
 0xafd   :  { %4431 = vmatmul.mubr.msk.f32.vlgmr.msra.gmra.mrb[84].mxu0 %vm2791_vm4, %v3251_v26 }
 0xafe   :  { %5189 = vmatpush3.bf16.msra.mxu0 %v8090_v48  ;;  %4441 = vmatprep.mubr.msk.f32.mxu0 %vm5466_vm5, %v5465_v11 }
 0xaff   :  { %5190 = vmatprep.subr.bf16.mxu0 %v5464_v54 }
 0xb02   :  { %5192 = vmatpush3.bf16.msra.mxu0 %v8100_v6 }
 0xb03   :  { %5193 = vmatprep.subr.bf16.mxu0 %v5464_v54 }
 0xbd0   :  { %v3320_v47 = vpop.f32.mrb[84].mxu0 }
 0xbd1   :  { %v3324_v63 = vadd.f32 %v3320_v47, %v8130_v0  ;;  %v4432_v8 = vpop.f32.mrb[85].mxu0 }
 0xbd3   :  { %5415 = vtanh.f32 %v3324_v63  ;;  %v4051_v13 = vmul.f32 -1.442695, %v3324_v63 }
 0xbd5   :  { %5417 = vpow2.f32 %v4051_v13 }
 0xbdd   :  { %v5416_v19 = vpop.eup %5415 }
 0xbde   :  { %3334 = vrot.lane.b32.xlu1 %v5416_v19, %s5467_s2 }
 0xbdf   :  { %v5418_v52 = vpop.eup %5417 }
 0xbe0   :  { %v3328_v33 = vadd.f32 1.0, %v5418_v52 }
 0xbe2   :  { %5419 = vrcp.f32 %v3328_v33 }
 0xbec   :  { %v5420_v40 = vpop.eup %5419 }
 0xbed   :  { %v3332_v9 = vmul.f32 %v5420_v40, %v3242_v58 }
 0xc50   :  { %v3335_v56 = vpop.permute.xlu1 %3334 }
 0xc51   :  { %v3337_v14 = vmul.f32 %v5420_v40, %v3335_v56 }
 0xc53   :  { %3339 = vrot.lane.b32.xlu0 %v3337_v14, %s5468_s9 }
 0xcc5   :  { %v3340_v46 = vpop.permute.xlu0 %3339 }
 0xcc6   :  { %v3342_v16 = vadd.f32 %v3340_v46, %v3332_v9 }
 0xcc8   :  { %5421 = vtanh.f32 %v3342_v16 }
 0xcd2   :  { %v5422_v0 = vpop.eup %5421 }
 0xcd3   :  { %3345 = vrot.lane.b32.xlu1 %v5422_v0, %s5467_s2 }
 0xd45   :  { %v3346_v36 = vpop.permute.xlu1 %3345 }
 0xd46   :  { %v3348_v41 = vmul.f32 %v5420_v40, %v3346_v36 }
 0xd48   :  { %3350 = vrot.lane.b32.xlu0 %v3348_v41, %s5468_s9 }
 0xdba   :  { %v3351_v53 = vpop.permute.xlu0 %3350 }
 0xdbb   :  { %4442 = vmatmul.mubr.msk.f32.vlgmr.msra.gmra.mrb[86].mxu0 %vm2791_vm4, %v3351_v53 }
 0xdbc   :  { %5195 = vmatpush3.bf16.msra.mxu0 %v8090_v48  ;;  %4452 = vmatprep.mubr.msk.f32.mxu0 %vm5466_vm5, %v5465_v11 }
 0xdbd   :  { %5196 = vmatprep.subr.bf16.mxu0 %v5464_v54 }
 0xdc0   :  { %5198 = vmatpush3.bf16.msra.mxu0 %v8100_v6 }
 0xdc1   :  { %5199 = vmatprep.subr.bf16.mxu0 %v5464_v54 }
 0xe8e   :  { %v3420_v44 = vpop.f32.mrb[86].mxu0 }
 0xe8f   :  { %v3424_v43 = vadd.f32 %v3420_v44, %v8128_v28  ;;  %v4443_v7 = vpop.f32.mrb[87].mxu0 }
 0xe91   :  { %5423 = vtanh.f32 %v3424_v43  ;;  %v4053_v45 = vmul.f32 -1.442695, %v3424_v43 }
 0xe93   :  { %5425 = vpow2.f32 %v4053_v45 }
 0xe9b   :  { %v5424_v24 = vpop.eup %5423 }
 0xe9c   :  { %3434 = vrot.lane.b32.xlu1 %v5424_v24, %s5467_s2 }
 0xe9d   :  { %v5426_v29 = vpop.eup %5425 }
 0xe9e   :  { %v3428_v20 = vadd.f32 1.0, %v5426_v29 }
 0xea0   :  { %5427 = vrcp.f32 %v3428_v20 }
 0xeaa   :  { %v5428_v30 = vpop.eup %5427 }
 0xeab   :  { %v3432_v60 = vmul.f32 %v5428_v30, %v3342_v16 }
 0xf0e   :  { %v3435_v39 = vpop.permute.xlu1 %3434 }
 0xf0f   :  { %v3437_v35 = vmul.f32 %v5428_v30, %v3435_v39 }
 0xf11   :  { %3439 = vrot.lane.b32.xlu0 %v3437_v35, %s5468_s9 }
 0xf83   :  { %v3440_v37 = vpop.permute.xlu0 %3439 }
 0xf84   :  { %v3442_v12 = vadd.f32 %v3440_v37, %v3432_v60 }
 0xf86   :  { %5429 = vtanh.f32 %v3442_v12 }
 0xf90   :  { %v5430_v28 = vpop.eup %5429 }
 0xf91   :  { %3445 = vrot.lane.b32.xlu1 %v5430_v28, %s5467_s2 }
0x1003   :  { %v3446_v49 = vpop.permute.xlu1 %3445 }
0x1004   :  { %v3448_v57 = vmul.f32 %v5428_v30, %v3446_v49 }
0x1006   :  { %3450 = vrot.lane.b32.xlu0 %v3448_v57, %s5468_s9 }
0x1078   :  { %v3451_v38 = vpop.permute.xlu0 %3450 }
0x1079   :  { %4453 = vmatmul.mubr.msk.f32.vlgmr.msra.gmra.mrb[88].mxu0 %vm2791_vm4, %v3451_v38 }
0x107a   :  { %5201 = vmatpush3.bf16.msra.mxu0 %v8090_v48  ;;  %4463 = vmatprep.mubr.msk.f32.mxu0 %vm5466_vm5, %v5465_v11 }
0x107b   :  { %5202 = vmatprep.subr.bf16.mxu0 %v5464_v54 }
0x107e   :  { %5204 = vmatpush3.bf16.msra.mxu0 %v8100_v6 }
0x107f   :  { %5211 = vmatprep.subr.bf16.mxu0 %v5464_v54 }
0x114c   :  { %v3520_v32 = vpop.f32.mrb[88].mxu0 }
0x114d   :  { %v3524_v34 = vadd.f32 %v3520_v32, %v8134_v15  ;;  %v4454_v61 = vpop.f32.mrb[89].mxu0 }
0x114e   :  { %v3860_v61 = vld [vmem:[%s8270_s20 + $0x8] sm:$0xff] }
0x114f   :  { %5431 = vtanh.f32 %v3524_v34  ;;  %v4055_v23 = vmul.f32 -1.442695, %v3524_v34 }
0x1151   :  { %5433 = vpow2.f32 %v4055_v23 }
0x1159   :  { %v5432_v59 = vpop.eup %5431 }
0x115a   :  { %3534 = vrot.lane.b32.xlu1 %v5432_v59, %s5467_s2  ;;  %v3861_v59 = vld [vmem:[%s8270_s20 + $0x10] sm:$0xff] }
0x115b   :  { %v5434_v4 = vpop.eup %5433 }
0x115c   :  { %v3528_v18 = vadd.f32 1.0, %v5434_v4  ;;  %v3862_v4 = vld [vmem:[%s8270_s20 + $0x18] sm:$0xff] }
0x115e   :  { %5435 = vrcp.f32 %v3528_v18  ;;  %v5221_v18 = vpack.c.bf16 %v3862_v4, %v3861_v59 }
0x1168   :  { %v5436_v62 = vpop.eup %5435 }
0x1169   :  { %v3532_v50 = vmul.f32 %v5436_v62, %v3442_v12 }
0x11cc   :  { %v3535_v55 = vpop.permute.xlu1 %3534 }
0x11cd   :  { %v3537_v27 = vmul.f32 %v5436_v62, %v3535_v55 }
0x11cf   :  { %3539 = vrot.lane.b32.xlu0 %v3537_v27, %s5468_s9 }
0x1241   :  { %v3540_v1 = vpop.permute.xlu0 %3539 }
0x1242   :  { %v3542_v42 = vadd.f32 %v3540_v1, %v3532_v50  ;;  %v5469_v1 = vmov 5  }
0x1243   :  { %5398 = vset.pattern.permute.xlu0 %v5469_v1 }
0x1244   :  { %5437 = vtanh.f32 %v3542_v42 }
0x124e   :  { %v5438_v15 = vpop.eup %5437 }
0x124f   :  { %3545 = vrot.lane.b32.xlu1 %v5438_v15, %s5467_s2 }
0x12c1   :  { %v3546_v5 = vpop.permute.xlu1 %3545 }
0x12c2   :  { %v3548_v31 = vmul.f32 %v5436_v62, %v3546_v5 }
0x12c4   :  { %3550 = vrot.lane.b32.xlu0 %v3548_v31, %s5468_s9 }
0x1336   :  { %v3551_v22 = vpop.permute.xlu0 %3550 }
0x1337   :  { %4464 = vmatmul.mubr.msk.f32.vlgmr.msra.gmra.mrb[90].mxu0 %vm2791_vm4, %v3551_v22 }
0x1338   :  { %5213 = vmatpush3.bf16.msra.mxu0 %v8090_v48  ;;  %4485 = vmatprep.mubr.msk.f32.mxu0 %vm5466_vm5, %v5465_v11 }
0x1339   :  { %5214 = vmatprep.subr.bf16.mxu0 %v5464_v54 }
0x133c   :  { %5216 = vmatpush3.bf16.msra.mxu0 %v8100_v6 }
0x140a   :  { %v3620_v21 = vpop.f32.mrb[90].mxu0 }
0x140b   :  { %v3624_v58 = vadd.f32 %v3620_v21, %v8132_v2  ;;  %v4465_v25 = vpop.f32.mrb[91].mxu0 }
0x140d   :  { %5439 = vtanh.f32 %v3624_v58  ;;  %v4057_v10 = vmul.f32 -1.442695, %v3624_v58 }
0x140f   :  { %5441 = vpow2.f32 %v4057_v10 }
0x1417   :  { %v5440_v51 = vpop.eup %5439 }
0x1418   :  { %3634 = vrot.lane.b32.xlu1 %v5440_v51, %s5467_s2 }
0x1419   :  { %v5442_v26 = vpop.eup %5441 }
0x141a   :  { %v3628_v47 = vadd.f32 1.0, %v5442_v26 }
0x141c   :  { %5443 = vrcp.f32 %v3628_v47 }
0x1426   :  { %v5444_v48 = vpop.eup %5443 }
0x1427   :  { %v3632_v19 = vmul.f32 %v5444_v48, %v3542_v42 }
0x148a   :  { %v3635_v63 = vpop.permute.xlu1 %3634 }
0x148b   :  { %v3637_v8 = vmul.f32 %v5444_v48, %v3635_v63 }
0x148d   :  { %3639 = vrot.lane.b32.xlu0 %v3637_v8, %s5468_s9 }
0x14ff   :  { %v3640_v6 = vpop.permute.xlu0 %3639 }
0x1500   :  { %v3642_v13 = vadd.f32 %v3640_v6, %v3632_v19 }
0x1502   :  { %5445 = vtanh.f32 %v3642_v13 }
0x150c   :  { %v5446_v2 = vpop.eup %5445 }
0x150d   :  { %3645 = vrot.lane.b32.xlu1 %v5446_v2, %s5467_s2 }
0x157f   :  { %v3646_v52 = vpop.permute.xlu1 %3645 }
0x1580   :  { %v3648_v33 = vmul.f32 %v5444_v48, %v3646_v52 }
0x1582   :  { %3650 = vrot.lane.b32.xlu0 %v3648_v33, %s5468_s9 }
0x15f4   :  { %v3651_v40 = vpop.permute.xlu0 %3650 }
0x15f5   :  { %4475 = vmatmul.mubr.msk.f32.vlgmr.msra.gmra.mrb[64].mxu1 %vm2791_vm4, %v3651_v40 }
0x15f6   :  { %4496 = vmatprep.mubr.msk.f32.mxu1 %vm5466_vm5, %v5465_v11 }
0x16c8   :  { %v3720_v56 = vpop.f32.mrb[64].mxu1 }
0x16c9   :  { %v3724_v14 = vadd.f32 %v3720_v56, %v8138_v3  ;;  %v4476_v9 = vpop.f32.mrb[65].mxu1 }
0x16cb   :  { %5447 = vtanh.f32 %v3724_v14  ;;  %v4059_v16 = vmul.f32 -1.442695, %v3724_v14 }
0x16cd   :  { %5449 = vpow2.f32 %v4059_v16 }
0x16d5   :  { %v5448_v46 = vpop.eup %5447 }
0x16d6   :  { %3734 = vrot.lane.b32.xlu1 %v5448_v46, %s5467_s2 }
0x16d7   :  { %v5450_v0 = vpop.eup %5449 }
0x16d8   :  { %v3728_v36 = vadd.f32 1.0, %v5450_v0 }
0x16da   :  { %5451 = vrcp.f32 %v3728_v36 }
0x16e4   :  { %v5452_v41 = vpop.eup %5451 }
0x16e5   :  { %v3732_v43 = vmul.f32 %v5452_v41, %v3642_v13 }
0x1748   :  { %v3735_v53 = vpop.permute.xlu1 %3734 }
0x1749   :  { %v3737_v44 = vmul.f32 %v5452_v41, %v3735_v53 }
0x174b   :  { %3739 = vrot.lane.b32.xlu0 %v3737_v44, %s5468_s9 }
0x17bd   :  { %v3740_v11 = vpop.permute.xlu0 %3739 }
0x17be   :  { %v3742_v7 = vadd.f32 %v3740_v11, %v3732_v43 }
0x17c0   :  { %5453 = vtanh.f32 %v3742_v7 }
0x17ca   :  { %v5454_v3 = vpop.eup %5453 }
0x17cb   :  { %3745 = vrot.lane.b32.xlu1 %v5454_v3, %s5467_s2 }
0x183d   :  { %v3746_v24 = vpop.permute.xlu1 %3745 }
0x183e   :  { %v3748_v45 = vmul.f32 %v5452_v41, %v3746_v24 }
0x1840   :  { %3750 = vrot.lane.b32.xlu0 %v3748_v45, %s5468_s9 }
0x18b2   :  { %v3751_v29 = vpop.permute.xlu0 %3750 }
0x18b3   :  { %4486 = vmatmul.mubr.msk.f32.vlgmr.msra.gmra.mrb[92].mxu0 %vm2791_vm4, %v3751_v29 }
0x1986   :  { %v3820_v20 = vpop.f32.mrb[92].mxu0 }
0x1987   :  { %v3824_v30 = vadd.f32 %v3820_v20, %v8136_v17  ;;  %v4487_v39 = vpop.f32.mrb[93].mxu0  ;;  %v3859_v17 = vld [vmem:[%s8270_s20] sm:$0xff] }
0x1988   :  { %v5218_v23 = vpack.c.bf16 %v3860_v61, %v3859_v17 }
0x1989   :  { %5455 = vtanh.f32 %v3824_v30  ;;  %v4061_v60 = vmul.f32 -1.442695, %v3824_v30 }
0x198a   :  { %5219 = vmatpush3.bf16.msra.mxu1 %v5218_v23 }
0x198b   :  { %5457 = vpow2.f32 %v4061_v60  ;;  %5220 = vmatprep.subr.bf16.mxu1 %v5464_v54  ;;  %v4062_v54 = vld [vmem:[%s8272_s21] ss:$0 sm:$0xff] }
0x198e   :  { %5222 = vmatpush3.bf16.msra.mxu1 %v5221_v18 }
0x1993   :  { %v5456_v35 = vpop.eup %5455 }
0x1994   :  { %3834 = vrot.lane.b32.xlu1 %v5456_v35, %s5467_s2 }
0x1995   :  { %v5458_v37 = vpop.eup %5457 }
0x1996   :  { %v3828_v12 = vadd.f32 1.0, %v5458_v37 }
0x1998   :  { %5459 = vrcp.f32 %v3828_v12 }
0x19a2   :  { %v5460_v28 = vpop.eup %5459 }
0x19a3   :  { %v3832_v38 = vmul.f32 %v5460_v28, %v3742_v7 }
0x1a06   :  { %v3835_v49 = vpop.permute.xlu1 %3834 }
0x1a07   :  { %v3837_v57 = vmul.f32 %v5460_v28, %v3835_v49 }
0x1a09   :  { %3839 = vrot.lane.b32.xlu0 %v3837_v57, %s5468_s9 }
0x1a7b   :  { %v3840_v32 = vpop.permute.xlu0 %3839 }
0x1a7c   :  { %v3842_v34 = vadd.f32 %v3840_v32, %v3832_v38 }
0x1a7e   :  { %5461 = vtanh.f32 %v3842_v34 }
0x1a88   :  { %v5462_v62 = vpop.eup %5461 }
0x1a89   :  { %3845 = vrot.lane.b32.xlu1 %v5462_v62, %s5467_s2 }
0x1afb   :  { %v3846_v55 = vpop.permute.xlu1 %3845 }
0x1afc   :  { %v3848_v27 = vmul.f32 %v5460_v28, %v3846_v55 }
0x1afe   :  { %3850 = vrot.lane.b32.xlu0 %v3848_v27, %s5468_s9 }
0x1b70   :  { %v3851_v50 = vpop.permute.xlu0 %3850 }
0x1b71   :  { %3853 = vst.msk [vmem:[%s8271_s23] sm:$0xff] %vm2791_vm4, %v3851_v50  ;;  %4497 = vmatmul.mubr.msk.f32.vlgmr.msra.gmra.mrb[66].mxu1 %vm2791_vm4, %v3851_v50 }
0x1c44   :  { %v3938_v42 = vpop.f32.mrb[66].mxu1 }
0x1c45   :  { %v3939_v15 = vadd.f32 %v4062_v54, %v3938_v42  ;;  %v4498_v5 = vpop.f32.mrb[67].mxu1 }
0x1c47   :  { %3944 = vperm.xlu0 %5398, %v3939_v15   ;;  %v3949_v31 = vsel %vm3948_vm6, %v3939_v15, 0.0 }
0x1c48   :  { %3950 = vadd.xlane.f32.xlu1 %v3949_v31 }
0x1c4b   :  { %3855 = vrot.lane.b32.xlu0 %v3842_v34, %s5470_s12 }
0x1cc6   :  { %v3945_v22 = vpop.permute.xlu0 %3944 }
0x1cc7   :  { %v3947_v25 = vadd.f32 %v3945_v22, %v3939_v15 }
0x1cca   :  { %v3856_v21 = vpop.permute.xlu0 %3855 }
0x1ccb   :  { %3858 = vst.msk [vmem:[%s8273_s24] sm:$0xff] %vm2791_vm4, %v3856_v21 }
0x1cd5   :  { %v3951_v58 = vpop.xlane.xlu1 %3950 }
0x1cd6   :  { %v3953_v51 = vmul.f32 0.2, %v3951_v58 }
0x1cd8   :  { %v3954_v10 = vsub.f32 %v3947_v25, %v3953_v51 }
0x1cda   :  { %3955 = vst.msk [vmem:[%s8274_s22] sm:$0xff] %vm3948_vm6, %v3954_v10 }

</bundles_post_ra>
